<compile_context>
chip_gen: v7x
topology: tpu7x:2x2x1
jax: 0.10.0
libtpu: 0.0.40
codegen_flags: <defaults>
</compile_context>

<pallas_src>
import functools

import jax
import jax.numpy as jnp
from jax.experimental import pallas as pl
from jax.experimental.pallas import tpu as pltpu


_PARAM_ORDER = (
    "wq", "bq", "wk", "bk", "wv", "bv", "wo", "bo",
    "g1", "be1",
    "w1", "bf1", "w2", "bf2",
    "g2", "be2",
)


# ----------------------------- kernel ---------------------------------------


def _layer_norm(x, gamma, beta, eps=1e-5):
    """Single-pass LayerNorm: var = E[x^2] - E[x]^2 (one read of x for both stats)."""
    mean = jnp.mean(x, axis=-1, keepdims=True)
    mean_sq = jnp.mean(x * x, axis=-1, keepdims=True)
    var = mean_sq - mean * mean
    inv = jax.lax.rsqrt(var + eps)
    return (x - mean) * inv * gamma + beta


def encoder_stack_kernel(
    x_ref, bias_ref,
    wq_ref, bq_ref, wk_ref, bk_ref, wv_ref, bv_ref, wo_ref, bo_ref,
    g1_ref, be1_ref,
    w1_ref, bf1_ref, w2_ref, bf2_ref,
    g2_ref, be2_ref,
    o_ref,
    x_scr,
    *, n_heads,
):
    layer = pl.program_id(1)
    n_layers = pl.num_programs(1)

    Bt, S, D = x_ref.shape
    M = Bt * S
    dh = D // n_heads
    BH = Bt * n_heads

    # Load the batch-block activation into the resident f32 scratch at layer 0.
    @pl.when(layer == 0)
    def _():
        x_scr[...] = x_ref[...].reshape(M, D).astype(jnp.float32)

    x = x_scr[...]                      # (M, D) f32, resident across layers
    xb = x.astype(jnp.bfloat16)

    # --- Multi-head self attention (bf16 MXU, f32 accumulation) --------------
    # NOTE: 1/sqrt(dh) is already folded into wq/bq by the wrapper.
    q = jnp.dot(xb, wq_ref[0], preferred_element_type=jnp.float32) + bq_ref[0]
    k = jnp.dot(xb, wk_ref[0], preferred_element_type=jnp.float32) + bk_ref[0]
    v = jnp.dot(xb, wv_ref[0], preferred_element_type=jnp.float32) + bv_ref[0]

    def split_heads(t):  # (M, D) f32 -> (Bt*H, S, dh) bf16 (relayout done in bf16)
        t = t.astype(jnp.bfloat16).reshape(Bt, S, n_heads, dh)
        return t.transpose(0, 2, 1, 3).reshape(BH, S, dh)

    qh, kh, vh = split_heads(q), split_heads(k), split_heads(v)

    scores = jnp.einsum("bqd,bkd->bqk", qh, kh,
                        preferred_element_type=jnp.float32)          # (BH, S, S)
    # bias block is (Bt, 1, S, S) bf16, broadcast over heads, promoted to f32.
    scores = scores.reshape(Bt, n_heads, S, S) + bias_ref[...]

    m = jnp.max(scores, axis=-1, keepdims=True)
    p = jnp.exp(scores - m)
    # approx=True uses the EUP reciprocal slot (~1e-4 rel err vs exact divide).
    p = p * pl.reciprocal(jnp.sum(p, axis=-1, keepdims=True), approx=True)

    ctx = jnp.einsum("bqk,bkd->bqd",
                     p.reshape(BH, S, S).astype(jnp.bfloat16), vh,
                     preferred_element_type=jnp.float32)             # (BH, S, dh)
    attn = (ctx.astype(jnp.bfloat16)
               .reshape(Bt, n_heads, S, dh)
               .transpose(0, 2, 1, 3)
               .reshape(M, D))                                       # head concat
    attn = jnp.dot(attn, wo_ref[0],
                   preferred_element_type=jnp.float32) + bo_ref[0]

    # --- Add & Norm 1 ---------------------------------------------------------
    x1 = _layer_norm(attn + x, g1_ref[0], be1_ref[0])

    # --- Position-wise feed forward (ReLU) ------------------------------------
    h = jnp.dot(x1.astype(jnp.bfloat16), w1_ref[0],
                preferred_element_type=jnp.float32) + bf1_ref[0]
    h = jnp.maximum(h, 0.0).astype(jnp.bfloat16)                     # bf16 right away
    h2 = jnp.dot(h, w2_ref[0], preferred_element_type=jnp.float32) + bf2_ref[0]

    # --- Add & Norm 2 ---------------------------------------------------------
    out = _layer_norm(h2 + x1, g2_ref[0], be2_ref[0])

    x_scr[...] = out                    # carry activation to next layer

    @pl.when(layer == n_layers - 1)
    def _():
        o_ref[...] = out.reshape(Bt, S, D).astype(o_ref.dtype)


# ----------------------------- wrapper ---------------------------------------


def _vmem_limit_bytes():
    cap = 128 * 1024 * 1024
    try:
        cap = int(getattr(pltpu.get_tpu_info(), "vmem_capacity_bytes", cap))
    except Exception:
        pass
    return int(min(0.75 * cap, 100 * 1024 * 1024))


def _pick_batch_block(B, S, max_rows=2048):
    """Largest divisor of B whose folded M = Bt*S stays within max_rows."""
    for bt in range(B, 0, -1):
        if B % bt == 0 and bt * S <= max_rows:
            return bt
    return 1


def encoder_forward(x, src_mask, stacked, n_heads, batch_block=None):
    """Full Encoder stack. x: (B, S, D) f32, src_mask: (B, 1, S, S), 1=attend/0=mask."""
    B, S, D = x.shape
    n_layers = stacked["wq"].shape[0]

    Bt = batch_block if batch_block is not None else _pick_batch_block(B, S)
    assert B % Bt == 0, "batch_block must divide batch size"
    num_bb = B // Bt

    # Additive attention bias precomputed once (not per layer), stored bf16.
    bias = jnp.where(src_mask == 0.0, jnp.float32(-1e9),
                     jnp.float32(0.0)).astype(jnp.bfloat16)          # (B, 1, S, S)

    def weight_spec(shape):
        nz = len(shape) - 1
        return pl.BlockSpec((1,) + tuple(shape[1:]),
                            lambda bb, l, nz=nz: (l,) + (0,) * nz)

    in_specs = [
        pl.BlockSpec((Bt, S, D), lambda bb, l: (bb, 0, 0)),          # x (read at l==0)
        pl.BlockSpec((Bt, 1, S, S), lambda bb, l: (bb, 0, 0, 0)),    # bias (l-invariant)
    ] + [weight_spec(stacked[name].shape) for name in _PARAM_ORDER]

    kernel = functools.partial(encoder_stack_kernel, n_heads=n_heads)

    return pl.pallas_call(
        kernel,
        out_shape=jax.ShapeDtypeStruct((B, S, D), x.dtype),
        grid_spec=pltpu.PrefetchScalarGridSpec(
            num_scalar_prefetch=0,
            # Batch-block OUTER, layer INNER: weights stream (B/Bt) * L times
            # (once total when the whole batch folds into one block).
            grid=(num_bb, n_layers),
            in_specs=in_specs,
            out_specs=pl.BlockSpec((Bt, S, D), lambda bb, l: (bb, 0, 0)),
            scratch_shapes=[pltpu.VMEM((Bt * S, D), jnp.float32)],
        ),
        compiler_params=pltpu.CompilerParams(
            dimension_semantics=("parallel", "arbitrary"),
            vmem_limit_bytes=_vmem_limit_bytes(),
        ),
    )(x, bias, *[stacked[name] for name in _PARAM_ORDER])


# ----------------------------- params ----------------------------------------


def init_layer_params(key, d_model, ffn_depth):
    ks = jax.random.split(key, 6)
    bound_d = 1.0 / jnp.sqrt(jnp.float32(d_model))
    bound_f = 1.0 / jnp.sqrt(jnp.float32(ffn_depth))

    def lin(k, shape, bound):
        return jax.random.uniform(k, shape, jnp.float32, -bound, bound)

    return {
        "wq": lin(ks[0], (d_model, d_model), bound_d),
        "bq": jnp.zeros((1, d_model), jnp.float32),
        "wk": lin(ks[1], (d_model, d_model), bound_d),
        "bk": jnp.zeros((1, d_model), jnp.float32),
        "wv": lin(ks[2], (d_model, d_model), bound_d),
        "bv": jnp.zeros((1, d_model), jnp.float32),
        "wo": lin(ks[3], (d_model, d_model), bound_d),
        "bo": jnp.zeros((1, d_model), jnp.float32),
        "g1": jnp.ones((1, d_model), jnp.float32),
        "be1": jnp.zeros((1, d_model), jnp.float32),
        "w1": lin(ks[4], (d_model, ffn_depth), bound_d),
        "bf1": jnp.zeros((1, ffn_depth), jnp.float32),
        "w2": lin(ks[5], (ffn_depth, d_model), bound_f),
        "bf2": jnp.zeros((1, d_model), jnp.float32),
        "g2": jnp.ones((1, d_model), jnp.float32),
        "be2": jnp.zeros((1, d_model), jnp.float32),
    }


def stack_params(layer_params, n_heads):
    """Stack per-layer params along a leading L axis; fold attn scale into wq/bq;
    cast matmul weights to bf16 (f32 accumulation happens in-kernel)."""
    d_model = layer_params[0]["wq"].shape[0]
    dh = d_model // n_heads
    scale = 1.0 / jnp.sqrt(jnp.float32(dh))

    stacked = {k: jnp.stack([p[k] for p in layer_params], axis=0)
               for k in _PARAM_ORDER}
    stacked["wq"] = stacked["wq"] * scale
    stacked["bq"] = stacked["bq"] * scale
    for k in ("wq", "wk", "wv", "wo", "w1", "w2"):
        stacked[k] = stacked[k].astype(jnp.bfloat16)
    return stacked


# ----------------------------- reference --------------------------------------


def encoder_reference(x, src_mask, stacked, n_heads):
    """Pure-JAX reference of the PyTorch Encoder forward (inference mode)."""
    B, S, D = x.shape
    L = stacked["wq"].shape[0]
    dh = D // n_heads
    bias = jnp.where(src_mask == 0.0, jnp.float32(-1e9), jnp.float32(0.0))
    h = x.astype(jnp.float32)
    for l in range(L):
        p = {k: stacked[k][l].astype(jnp.float32) for k in _PARAM_ORDER}
        q = h @ p["wq"] + p["bq"]          # scale already folded in
        k_ = h @ p["wk"] + p["bk"]
        v = h @ p["wv"] + p["bv"]

        def sh(t):
            return t.reshape(B, S, n_heads, dh).transpose(0, 2, 1, 3)

        qh, kh, vh = sh(q), sh(k_), sh(v)
        sc = jnp.einsum("bhqd,bhkd->bhqk", qh, kh) + bias
        w = jax.nn.softmax(sc, axis=-1)
        ctx = jnp.einsum("bhqk,bhkd->bhqd", w, vh)
        attn = ctx.transpose(0, 2, 1, 3).reshape(B, S, D) @ p["wo"] + p["bo"]
        x1 = _layer_norm(attn + h, p["g1"], p["be1"])
        f = jnp.maximum(x1 @ p["w1"] + p["bf1"], 0.0) @ p["w2"] + p["bf2"]
        h = _layer_norm(f + x1, p["g2"], p["be2"])
    return h


# ----------------------------- main -------------------------------------------


if __name__ == "__main__":
    # Small but lane-dense (D multiple of 128) demo shapes.
    B, S, D = 2, 16, 128
    n_heads = 4
    ffn_depth = 256
    n_layers = 2

    root = jax.random.PRNGKey(0)
    k_x, k_params = jax.random.split(root)

    x = jax.random.normal(k_x, (B, S, D), jnp.float32)

    # mask: 1 = attend, 0 = masked. Mask out the last 3 key positions of batch 1.
    src_mask = jnp.ones((B, 1, S, S), jnp.float32)
    src_mask = src_mask.at[1, :, :, S - 3:].set(0.0)

    layer_keys = jax.random.split(k_params, n_layers)
    layer_params = [init_layer_params(k, D, ffn_depth) for k in layer_keys]
    stacked = stack_params(layer_params, n_heads)

    out = encoder_forward(x, src_mask, stacked, n_heads)
    out = jax.block_until_ready(out)

    ref = encoder_reference(x, src_mask, stacked, n_heads)
    err = float(jnp.max(jnp.abs(out - ref)))

    assert out.shape == (B, S, D)
    assert jnp.all(jnp.isfinite(out))
    assert err < 5e-2, f"max |pallas - ref| = {err}"
    print("KERNEL_OK")
</pallas_src>

<mosaic_0001>
module attributes {stable_mosaic.version = 11 : i64} {
  func.func @encoder_stack_kernel(%arg0: i32, %arg1: i32, %arg2: memref<2x16x128xf32, #tpu.memory_space<vmem>>, %arg3: memref<2x1x16x16xbf16, #tpu.memory_space<vmem>>, %arg4: memref<1x128x128xbf16, #tpu.memory_space<vmem>>, %arg5: memref<1x1x128xf32, #tpu.memory_space<vmem>>, %arg6: memref<1x128x128xbf16, #tpu.memory_space<vmem>>, %arg7: memref<1x1x128xf32, #tpu.memory_space<vmem>>, %arg8: memref<1x128x128xbf16, #tpu.memory_space<vmem>>, %arg9: memref<1x1x128xf32, #tpu.memory_space<vmem>>, %arg10: memref<1x128x128xbf16, #tpu.memory_space<vmem>>, %arg11: memref<1x1x128xf32, #tpu.memory_space<vmem>>, %arg12: memref<1x1x128xf32, #tpu.memory_space<vmem>>, %arg13: memref<1x1x128xf32, #tpu.memory_space<vmem>>, %arg14: memref<1x128x256xbf16, #tpu.memory_space<vmem>>, %arg15: memref<1x1x256xf32, #tpu.memory_space<vmem>>, %arg16: memref<1x256x128xbf16, #tpu.memory_space<vmem>>, %arg17: memref<1x1x128xf32, #tpu.memory_space<vmem>>, %arg18: memref<1x1x128xf32, #tpu.memory_space<vmem>>, %arg19: memref<1x1x128xf32, #tpu.memory_space<vmem>>, %arg20: memref<2x16x128xf32, #tpu.memory_space<vmem>>, %arg21: memref<32x128xf32, #tpu.memory_space<vmem>>) attributes {dimension_semantics = [#tpu.dimension_semantics<parallel>, #tpu.dimension_semantics<arbitrary>], iteration_bounds = array<i64: 1, 2>, scalar_prefetch = 0 : i64, scratch_operands = 1 : i64, tpu.core_type = #tpu.core_type<tc>, window_params = [{transform_indices = @transform_0, window_bounds = array<i64: 2, 16, 128>}, {transform_indices = @transform_1, window_bounds = array<i64: 2, 1, 16, 16>}, {transform_indices = @transform_2, window_bounds = array<i64: 1, 128, 128>}, {transform_indices = @transform_3, window_bounds = array<i64: 1, 1, 128>}, {transform_indices = @transform_4, window_bounds = array<i64: 1, 128, 128>}, {transform_indices = @transform_5, window_bounds = array<i64: 1, 1, 128>}, {transform_indices = @transform_6, window_bounds = array<i64: 1, 128, 128>}, {transform_indices = @transform_7, window_bounds = array<i64: 1, 1, 128>}, {transform_indices = @transform_8, window_bounds = array<i64: 1, 128, 128>}, {transform_indices = @transform_9, window_bounds = array<i64: 1, 1, 128>}, {transform_indices = @transform_10, window_bounds = array<i64: 1, 1, 128>}, {transform_indices = @transform_11, window_bounds = array<i64: 1, 1, 128>}, {transform_indices = @transform_12, window_bounds = array<i64: 1, 128, 256>}, {transform_indices = @transform_13, window_bounds = array<i64: 1, 1, 256>}, {transform_indices = @transform_14, window_bounds = array<i64: 1, 256, 128>}, {transform_indices = @transform_15, window_bounds = array<i64: 1, 1, 128>}, {transform_indices = @transform_16, window_bounds = array<i64: 1, 1, 128>}, {transform_indices = @transform_17, window_bounds = array<i64: 1, 1, 128>}, {transform_indices = @transform_18, window_bounds = array<i64: 2, 16, 128>}]} {
    %c0_i32 = arith.constant 0 : i32
    %0 = arith.cmpi eq, %arg1, %c0_i32 : i32
    %1 = arith.extui %0 : i1 to i32
    %c0_i32_0 = arith.constant 0 : i32
    %2 = arith.cmpi ne, %1, %c0_i32_0 : i32
    scf.if %2 {
      %c0_77 = arith.constant 0 : index
      %c0_78 = arith.constant 0 : index
      %c0_79 = arith.constant 0 : index
      %144 = vector.load %arg2[%c0_77, %c0_78, %c0_79] : memref<2x16x128xf32, #tpu.memory_space<vmem>>, vector<2x16x128xf32>
      %145 = vector.shape_cast %144 : vector<2x16x128xf32> to vector<32x128xf32>
      %c0_80 = arith.constant 0 : index
      %c0_81 = arith.constant 0 : index
      %146 = vector.load %arg21[%c0_80, %c0_81] : memref<32x128xf32, #tpu.memory_space<vmem>>, vector<32x128xf32>
      tpu.vector_store %arg21[%c0_80, %c0_81], %145 {strides = array<i32>} : memref<32x128xf32, #tpu.memory_space<vmem>>, vector<32x128xf32>,
    } else {
    }
    %c0 = arith.constant 0 : index
    %c0_1 = arith.constant 0 : index
    %3 = vector.load %arg21[%c0, %c0_1] : memref<32x128xf32, #tpu.memory_space<vmem>>, vector<32x128xf32>
    %4 = arith.truncf %3 : vector<32x128xf32> to vector<32x128xbf16>
    %c0_2 = arith.constant 0 : index
    %c0_3 = arith.constant 0 : index
    %c0_4 = arith.constant 0 : index
    %5 = vector.load %arg4[%c0_2, %c0_3, %c0_4] : memref<1x128x128xbf16, #tpu.memory_space<vmem>>, vector<1x128x128xbf16>
    %6 = vector.shape_cast %5 : vector<1x128x128xbf16> to vector<128x128xbf16>
    %cst = arith.constant dense<0.000000e+00> : vector<32x128xf32>
    %7 = tpu.matmul %4, %6, %cst {dimension_numbers = #tpu.dot_dimension_numbers<[1], [0], [0], [1], [0, 0, 1, 1], [], []>} : vector<32x128xbf16>, vector<128x128xbf16>, vector<32x128xf32> -> vector<32x128xf32>
    %c0_5 = arith.constant 0 : index
    %c0_6 = arith.constant 0 : index
    %c0_7 = arith.constant 0 : index
    %8 = vector.load %arg5[%c0_5, %c0_6, %c0_7] : memref<1x1x128xf32, #tpu.memory_space<vmem>>, vector<1x1x128xf32>
    %9 = vector.shape_cast %8 : vector<1x1x128xf32> to vector<1x128xf32>
    %10 = vector.broadcast %9 : vector<1x128xf32> to vector<32x128xf32>
    %11 = arith.addf %7, %10 : vector<32x128xf32>
    %c0_8 = arith.constant 0 : index
    %c0_9 = arith.constant 0 : index
    %c0_10 = arith.constant 0 : index
    %12 = vector.load %arg6[%c0_8, %c0_9, %c0_10] : memref<1x128x128xbf16, #tpu.memory_space<vmem>>, vector<1x128x128xbf16>
    %13 = vector.shape_cast %12 : vector<1x128x128xbf16> to vector<128x128xbf16>
    %cst_11 = arith.constant dense<0.000000e+00> : vector<32x128xf32>
    %14 = tpu.matmul %4, %13, %cst_11 {dimension_numbers = #tpu.dot_dimension_numbers<[1], [0], [0], [1], [0, 0, 1, 1], [], []>} : vector<32x128xbf16>, vector<128x128xbf16>, vector<32x128xf32> -> vector<32x128xf32>
    %c0_12 = arith.constant 0 : index
    %c0_13 = arith.constant 0 : index
    %c0_14 = arith.constant 0 : index
    %15 = vector.load %arg7[%c0_12, %c0_13, %c0_14] : memref<1x1x128xf32, #tpu.memory_space<vmem>>, vector<1x1x128xf32>
    %16 = vector.shape_cast %15 : vector<1x1x128xf32> to vector<1x128xf32>
    %17 = vector.broadcast %16 : vector<1x128xf32> to vector<32x128xf32>
    %18 = arith.addf %14, %17 : vector<32x128xf32>
    %c0_15 = arith.constant 0 : index
    %c0_16 = arith.constant 0 : index
    %c0_17 = arith.constant 0 : index
    %19 = vector.load %arg8[%c0_15, %c0_16, %c0_17] : memref<1x128x128xbf16, #tpu.memory_space<vmem>>, vector<1x128x128xbf16>
    %20 = vector.shape_cast %19 : vector<1x128x128xbf16> to vector<128x128xbf16>
    %cst_18 = arith.constant dense<0.000000e+00> : vector<32x128xf32>
    %21 = tpu.matmul %4, %20, %cst_18 {dimension_numbers = #tpu.dot_dimension_numbers<[1], [0], [0], [1], [0, 0, 1, 1], [], []>} : vector<32x128xbf16>, vector<128x128xbf16>, vector<32x128xf32> -> vector<32x128xf32>
    %c0_19 = arith.constant 0 : index
    %c0_20 = arith.constant 0 : index
    %c0_21 = arith.constant 0 : index
    %22 = vector.load %arg9[%c0_19, %c0_20, %c0_21] : memref<1x1x128xf32, #tpu.memory_space<vmem>>, vector<1x1x128xf32>
    %23 = vector.shape_cast %22 : vector<1x1x128xf32> to vector<1x128xf32>
    %24 = vector.broadcast %23 : vector<1x128xf32> to vector<32x128xf32>
    %25 = arith.addf %21, %24 : vector<32x128xf32>
    %26 = arith.truncf %11 : vector<32x128xf32> to vector<32x128xbf16>
    %27 = vector.shape_cast %26 : vector<32x128xbf16> to vector<2x16x4x32xbf16>
    %28 = tpu.transpose %27, [0, 2, 1, 3] : vector<2x16x4x32xbf16> -> vector<2x4x16x32xbf16>
    %29 = vector.shape_cast %28 : vector<2x4x16x32xbf16> to vector<8x16x32xbf16>
    %30 = arith.truncf %18 : vector<32x128xf32> to vector<32x128xbf16>
    %31 = vector.shape_cast %30 : vector<32x128xbf16> to vector<2x16x4x32xbf16>
    %32 = tpu.transpose %31, [0, 2, 1, 3] : vector<2x16x4x32xbf16> -> vector<2x4x16x32xbf16>
    %33 = vector.shape_cast %32 : vector<2x4x16x32xbf16> to vector<8x16x32xbf16>
    %34 = arith.truncf %25 : vector<32x128xf32> to vector<32x128xbf16>
    %35 = vector.shape_cast %34 : vector<32x128xbf16> to vector<2x16x4x32xbf16>
    %36 = tpu.transpose %35, [0, 2, 1, 3] : vector<2x16x4x32xbf16> -> vector<2x4x16x32xbf16>
    %37 = vector.shape_cast %36 : vector<2x4x16x32xbf16> to vector<8x16x32xbf16>
    "tpu.trace_start"() <{level = 10 : i32, message = "bqd,bkd->bqk"}> : () -> ()
    %cst_22 = arith.constant dense<0.000000e+00> : vector<8x16x16xf32>
    %38 = tpu.matmul %29, %33, %cst_22 {dimension_numbers = #tpu.dot_dimension_numbers<[2], [2], [1], [1], [0, 0, 0, 1, 1, 1], [0], [0]>} : vector<8x16x32xbf16>, vector<8x16x32xbf16>, vector<8x16x16xf32> -> vector<8x16x16xf32>
    "tpu.trace_stop"() : () -> ()
    %39 = vector.shape_cast %38 : vector<8x16x16xf32> to vector<2x4x16x16xf32>
    %c0_23 = arith.constant 0 : index
    %c0_24 = arith.constant 0 : index
    %c0_25 = arith.constant 0 : index
    %c0_26 = arith.constant 0 : index
    %40 = vector.load %arg3[%c0_23, %c0_24, %c0_25, %c0_26] : memref<2x1x16x16xbf16, #tpu.memory_space<vmem>>, vector<2x1x16x16xbf16>
    %41 = arith.extf %40 : vector<2x1x16x16xbf16> to vector<2x1x16x16xf32>
    %42 = vector.broadcast %41 : vector<2x1x16x16xf32> to vector<2x4x16x16xf32>
    %43 = arith.addf %39, %42 : vector<2x4x16x16xf32>
    %cst_27 = arith.constant dense<0xFF800000> : vector<2x4x16xf32>
    %44 = vector.multi_reduction <maximumf>, %43, %cst_27 [3] : vector<2x4x16x16xf32> to vector<2x4x16xf32>
    %45 = vector.shape_cast %44 : vector<2x4x16xf32> to vector<2x4x16x1xf32>
    %46 = vector.broadcast %45 : vector<2x4x16x1xf32> to vector<2x4x16x16xf32>
    %47 = arith.subf %43, %46 : vector<2x4x16x16xf32>
    %48 = math.exp %47 : vector<2x4x16x16xf32>
    %cst_28 = arith.constant dense<0.000000e+00> : vector<2x4x16xf32>
    %49 = vector.multi_reduction <add>, %48, %cst_28 [3] : vector<2x4x16x16xf32> to vector<2x4x16xf32>
    %50 = vector.shape_cast %49 : vector<2x4x16xf32> to vector<2x4x16x1xf32>
    %51 = tpu.reciprocal %50 {approx = true} : vector<2x4x16x1xf32> -> vector<2x4x16x1xf32>
    %52 = vector.broadcast %51 : vector<2x4x16x1xf32> to vector<2x4x16x16xf32>
    %53 = arith.mulf %48, %52 : vector<2x4x16x16xf32>
    %54 = vector.shape_cast %53 : vector<2x4x16x16xf32> to vector<8x16x16xf32>
    %55 = arith.truncf %54 : vector<8x16x16xf32> to vector<8x16x16xbf16>
    "tpu.trace_start"() <{level = 10 : i32, message = "bqk,bkd->bqd"}> : () -> ()
    %cst_29 = arith.constant dense<0.000000e+00> : vector<8x16x32xf32>
    %56 = tpu.matmul %55, %37, %cst_29 {dimension_numbers = #tpu.dot_dimension_numbers<[2], [1], [1], [2], [0, 0, 0, 1, 1, 2], [0], [0]>} : vector<8x16x16xbf16>, vector<8x16x32xbf16>, vector<8x16x32xf32> -> vector<8x16x32xf32>
    "tpu.trace_stop"() : () -> ()
    %57 = arith.truncf %56 : vector<8x16x32xf32> to vector<8x16x32xbf16>
    %58 = vector.shape_cast %57 : vector<8x16x32xbf16> to vector<2x4x16x32xbf16>
    %59 = tpu.transpose %58, [0, 2, 1, 3] : vector<2x4x16x32xbf16> -> vector<2x16x4x32xbf16>
    %60 = vector.shape_cast %59 : vector<2x16x4x32xbf16> to vector<32x128xbf16>
    %c0_30 = arith.constant 0 : index
    %c0_31 = arith.constant 0 : index
    %c0_32 = arith.constant 0 : index
    %61 = vector.load %arg10[%c0_30, %c0_31, %c0_32] : memref<1x128x128xbf16, #tpu.memory_space<vmem>>, vector<1x128x128xbf16>
    %62 = vector.shape_cast %61 : vector<1x128x128xbf16> to vector<128x128xbf16>
    %cst_33 = arith.constant dense<0.000000e+00> : vector<32x128xf32>
    %63 = tpu.matmul %60, %62, %cst_33 {dimension_numbers = #tpu.dot_dimension_numbers<[1], [0], [0], [1], [0, 0, 1, 1], [], []>} : vector<32x128xbf16>, vector<128x128xbf16>, vector<32x128xf32> -> vector<32x128xf32>
    %c0_34 = arith.constant 0 : index
    %c0_35 = arith.constant 0 : index
    %c0_36 = arith.constant 0 : index
    %64 = vector.load %arg11[%c0_34, %c0_35, %c0_36] : memref<1x1x128xf32, #tpu.memory_space<vmem>>, vector<1x1x128xf32>
    %65 = vector.shape_cast %64 : vector<1x1x128xf32> to vector<1x128xf32>
    %66 = vector.broadcast %65 : vector<1x128xf32> to vector<32x128xf32>
    %67 = arith.addf %63, %66 : vector<32x128xf32>
    %68 = arith.addf %67, %3 : vector<32x128xf32>
    %c0_37 = arith.constant 0 : index
    %c0_38 = arith.constant 0 : index
    %c0_39 = arith.constant 0 : index
    %69 = vector.load %arg12[%c0_37, %c0_38, %c0_39] : memref<1x1x128xf32, #tpu.memory_space<vmem>>, vector<1x1x128xf32>
    %70 = vector.shape_cast %69 : vector<1x1x128xf32> to vector<1x128xf32>
    %c0_40 = arith.constant 0 : index
    %c0_41 = arith.constant 0 : index
    %c0_42 = arith.constant 0 : index
    %71 = vector.load %arg13[%c0_40, %c0_41, %c0_42] : memref<1x1x128xf32, #tpu.memory_space<vmem>>, vector<1x1x128xf32>
    %72 = vector.shape_cast %71 : vector<1x1x128xf32> to vector<1x128xf32>
    %cst_43 = arith.constant dense<0.000000e+00> : vector<32xf32>
    %73 = vector.multi_reduction <add>, %68, %cst_43 [1] : vector<32x128xf32> to vector<32xf32>
    %74 = vector.shape_cast %73 : vector<32xf32> to vector<32x1xf32>
    %cst_44 = arith.constant 1.280000e+02 : f32
    %75 = vector.broadcast %cst_44 : f32 to vector<32x1xf32>
    %76 = arith.divf %74, %75 : vector<32x1xf32>
    %77 = arith.mulf %68, %68 : vector<32x128xf32>
    %cst_45 = arith.constant dense<0.000000e+00> : vector<32xf32>
    %78 = vector.multi_reduction <add>, %77, %cst_45 [1] : vector<32x128xf32> to vector<32xf32>
    %79 = vector.shape_cast %78 : vector<32xf32> to vector<32x1xf32>
    %cst_46 = arith.constant 1.280000e+02 : f32
    %80 = vector.broadcast %cst_46 : f32 to vector<32x1xf32>
    %81 = arith.divf %79, %80 : vector<32x1xf32>
    %82 = arith.mulf %76, %76 : vector<32x1xf32>
    %83 = arith.subf %81, %82 : vector<32x1xf32>
    %cst_47 = arith.constant 9.99999974E-6 : f32
    %84 = vector.broadcast %cst_47 : f32 to vector<32x1xf32>
    %85 = arith.addf %83, %84 : vector<32x1xf32>
    %86 = math.rsqrt %85 : vector<32x1xf32>
    %87 = vector.broadcast %76 : vector<32x1xf32> to vector<32x128xf32>
    %88 = arith.subf %68, %87 : vector<32x128xf32>
    %89 = vector.broadcast %86 : vector<32x1xf32> to vector<32x128xf32>
    %90 = arith.mulf %88, %89 : vector<32x128xf32>
    %91 = vector.broadcast %70 : vector<1x128xf32> to vector<32x128xf32>
    %92 = arith.mulf %90, %91 : vector<32x128xf32>
    %93 = vector.broadcast %72 : vector<1x128xf32> to vector<32x128xf32>
    %94 = arith.addf %92, %93 : vector<32x128xf32>
    %95 = arith.truncf %94 : vector<32x128xf32> to vector<32x128xbf16>
    %c0_48 = arith.constant 0 : index
    %c0_49 = arith.constant 0 : index
    %c0_50 = arith.constant 0 : index
    %96 = vector.load %arg14[%c0_48, %c0_49, %c0_50] : memref<1x128x256xbf16, #tpu.memory_space<vmem>>, vector<1x128x256xbf16>
    %97 = vector.shape_cast %96 : vector<1x128x256xbf16> to vector<128x256xbf16>
    %cst_51 = arith.constant dense<0.000000e+00> : vector<32x256xf32>
    %98 = tpu.matmul %95, %97, %cst_51 {dimension_numbers = #tpu.dot_dimension_numbers<[1], [0], [0], [1], [0, 0, 1, 1], [], []>} : vector<32x128xbf16>, vector<128x256xbf16>, vector<32x256xf32> -> vector<32x256xf32>
    %c0_52 = arith.constant 0 : index
    %c0_53 = arith.constant 0 : index
    %c0_54 = arith.constant 0 : index
    %99 = vector.load %arg15[%c0_52, %c0_53, %c0_54] : memref<1x1x256xf32, #tpu.memory_space<vmem>>, vector<1x1x256xf32>
    %100 = vector.shape_cast %99 : vector<1x1x256xf32> to vector<1x256xf32>
    %101 = vector.broadcast %100 : vector<1x256xf32> to vector<32x256xf32>
    %102 = arith.addf %98, %101 : vector<32x256xf32>
    %cst_55 = arith.constant 0.000000e+00 : f32
    %103 = vector.broadcast %cst_55 : f32 to vector<32x256xf32>
    %104 = arith.maximumf %102, %103 : vector<32x256xf32>
    %105 = arith.truncf %104 : vector<32x256xf32> to vector<32x256xbf16>
    %c0_56 = arith.constant 0 : index
    %c0_57 = arith.constant 0 : index
    %c0_58 = arith.constant 0 : index
    %106 = vector.load %arg16[%c0_56, %c0_57, %c0_58] : memref<1x256x128xbf16, #tpu.memory_space<vmem>>, vector<1x256x128xbf16>
    %107 = vector.shape_cast %106 : vector<1x256x128xbf16> to vector<256x128xbf16>
    %cst_59 = arith.constant dense<0.000000e+00> : vector<32x128xf32>
    %108 = tpu.matmul %105, %107, %cst_59 {dimension_numbers = #tpu.dot_dimension_numbers<[1], [0], [0], [1], [0, 0, 1, 1], [], []>} : vector<32x256xbf16>, vector<256x128xbf16>, vector<32x128xf32> -> vector<32x128xf32>
    %c0_60 = arith.constant 0 : index
    %c0_61 = arith.constant 0 : index
    %c0_62 = arith.constant 0 : index
    %109 = vector.load %arg17[%c0_60, %c0_61, %c0_62] : memref<1x1x128xf32, #tpu.memory_space<vmem>>, vector<1x1x128xf32>
    %110 = vector.shape_cast %109 : vector<1x1x128xf32> to vector<1x128xf32>
    %111 = vector.broadcast %110 : vector<1x128xf32> to vector<32x128xf32>
    %112 = arith.addf %108, %111 : vector<32x128xf32>
    %113 = arith.addf %112, %94 : vector<32x128xf32>
    %c0_63 = arith.constant 0 : index
    %c0_64 = arith.constant 0 : index
    %c0_65 = arith.constant 0 : index
    %114 = vector.load %arg18[%c0_63, %c0_64, %c0_65] : memref<1x1x128xf32, #tpu.memory_space<vmem>>, vector<1x1x128xf32>
    %115 = vector.shape_cast %114 : vector<1x1x128xf32> to vector<1x128xf32>
    %c0_66 = arith.constant 0 : index
    %c0_67 = arith.constant 0 : index
    %c0_68 = arith.constant 0 : index
    %116 = vector.load %arg19[%c0_66, %c0_67, %c0_68] : memref<1x1x128xf32, #tpu.memory_space<vmem>>, vector<1x1x128xf32>
    %117 = vector.shape_cast %116 : vector<1x1x128xf32> to vector<1x128xf32>
    %cst_69 = arith.constant dense<0.000000e+00> : vector<32xf32>
    %118 = vector.multi_reduction <add>, %113, %cst_69 [1] : vector<32x128xf32> to vector<32xf32>
    %119 = vector.shape_cast %118 : vector<32xf32> to vector<32x1xf32>
    %cst_70 = arith.constant 1.280000e+02 : f32
    %120 = vector.broadcast %cst_70 : f32 to vector<32x1xf32>
    %121 = arith.divf %119, %120 : vector<32x1xf32>
    %122 = arith.mulf %113, %113 : vector<32x128xf32>
    %cst_71 = arith.constant dense<0.000000e+00> : vector<32xf32>
    %123 = vector.multi_reduction <add>, %122, %cst_71 [1] : vector<32x128xf32> to vector<32xf32>
    %124 = vector.shape_cast %123 : vector<32xf32> to vector<32x1xf32>
    %cst_72 = arith.constant 1.280000e+02 : f32
    %125 = vector.broadcast %cst_72 : f32 to vector<32x1xf32>
    %126 = arith.divf %124, %125 : vector<32x1xf32>
    %127 = arith.mulf %121, %121 : vector<32x1xf32>
    %128 = arith.subf %126, %127 : vector<32x1xf32>
    %cst_73 = arith.constant 9.99999974E-6 : f32
    %129 = vector.broadcast %cst_73 : f32 to vector<32x1xf32>
    %130 = arith.addf %128, %129 : vector<32x1xf32>
    %131 = math.rsqrt %130 : vector<32x1xf32>
    %132 = vector.broadcast %121 : vector<32x1xf32> to vector<32x128xf32>
    %133 = arith.subf %113, %132 : vector<32x128xf32>
    %134 = vector.broadcast %131 : vector<32x1xf32> to vector<32x128xf32>
    %135 = arith.mulf %133, %134 : vector<32x128xf32>
    %136 = vector.broadcast %115 : vector<1x128xf32> to vector<32x128xf32>
    %137 = arith.mulf %135, %136 : vector<32x128xf32>
    %138 = vector.broadcast %117 : vector<1x128xf32> to vector<32x128xf32>
    %139 = arith.addf %137, %138 : vector<32x128xf32>
    %c0_74 = arith.constant 0 : index
    %c0_75 = arith.constant 0 : index
    %140 = vector.load %arg21[%c0_74, %c0_75] : memref<32x128xf32, #tpu.memory_space<vmem>>, vector<32x128xf32>
    tpu.vector_store %arg21[%c0_74, %c0_75], %139 {strides = array<i32>} : memref<32x128xf32, #tpu.memory_space<vmem>>, vector<32x128xf32>,
    %c1_i32 = arith.constant 1 : i32
    %141 = arith.cmpi eq, %arg1, %c1_i32 : i32
    %142 = arith.extui %141 : i1 to i32
    %c0_i32_76 = arith.constant 0 : i32
    %143 = arith.cmpi ne, %142, %c0_i32_76 : i32
    scf.if %143 {
      %144 = vector.shape_cast %139 : vector<32x128xf32> to vector<2x16x128xf32>
      %c0_77 = arith.constant 0 : index
      %c0_78 = arith.constant 0 : index
      %c0_79 = arith.constant 0 : index
      %145 = vector.load %arg20[%c0_77, %c0_78, %c0_79] : memref<2x16x128xf32, #tpu.memory_space<vmem>>, vector<2x16x128xf32>
      tpu.vector_store %arg20[%c0_77, %c0_78, %c0_79], %144 {strides = array<i32>} : memref<2x16x128xf32, #tpu.memory_space<vmem>>, vector<2x16x128xf32>,
    } else {
    }
    return
  }
  func.func @transform_0(%arg0: i32, %arg1: i32) -> (i32, i32, i32) {
    %c0_i32 = arith.constant 0 : i32
    %c0_i32_0 = arith.constant 0 : i32
    %c0_i32_1 = arith.constant 0 : i32
    return %arg0, %c0_i32, %c0_i32_0 : i32, i32, i32
  }
  func.func @transform_1(%arg0: i32, %arg1: i32) -> (i32, i32, i32, i32) {
    %c0_i32 = arith.constant 0 : i32
    %c0_i32_0 = arith.constant 0 : i32
    %c0_i32_1 = arith.constant 0 : i32
    %c0_i32_2 = arith.constant 0 : i32
    return %arg0, %c0_i32, %c0_i32_0, %c0_i32_1 : i32, i32, i32, i32
  }
  func.func @transform_2(%arg0: i32, %arg1: i32) -> (i32, i32, i32) {
    %c0_i32 = arith.constant 0 : i32
    %c0_i32_0 = arith.constant 0 : i32
    %c0_i32_1 = arith.constant 0 : i32
    return %arg1, %c0_i32, %c0_i32_0 : i32, i32, i32
  }
  func.func @transform_3(%arg0: i32, %arg1: i32) -> (i32, i32, i32) {
    %c0_i32 = arith.constant 0 : i32
    %c0_i32_0 = arith.constant 0 : i32
    %c0_i32_1 = arith.constant 0 : i32
    return %arg1, %c0_i32, %c0_i32_0 : i32, i32, i32
  }
  func.func @transform_4(%arg0: i32, %arg1: i32) -> (i32, i32, i32) {
    %c0_i32 = arith.constant 0 : i32
    %c0_i32_0 = arith.constant 0 : i32
    %c0_i32_1 = arith.constant 0 : i32
    return %arg1, %c0_i32, %c0_i32_0 : i32, i32, i32
  }
  func.func @transform_5(%arg0: i32, %arg1: i32) -> (i32, i32, i32) {
    %c0_i32 = arith.constant 0 : i32
    %c0_i32_0 = arith.constant 0 : i32
    %c0_i32_1 = arith.constant 0 : i32
    return %arg1, %c0_i32, %c0_i32_0 : i32, i32, i32
  }
  func.func @transform_6(%arg0: i32, %arg1: i32) -> (i32, i32, i32) {
    %c0_i32 = arith.constant 0 : i32
    %c0_i32_0 = arith.constant 0 : i32
    %c0_i32_1 = arith.constant 0 : i32
    return %arg1, %c0_i32, %c0_i32_0 : i32, i32, i32
  }
  func.func @transform_7(%arg0: i32, %arg1: i32) -> (i32, i32, i32) {
    %c0_i32 = arith.constant 0 : i32
    %c0_i32_0 = arith.constant 0 : i32
    %c0_i32_1 = arith.constant 0 : i32
    return %arg1, %c0_i32, %c0_i32_0 : i32, i32, i32
  }
  func.func @transform_8(%arg0: i32, %arg1: i32) -> (i32, i32, i32) {
    %c0_i32 = arith.constant 0 : i32
    %c0_i32_0 = arith.constant 0 : i32
    %c0_i32_1 = arith.constant 0 : i32
    return %arg1, %c0_i32, %c0_i32_0 : i32, i32, i32
  }
  func.func @transform_9(%arg0: i32, %arg1: i32) -> (i32, i32, i32) {
    %c0_i32 = arith.constant 0 : i32
    %c0_i32_0 = arith.constant 0 : i32
    %c0_i32_1 = arith.constant 0 : i32
    return %arg1, %c0_i32, %c0_i32_0 : i32, i32, i32
  }
  func.func @transform_10(%arg0: i32, %arg1: i32) -> (i32, i32, i32) {
    %c0_i32 = arith.constant 0 : i32
    %c0_i32_0 = arith.constant 0 : i32
    %c0_i32_1 = arith.constant 0 : i32
    return %arg1, %c0_i32, %c0_i32_0 : i32, i32, i32
  }
  func.func @transform_11(%arg0: i32, %arg1: i32) -> (i32, i32, i32) {
    %c0_i32 = arith.constant 0 : i32
    %c0_i32_0 = arith.constant 0 : i32
    %c0_i32_1 = arith.constant 0 : i32
    return %arg1, %c0_i32, %c0_i32_0 : i32, i32, i32
  }
  func.func @transform_12(%arg0: i32, %arg1: i32) -> (i32, i32, i32) {
    %c0_i32 = arith.constant 0 : i32
    %c0_i32_0 = arith.constant 0 : i32
    %c0_i32_1 = arith.constant 0 : i32
    return %arg1, %c0_i32, %c0_i32_0 : i32, i32, i32
  }
  func.func @transform_13(%arg0: i32, %arg1: i32) -> (i32, i32, i32) {
    %c0_i32 = arith.constant 0 : i32
    %c0_i32_0 = arith.constant 0 : i32
    %c0_i32_1 = arith.constant 0 : i32
    return %arg1, %c0_i32, %c0_i32_0 : i32, i32, i32
  }
  func.func @transform_14(%arg0: i32, %arg1: i32) -> (i32, i32, i32) {
    %c0_i32 = arith.constant 0 : i32
    %c0_i32_0 = arith.constant 0 : i32
    %c0_i32_1 = arith.constant 0 : i32
    return %arg1, %c0_i32, %c0_i32_0 : i32, i32, i32
  }
  func.func @transform_15(%arg0: i32, %arg1: i32) -> (i32, i32, i32) {
    %c0_i32 = arith.constant 0 : i32
    %c0_i32_0 = arith.constant 0 : i32
    %c0_i32_1 = arith.constant 0 : i32
    return %arg1, %c0_i32, %c0_i32_0 : i32, i32, i32
  }
  func.func @transform_16(%arg0: i32, %arg1: i32) -> (i32, i32, i32) {
    %c0_i32 = arith.constant 0 : i32
    %c0_i32_0 = arith.constant 0 : i32
    %c0_i32_1 = arith.constant 0 : i32
    return %arg1, %c0_i32, %c0_i32_0 : i32, i32, i32
  }
  func.func @transform_17(%arg0: i32, %arg1: i32) -> (i32, i32, i32) {
    %c0_i32 = arith.constant 0 : i32
    %c0_i32_0 = arith.constant 0 : i32
    %c0_i32_1 = arith.constant 0 : i32
    return %arg1, %c0_i32, %c0_i32_0 : i32, i32, i32
  }
  func.func @transform_18(%arg0: i32, %arg1: i32) -> (i32, i32, i32) {
    %c0_i32 = arith.constant 0 : i32
    %c0_i32_0 = arith.constant 0 : i32
    %c0_i32_1 = arith.constant 0 : i32
    return %arg0, %c0_i32, %c0_i32_0 : i32, i32, i32
  }
}

</mosaic_0001>

<bundles_post_ra>
// kernel: tpu_custom_call.1
= control target key start
LH: loop header
LB: loop body
LE: loop exit
PB: predicated region body
PF: predicated region fallthrough
CT: control target
= control target key end

     0   :  { %s8606_s0 = inlined_call_operand.hbm [shape: f32[2,16,128], index: 0, kind: input, shape index: {}]   ;;  %s8607_s1 = inlined_call_operand.hbm [shape: bf16[2,1,16,16], index: 1, kind: input, shape index: {}]   ;;  %s8608_s2 = inlined_call_operand.hbm [shape: bf16[2,128,128], index: 2, kind: input, shape index: {}]   ;;  %s8609_s3 = inlined_call_operand.hbm [shape: f32[2,1,128], index: 3, kind: input, shape index: {}]   ;;  %s8610_s4 = inlined_call_operand.hbm [shape: bf16[2,128,128], index: 4, kind: input, shape index: {}]   ;;  %s8611_s5 = inlined_call_operand.hbm [shape: f32[2,1,128], index: 5, kind: input, shape index: {}]   ;;  %s8612_s6 = inlined_call_operand.hbm [shape: bf16[2,128,128], index: 6, kind: input, shape index: {}]   ;;  %s8613_s7 = inlined_call_operand.hbm [shape: f32[2,1,128], index: 7, kind: input, shape index: {}]   ;;  %s8614_s8 = inlined_call_operand.hbm [shape: bf16[2,128,128], index: 8, kind: input, shape index: {}]   ;;  %s8615_s9 = inlined_call_operand.hbm [shape: f32[2,1,128], index: 9, kind: input, shape index: {}]   ;;  %s8616_s10 = inlined_call_operand.hbm [shape: f32[2,1,128], index: 10, kind: input, shape index: {}]   ;;  %s8617_s11 = inlined_call_operand.hbm [shape: f32[2,1,128], index: 11, kind: input, shape index: {}]   ;;  %s8618_s12 = inlined_call_operand.hbm [shape: bf16[2,128,256], index: 12, kind: input, shape index: {}]   ;;  %s8619_s13 = inlined_call_operand.hbm [shape: f32[2,1,256], index: 13, kind: input, shape index: {}]   ;;  %s8620_s14 = inlined_call_operand.hbm [shape: bf16[2,256,128], index: 14, kind: input, shape index: {}]   ;;  %s8621_s15 = inlined_call_operand.hbm [shape: f32[2,1,128], index: 15, kind: input, shape index: {}]   ;;  %s8622_s16 = inlined_call_operand.hbm [shape: f32[2,1,128], index: 16, kind: input, shape index: {}]   ;;  %s8623_s17 = inlined_call_operand.hbm [shape: f32[2,1,128], index: 17, kind: input, shape index: {}]   ;;  %s8624_s18 = inlined_call_operand.hbm [shape: f32[2,16,128], index: 18, kind: output, shape index: {}]  }
   0x1   :  { %8656 = sst [smem:[#allocation38_spill]] %s8606_s0 }
   0x2   :  { %8657 = sst [smem:[#allocation39_spill]] %s8607_s1 }
   0x3   :  { %8658 = sst [smem:[#allocation40_spill]] %s8608_s2 }
   0x4   :  { %8659 = sst [smem:[#allocation41_spill]] %s8609_s3 }
   0x5   :  { %8660 = sst [smem:[#allocation42_spill]] %s8610_s4 }
   0x6   :  { %8661 = sst [smem:[#allocation43_spill]] %s8611_s5 }
   0x7   :  { %8662 = sst [smem:[#allocation44_spill]] %s8612_s6 }
   0x8   :  { %8663 = sst [smem:[#allocation45_spill]] %s8619_s13 }
   0x9   :  { %8664 = sst [smem:[#allocation46_spill]] %s8620_s14 }
   0xa   :  { %8665 = sst [smem:[#allocation47_spill]] %s8621_s15 }
   0xb   :  { %8666 = sst [smem:[#allocation48_spill]] %s8622_s16 }
   0xc   :  { %8667 = sst [smem:[#allocation49_spill]] %s8623_s17 }
   0xd   :  { %8668 = sst [smem:[#allocation50_spill]] %s8624_s18 }
   0xe   :  { %23 = vsyncpa [#allocation4], 0 }
   0xf   :  { %24 = vsyncpa [#allocation7], 0 }
  0x10   :  { %25 = vsyncpa [#allocation5], 0  ;;  %s7133_s27 = smov 0   ;;  %s7135_s28 = smov 0  }
  0x11   :  { %s7137_s29 = smov 0   ;;  %s7139_s30 = smov 0  }
  0x12   :  { %s7141_s0 = smov 0   ;;  %s7143_s19 = smov 0  }
  0x13 LB: > { %8669 = sst [smem:[#allocation29_spill]] %s6983_s28  ;;  %s7162_s1 = sadd.s32 4294967295, %s6999_s19   ;;  %s6999_s19 = sphi %s7143_s19, %s31_s19   ;;  %s6995_s0 = sphi %s7141_s0, %s8721_s0   ;;  %s6991_s30 = sphi %s7139_s30, %s8720_s30   ;;  %s6987_s29 = sphi %s7137_s29, %s8718_s29   ;;  %s6983_s28 = sphi %s7135_s28, %s8717_s28   ;;  %s6979_s27 = sphi %s7133_s27, %s8716_s27  }
  0x14   : > { %8670 = sst [smem:[#allocation30_spill]] %s6987_s29  ;;  %s40_s20 = sadd.s32 1, %s6995_s0 }
  0x15   : > { %8671 = sst [smem:[#allocation31_spill]] %s6991_s30  ;;  %p41_p0 = scmp.ge.s32.totalorder %s40_s20, 2 }
  0x16   : > { %8672 = sst [smem:[#allocation32_spill]] %s6999_s19  ;;  %s102_s21 = sadd.s32 1, %s6987_s29 }
  0x17   : > { %8673 = sst [smem:[#allocation33_spill]] %s7162_s1  ;;  %p109_p1 = scmp.ne.s32.totalorder %s6987_s29, %s6983_s28 }
  0x18   : > { %p110_p2 = scmp.eq.s32.totalorder %s6999_s19, 0  ;;  %s8723_s20 = smov (%p41_p0, %s40_s20), 0 }
  0x19   : > { %8674 = sst [smem:[#allocation34_spill]] %s8723_s20  ;;  %p115_p4 = scmp.ne.s32.totalorder %s6983_s28, %s6979_s27 }
  0x1a   : > { %p7171_p3 = por %p110_p2, %p109_p1  ;;  %s99_s2 = ssub.s32 %s6995_s0, %s8723_s20 }
  0x1b   : > { %p8638_p5 = scmp.eq.s32.totalorder %s7162_s1, 0  ;;  %p100_p6 = scmp.eq.s32.totalorder %s99_s2, 0 }
  0x1c   : > { %s8675_s22 = scalar_select %p7171_p3, 1, 0 }
  0x1d   : > { %p5662_p7 = scmp.ge.s32.totalorder %s6999_s19, 1  ;;  %p7182_p8 = por %p8638_p5, %p115_p4 }
  0x1e   : > { %p542_p9 = scmp.lt.s32.totalorder %s6999_s19, 3  ;;  %s7001_s26 = smov [#allocation3]  }
  0x1f   : > { %s8676_s23 = scalar_select %p7182_p8, 1, 0 }
  0x20   : > { %s7188_s24 = scalar_select %p100_p6, %s6987_s29, %s102_s21  }
  0x21   : > { %8677 = sst [smem:[#allocation35_spill]] %s8676_s23  ;;  %p7190_p10 = pnand %p5662_p7, %p542_p9 }
  0x22   : > { %8678 = sst [smem:[#allocation36_spill]] %s7188_s24  ;;  %s558_s27 = sshll.u32 %s7001_s26, 4  ;;  %s559_s27 = int_to_ptr.vmem [resolvable:$true] %s558_s27 }
  0x23   : > { %s8679_s25 = scalar_select %p7190_p10, 1, 0 }
  0x24   : > { %p6169_p11 = pneg %p7190_p10  ;;  %s7002_s20 = smov [#allocation6]  }
  0x25   : > { %8680 = sst [smem:[#allocation37_spill]] %s8679_s25  ;;  %s575_s21 = sshll.u32 %s7002_s20, 4  ;;  %s7202_s21 = int_to_ptr.vmem [resolvable:$true] %s575_s21 }
  0x26   : > { %p7198_p12 = pnand %p6169_p11, %p8638_p5  ;;  %s8682_s30 = sld [smem:[#allocation38_spill]] }
  0x28   : > { %p6409_p0 = pneg %p7198_p12 }
  0x2c   : > { %s8683_s23 = smov %s8682_s30  ;;  %s6407_s28 = scalar_lea.hbm %s8682_s30, 512 }
  0x2d   : > { %p6408_p13 = scmp.ne.s32.totalorder %s8683_s23, %s6407_s28  ;;  %p6414_p4 = scmp.lt.u32.totalorder %s6407_s28, %s8683_s23 }
  0x2f   : > { %p6410_p1 = pnand %p6409_p0, %p6408_p13 }
  0x31   : > { %p6411_p2 = pneg %p6410_p1 }
  0x33   : > { %p6416_p6 = pnand %p6414_p4, %p6411_p2 }
  0x35   : > { %6419 = shalt.err (!%p6416_p6)
}
  0x36   : > { %s6420_s20 = scalar_lea.vmem %s559_s27, 512  ;;  %p6428_p5 = scmp.lt.s32.totalorder %s559_s27, %s559_s27 }
  0x37   : > { %p6421_p7 = scmp.ne.s32.totalorder %s559_s27, %s6420_s20  ;;  %p6429_p8 = scmp.lt.s32.totalorder %s6420_s20, %s6420_s20 }
  0x39   : > { %p6423_p9 = pnand %p6421_p7, %p6409_p0  ;;  %p6430_p10 = por %p6429_p8, %p6428_p5 }
  0x3b   : > { %p6424_p11 = pneg %p6423_p9 }
  0x3d   : > { %p6431_p3 = pnand %p6430_p10, %p6424_p11 }
  0x3f   : > { %6434 = shalt.err (!%p6431_p3)
}
  0x40   : > { %s7003_s17 = smov 128   ;;  %s7004_s18 = smov 8  }
  0x41   : > { %6172 = dma.hbm_to_vmem [thread:$0]  (!%p7198_p12), %s8683_s23, 512, %s559_s27, [#allocation4], %s7003_s17, %s7003_s17, %s7004_s18  }
  0x42   : > { %s8684_s25 = sld [smem:[#allocation39_spill]] }
  0x48   : > { %s6435_s26 = scalar_lea.hbm %s8684_s25, 256 }
  0x49   : > { %p6436_p13 = scmp.ne.s32.totalorder %s8684_s25, %s6435_s26  ;;  %p6442_p8 = scmp.lt.u32.totalorder %s6435_s26, %s8684_s25 }
  0x4b   : > { %p6438_p3 = pnand %p6436_p13, %p6409_p0 }
  0x4d   : > { %p6439_p5 = pneg %p6438_p3 }
  0x4f   : > { %p6444_p10 = pnand %p6442_p8, %p6439_p5 }
  0x51   : > { %6447 = shalt.err (!%p6444_p10)
}
  0x52   : > { %s6448_s27 = scalar_lea.vmem %s7202_s21, 256  ;;  %p6456_p6 = scmp.lt.s32.totalorder %s7202_s21, %s7202_s21 }
  0x53   : > { %p6449_p1 = scmp.ne.s32.totalorder %s7202_s21, %s6448_s27  ;;  %p6457_p7 = scmp.lt.s32.totalorder %s6448_s27, %s6448_s27 }
  0x55   : > { %p6451_p2 = pnand %p6449_p1, %p6409_p0  ;;  %p6458_p9 = por %p6457_p7, %p6456_p6 }
  0x57   : > { %p6452_p4 = pneg %p6451_p2 }
  0x59   : > { %p6459_p11 = pnand %p6458_p9, %p6452_p4 }
  0x5b   : > { %6462 = shalt.err (!%p6459_p11)
}
  0x5c   : > { %s7005_s14 = smov 64   ;;  %s7006_s15 = smov 4  }
  0x5d   : > { %6175 = dma.hbm_to_vmem [thread:$0]  (!%p7198_p12), %s8684_s25, 256, %s7202_s21, [#allocation7], %s7005_s14, %s7005_s14, %s7006_s15  }
  0x5e   : > { %p5665_p13 = scmp.ge.s32.totalorder %s6999_s19, 2 }
  0x5f   : > { %s589_s18 = sand.u32 (!%p5665_p13), 1, %s6999_s19   ;;  %s7254_s28 = sand.u32 (!%p5665_p13), 1, %s6987_s29  }
  0x60   : > { %585 = sbr.rel (%p5665_p13) target bundleno = 496 (0x1f0), region = 24  ;;  %s7257_s30 = sshll.u32 (!%p5665_p13), %s7254_s28, 6 }
  0x61   : > { %s7260_s1 = sshll.u32 (!%p5665_p13), %s6995_s0, 10  ;;  %s8685_s21 = sld [smem:[#allocation40_spill]] (!%p5665_p13) }
  0x62   : > { %s593_s20 = scalar_lea.vmem (!%p5665_p13), [#allocation8], %s7257_s30  ;;  %s7271_s14 = scalar_lea.sflag (!%p5665_p13), [#allocation4], %s589_s18 }
  0x63   : > { %s600_s27 = sshll.u32 (!%p5665_p13), %s593_s20, 4  ;;  %p8686_p0 = scmp.ne.s32.totalorder (!%p5665_p13), %s8675_s22, 0  ;;  %s7269_s27 = int_to_ptr.vmem [resolvable:$true] %s600_s27 }
  0x67   : > { %s7266_s26 = scalar_lea.hbm %s8685_s21, %s7260_s1  ;;  %s6467_s2 = scalar_lea.hbm %s8685_s21, 2048 }
  0x68   : > { %s6463_s15 = scalar_lea.hbm %s7266_s26, 1024  ;;  %p6468_p8 = scmp.lt.u32.totalorder %s7266_s26, %s8685_s21 }
  0x69   : > { %p6464_p12 = scmp.ne.s32.totalorder %s7266_s26, %s6463_s15  ;;  %p6469_p10 = scmp.lt.u32.totalorder %s6467_s2, %s6463_s15 }
  0x6a   : > { %p6471_p2 = scmp.lt.u32.totalorder %s6463_s15, %s7266_s26 }
  0x6b   : > { %p6465_p3 = pnand %p6464_p12, %p8686_p0  ;;  %p6470_p1 = por %p6469_p10, %p6468_p8 }
  0x6d   : > { %p6466_p5 = pneg %p6465_p3  ;;  %p6472_p4 = por %p6471_p2, %p6470_p1 }
  0x6f   : > { %p6473_p6 = pnand %p6472_p4, %p6466_p5 }
  0x71   : > { %6476 = shalt.err (!%p6473_p6)
}
  0x72   : > { %s6477_s18 = scalar_lea.vmem %s7269_s27, 1024  ;;  %s7007_s20 = smov [#allocation8]  }
  0x73   : > { %p6478_p7 = scmp.ne.s32.totalorder %s7269_s27, %s6477_s18  ;;  %s6481_s16 = sshll.u32 %s7007_s20, 4  ;;  %s6482_s16 = int_to_ptr.vmem [resolvable:$false] %s6481_s16 }
  0x74   : > { %s6483_s23 = scalar_lea.vmem %s6482_s16, 2048  ;;  %p6484_p13 = scmp.lt.s32.totalorder %s7269_s27, %s6482_s16 }
  0x75   : > { %p6479_p9 = pnand %p6478_p7, %p8686_p0  ;;  %p6485_p12 = scmp.lt.s32.totalorder %s6483_s23, %s6477_s18 }
  0x77   : > { %p6480_p11 = pneg %p6479_p9  ;;  %p6486_p3 = por %p6485_p12, %p6484_p13 }
  0x79   : > { %p6487_p8 = pnand %p6486_p3, %p6480_p11 }
  0x7b   : > { %6490 = shalt.err (!%p6487_p8)
}
  0x7c   : > { %s8650_s15 = smov 64   ;;  %s8653_s17 = smov 4  }
  0x7d   : > { %6129 = dma.hbm_to_vmem [thread:$0]  (%p8686_p0), %s7266_s26, 1024, %s7269_s27, %s7271_s14, %s8650_s15, %s8650_s15, %s8653_s17  }
  0x7e   : > { %s7299_s2 = sshll.u32 %s6995_s0, 4  ;;  %s613_s24 = scalar_lea.vmem [#allocation9], %s7254_s28 }
  0x7f   : > { %s620_s18 = sshll.u32 %s613_s24, 4  ;;  %s8687_s3 = sld [smem:[#allocation41_spill]]  ;;  %s621_s18 = int_to_ptr.vmem [resolvable:$true] %s620_s18 }
  0x85   : > { %s618_s23 = scalar_lea.hbm %s8687_s3, %s7299_s2  ;;  %s6495_s19 = scalar_lea.hbm %s8687_s3, 32 }
  0x86   : > { %s6491_s21 = scalar_lea.hbm %s618_s23, 16  ;;  %p6496_p2 = scmp.lt.u32.totalorder %s618_s23, %s8687_s3 }
  0x87   : > { %p6492_p5 = scmp.ne.s32.totalorder %s618_s23, %s6491_s21  ;;  %p6497_p4 = scmp.lt.u32.totalorder %s6495_s19, %s6491_s21 }
  0x88   : > { %p6499_p7 = scmp.lt.u32.totalorder %s6491_s21, %s618_s23 }
  0x89   : > { %p6493_p10 = pnand %p6492_p5, %p8686_p0  ;;  %p6498_p6 = por %p6497_p4, %p6496_p2 }
  0x8b   : > { %p6494_p1 = pneg %p6493_p10  ;;  %p6500_p9 = por %p6499_p7, %p6498_p6 }
  0x8d   : > { %p6501_p11 = pnand %p6500_p9, %p6494_p1 }
  0x8f   : > { %6504 = shalt.err (!%p6501_p11)
}
  0x90   : > { %s6505_s24 = scalar_lea.vmem %s621_s18, 16  ;;  %s7010_s20 = smov [#allocation9]  }
  0x91   : > { %p6506_p13 = scmp.ne.s32.totalorder %s621_s18, %s6505_s24  ;;  %s6509_s16 = sshll.u32 %s7010_s20, 4  ;;  %s6510_s16 = int_to_ptr.vmem [resolvable:$false] %s6509_s16 }
  0x92   : > { %s6511_s29 = scalar_lea.vmem %s6510_s16, 32  ;;  %p6512_p8 = scmp.lt.s32.totalorder %s621_s18, %s6510_s16 }
  0x93   : > { %p6507_p12 = pnand %p6506_p13, %p8686_p0  ;;  %p6513_p5 = scmp.lt.s32.totalorder %s6511_s29, %s6505_s24 }
  0x95   : > { %p6508_p3 = pneg %p6507_p12  ;;  %p6514_p10 = por %p6513_p5, %p6512_p8 }
  0x97   : > { %p6515_p2 = pnand %p6514_p10, %p6508_p3 }
  0x99   : > { %6518 = shalt.err (!%p6515_p2)
}
  0x9a   : > { %6130 = dma.hbm_to_vmem [thread:$0]  (%p8686_p0), %s618_s23, 16, %s621_s18, %s7271_s14  }
  0x9b   : > { %s8688_s4 = sld [smem:[#allocation42_spill]]  ;;  %s631_s26 = scalar_lea.vmem [#allocation10], %s7257_s30 }
  0x9c   : > { %s638_s27 = sshll.u32 %s631_s26, 4  ;;  %s8689_s5 = sld [smem:[#allocation43_spill]]  ;;  %s7326_s27 = int_to_ptr.vmem [resolvable:$true] %s638_s27 }
  0xa1   : > { %s7323_s21 = scalar_lea.hbm %s8688_s4, %s7260_s1  ;;  %s6523_s19 = scalar_lea.hbm %s8688_s4, 2048 }
  0xa2   : > { %s7332_s16 = scalar_lea.hbm %s8689_s5, %s7299_s2  ;;  %s6519_s29 = scalar_lea.hbm %s7323_s21, 1024 }
  0xa3   : > { %p6520_p1 = scmp.ne.s32.totalorder %s7323_s21, %s6519_s29  ;;  %p6524_p7 = scmp.lt.u32.totalorder %s7323_s21, %s8688_s4 }
  0xa4   : > { %p6525_p9 = scmp.lt.u32.totalorder %s6523_s19, %s6519_s29  ;;  %p6527_p13 = scmp.lt.u32.totalorder %s6519_s29, %s7323_s21 }
  0xa5   : > { %p6521_p4 = pnand %p6520_p1, %p8686_p0 }
  0xa6   : > { %p6526_p11 = por %p6525_p9, %p6524_p7 }
  0xa7   : > { %p6522_p6 = pneg %p6521_p4 }
  0xa8   : > { %p6528_p12 = por %p6527_p13, %p6526_p11 }
  0xaa   : > { %p6529_p3 = pnand %p6528_p12, %p6522_p6 }
  0xac   : > { %6532 = shalt.err (!%p6529_p3)
}
  0xad   : > { %s6533_s26 = scalar_lea.vmem %s7326_s27, 1024  ;;  %s7011_s24 = smov [#allocation10]  }
  0xae   : > { %p6534_p8 = scmp.ne.s32.totalorder %s7326_s27, %s6533_s26  ;;  %s6537_s20 = sshll.u32 %s7011_s24, 4  ;;  %s6538_s20 = int_to_ptr.vmem [resolvable:$false] %s6537_s20 }
  0xaf   : > { %s6539_s15 = scalar_lea.vmem %s6538_s20, 2048  ;;  %p6540_p2 = scmp.lt.s32.totalorder %s7326_s27, %s6538_s20 }
  0xb0   : > { %p6535_p5 = pnand %p6534_p8, %p8686_p0  ;;  %p6541_p1 = scmp.lt.s32.totalorder %s6539_s15, %s6533_s26 }
  0xb2   : > { %p6536_p10 = pneg %p6535_p5  ;;  %p6542_p4 = por %p6541_p1, %p6540_p2 }
  0xb4   : > { %p6543_p7 = pnand %p6542_p4, %p6536_p10 }
  0xb6   : > { %6546 = shalt.err (!%p6543_p7)
}
  0xb7   : > { %s8690_s29 = smov 64   ;;  %s651_s18 = scalar_lea.vmem [#allocation11], %s7254_s28 }
  0xb8   : > { %6131 = dma.hbm_to_vmem [thread:$0]  (%p8686_p0), %s7323_s21, 1024, %s7326_s27, %s7271_s14, %s8690_s29, %s8690_s29, %s8653_s17  }
  0xb9   : > { %s658_s23 = sshll.u32 %s651_s18, 4  ;;  %s8691_s6 = sld [smem:[#allocation44_spill]]  ;;  %s659_s23 = int_to_ptr.vmem [resolvable:$true] %s658_s23 }
  0xba   : > { %s6547_s24 = scalar_lea.hbm %s7332_s16, 16  ;;  %s6551_s3 = scalar_lea.hbm %s8689_s5, 32 }
  0xbb   : > { %p6548_p6 = scmp.ne.s32.totalorder %s7332_s16, %s6547_s24  ;;  %p6552_p13 = scmp.lt.u32.totalorder %s7332_s16, %s8689_s5 }
  0xbc   : > { %p6553_p12 = scmp.lt.u32.totalorder %s6551_s3, %s6547_s24  ;;  %p6555_p8 = scmp.lt.u32.totalorder %s6547_s24, %s7332_s16 }
  0xbd   : > { %p6549_p9 = pnand %p6548_p6, %p8686_p0 }
  0xbe   : > { %p6554_p3 = por %p6553_p12, %p6552_p13 }
  0xbf   : > { %s7364_s26 = scalar_lea.hbm %s8691_s6, %s7260_s1  ;;  %p6550_p11 = pneg %p6549_p9 }
  0xc0   : > { %p6556_p5 = por %p6555_p8, %p6554_p3 }
  0xc2   : > { %p6557_p10 = pnand %p6556_p5, %p6550_p11 }
  0xc4   : > { %6560 = shalt.err (!%p6557_p10)
}
  0xc5   : > { %s6561_s21 = scalar_lea.vmem %s659_s23, 16  ;;  %s7012_s27 = smov [#allocation11]  }
  0xc6   : > { %p6562_p2 = scmp.ne.s32.totalorder %s659_s23, %s6561_s21  ;;  %s6565_s18 = sshll.u32 %s7012_s27, 4  ;;  %s6566_s18 = int_to_ptr.vmem [resolvable:$false] %s6565_s18 }
  0xc7   : > { %s6567_s19 = scalar_lea.vmem %s6566_s18, 32  ;;  %p6568_p7 = scmp.lt.s32.totalorder %s659_s23, %s6566_s18 }
  0xc8   : > { %p6563_p1 = pnand %p6562_p2, %p8686_p0  ;;  %p6569_p6 = scmp.lt.s32.totalorder %s6567_s19, %s6561_s21 }
  0xca   : > { %p6564_p4 = pneg %p6563_p1  ;;  %p6570_p9 = por %p6569_p6, %p6568_p7 }
  0xcc   : > { %p6571_p12 = pnand %p6570_p9, %p6564_p4 }
  0xce   : > { %6574 = shalt.err (!%p6571_p12)
}
  0xcf   : > { %6132 = dma.hbm_to_vmem [thread:$0]  (%p8686_p0), %s7332_s16, 16, %s659_s23, %s7271_s14  }
  0xd0   : > { %s669_s3 = scalar_lea.vmem [#allocation12], %s7257_s30  ;;  %s7391_s24 = scalar_lea.hbm %s8613_s7, %s7299_s2 }
  0xd1   : > { %s676_s4 = sshll.u32 %s669_s3, 4  ;;  %s6575_s20 = scalar_lea.hbm %s7364_s26, 1024  ;;  %s7385_s4 = int_to_ptr.vmem [resolvable:$true] %s676_s4 }
  0xd2   : > { %p6576_p11 = scmp.ne.s32.totalorder %s7364_s26, %s6575_s20  ;;  %s6579_s27 = scalar_lea.hbm %s8691_s6, 2048 }
  0xd3   : > { %p6580_p8 = scmp.lt.u32.totalorder %s7364_s26, %s8691_s6  ;;  %p6581_p5 = scmp.lt.u32.totalorder %s6579_s27, %s6575_s20 }
  0xd4   : > { %p6577_p13 = pnand %p6576_p11, %p8686_p0  ;;  %p6583_p2 = scmp.lt.u32.totalorder %s6575_s20, %s7364_s26 }
  0xd5   : > { %p6582_p10 = por %p6581_p5, %p6580_p8 }
  0xd6   : > { %p6578_p3 = pneg %p6577_p13 }
  0xd7   : > { %p6584_p1 = por %p6583_p2, %p6582_p10 }
  0xd9   : > { %p6585_p4 = pnand %p6584_p1, %p6578_p3 }
  0xdb   : > { %6588 = shalt.err (!%p6585_p4)
}
  0xdc   : > { %s6589_s23 = scalar_lea.vmem %s7385_s4, 1024  ;;  %s7013_s19 = smov [#allocation12]  }
  0xdd   : > { %p6590_p7 = scmp.ne.s32.totalorder %s7385_s4, %s6589_s23  ;;  %s6593_s3 = sshll.u32 %s7013_s19, 4  ;;  %s6594_s3 = int_to_ptr.vmem [resolvable:$false] %s6593_s3 }
  0xde   : > { %s6595_s13 = scalar_lea.vmem %s6594_s3, 2048  ;;  %p6596_p12 = scmp.lt.s32.totalorder %s7385_s4, %s6594_s3 }
  0xdf   : > { %p6591_p6 = pnand %p6590_p7, %p8686_p0  ;;  %p6597_p11 = scmp.lt.s32.totalorder %s6595_s13, %s6589_s23 }
  0xe1   : > { %p6592_p9 = pneg %p6591_p6  ;;  %p6598_p13 = por %p6597_p11, %p6596_p12 }
  0xe3   : > { %p6599_p8 = pnand %p6598_p13, %p6592_p9 }
  0xe5   : > { %6602 = shalt.err (!%p6599_p8)
}
  0xe6   : > { %6133 = dma.hbm_to_vmem [thread:$0]  (%p8686_p0), %s7364_s26, 1024, %s7385_s4, %s7271_s14, %s8690_s29, %s8690_s29, %s8653_s17  }
  0xe7   : > { %s689_s25 = scalar_lea.vmem [#allocation13], %s7254_s28  ;;  %s7423_s27 = scalar_lea.hbm %s8614_s8, %s7260_s1 }
  0xe8   : > { %s696_s20 = sshll.u32 %s689_s25, 4  ;;  %s6603_s18 = scalar_lea.hbm %s7391_s24, 16  ;;  %s697_s20 = int_to_ptr.vmem [resolvable:$true] %s696_s20 }
  0xe9   : > { %p6604_p3 = scmp.ne.s32.totalorder %s7391_s24, %s6603_s18  ;;  %s6607_s19 = scalar_lea.hbm %s8613_s7, 32 }
  0xea   : > { %p6608_p2 = scmp.lt.u32.totalorder %s7391_s24, %s8613_s7  ;;  %p6609_p1 = scmp.lt.u32.totalorder %s6607_s19, %s6603_s18 }
  0xeb   : > { %p6605_p5 = pnand %p6604_p3, %p8686_p0  ;;  %p6611_p7 = scmp.lt.u32.totalorder %s6603_s18, %s7391_s24 }
  0xec   : > { %p6610_p4 = por %p6609_p1, %p6608_p2 }
  0xed   : > { %p6606_p10 = pneg %p6605_p5 }
  0xee   : > { %p6612_p6 = por %p6611_p7, %p6610_p4 }
  0xf0   : > { %p6613_p9 = pnand %p6612_p6, %p6606_p10 }
  0xf2   : > { %6616 = shalt.err (!%p6613_p9)
}
  0xf3   : > { %s6617_s1 = scalar_lea.vmem %s697_s20, 16  ;;  %s7014_s26 = smov [#allocation13]  }
  0xf4   : > { %p6618_p12 = scmp.ne.s32.totalorder %s697_s20, %s6617_s1  ;;  %s6621_s4 = sshll.u32 %s7014_s26, 4  ;;  %s6622_s4 = int_to_ptr.vmem [resolvable:$false] %s6621_s4 }
  0xf5   : > { %s6623_s25 = scalar_lea.vmem %s6622_s4, 32  ;;  %p6624_p8 = scmp.lt.s32.totalorder %s697_s20, %s6622_s4 }
  0xf6   : > { %p6619_p11 = pnand %p6618_p12, %p8686_p0  ;;  %p6625_p3 = scmp.lt.s32.totalorder %s6623_s25, %s6617_s1 }
  0xf8   : > { %p6620_p13 = pneg %p6619_p11  ;;  %p6626_p5 = por %p6625_p3, %p6624_p8 }
  0xfa   : > { %p6627_p1 = pnand %p6626_p5, %p6620_p13 }
  0xfc   : > { %6630 = shalt.err (!%p6627_p1)
}
  0xfd   : > { %6134 = dma.hbm_to_vmem [thread:$0]  (%p8686_p0), %s7391_s24, 16, %s697_s20, %s7271_s14  }
  0xfe   : > { %s707_s15 = scalar_lea.vmem [#allocation14], %s7257_s30  ;;  %s7450_s23 = scalar_lea.hbm %s8615_s9, %s7299_s2 }
  0xff   : > { %s714_s21 = sshll.u32 %s707_s15, 4  ;;  %s6631_s19 = scalar_lea.hbm %s7423_s27, 1024  ;;  %s7444_s21 = int_to_ptr.vmem [resolvable:$true] %s714_s21 }
 0x100   : > { %p6632_p10 = scmp.ne.s32.totalorder %s7423_s27, %s6631_s19  ;;  %s6635_s1 = scalar_lea.hbm %s8614_s8, 2048 }
 0x101   : > { %p6636_p7 = scmp.lt.u32.totalorder %s7423_s27, %s8614_s8  ;;  %p6637_p6 = scmp.lt.u32.totalorder %s6635_s1, %s6631_s19 }
 0x102   : > { %p6633_p2 = pnand %p6632_p10, %p8686_p0  ;;  %p6639_p12 = scmp.lt.u32.totalorder %s6631_s19, %s7423_s27 }
 0x103   : > { %p6638_p9 = por %p6637_p6, %p6636_p7 }
 0x104   : > { %p6634_p4 = pneg %p6633_p2 }
 0x105   : > { %p6640_p11 = por %p6639_p12, %p6638_p9 }
 0x107   : > { %p6641_p13 = pnand %p6640_p11, %p6634_p4 }
 0x109   : > { %6644 = shalt.err (!%p6641_p13)
}
 0x10a   : > { %s6645_s30 = scalar_lea.vmem %s7444_s21, 1024  ;;  %s7015_s20 = smov [#allocation14]  }
 0x10b   : > { %p6646_p8 = scmp.ne.s32.totalorder %s7444_s21, %s6645_s30  ;;  %s6649_s4 = sshll.u32 %s7015_s20, 4  ;;  %s6650_s4 = int_to_ptr.vmem [resolvable:$false] %s6649_s4 }
 0x10c   : > { %s6651_s25 = scalar_lea.vmem %s6650_s4, 2048  ;;  %p6652_p1 = scmp.lt.s32.totalorder %s7444_s21, %s6650_s4 }
 0x10d   : > { %p6647_p3 = pnand %p6646_p8, %p8686_p0  ;;  %p6653_p10 = scmp.lt.s32.totalorder %s6651_s25, %s6645_s30 }
 0x10f   : > { %p6648_p5 = pneg %p6647_p3  ;;  %p6654_p2 = por %p6653_p10, %p6652_p1 }
 0x111   : > { %p6655_p7 = pnand %p6654_p2, %p6648_p5 }
 0x113   : > { %6658 = shalt.err (!%p6655_p7)
}
 0x114   : > { %6135 = dma.hbm_to_vmem [thread:$0]  (%p8686_p0), %s7423_s27, 1024, %s7444_s21, %s7271_s14, %s8690_s29, %s8690_s29, %s8653_s17  }
 0x115   : > { %s727_s15 = scalar_lea.vmem [#allocation15], %s7254_s28  ;;  %s7482_s3 = scalar_lea.hbm %s8616_s10, %s7299_s2 }
 0x116   : > { %s734_s18 = sshll.u32 %s727_s15, 4  ;;  %s6659_s13 = scalar_lea.hbm %s7450_s23, 16  ;;  %s735_s18 = int_to_ptr.vmem [resolvable:$true] %s734_s18 }
 0x117   : > { %p6660_p4 = scmp.ne.s32.totalorder %s7450_s23, %s6659_s13  ;;  %s6663_s24 = scalar_lea.hbm %s8615_s9, 32 }
 0x118   : > { %p6664_p12 = scmp.lt.u32.totalorder %s7450_s23, %s8615_s9  ;;  %p6665_p11 = scmp.lt.u32.totalorder %s6663_s24, %s6659_s13 }
 0x119   : > { %p6661_p6 = pnand %p6660_p4, %p8686_p0  ;;  %p6667_p8 = scmp.lt.u32.totalorder %s6659_s13, %s7450_s23 }
 0x11a   : > { %p6666_p13 = por %p6665_p11, %p6664_p12 }
 0x11b   : > { %p6662_p9 = pneg %p6661_p6 }
 0x11c   : > { %p6668_p3 = por %p6667_p8, %p6666_p13 }
 0x11e   : > { %p6669_p5 = pnand %p6668_p3, %p6662_p9 }
 0x120   : > { %6672 = shalt.err (!%p6669_p5)
}
 0x121   : > { %s6673_s27 = scalar_lea.vmem %s735_s18, 16  ;;  %s7016_s21 = smov [#allocation15]  }
 0x122   : > { %p6674_p1 = scmp.ne.s32.totalorder %s735_s18, %s6673_s27  ;;  %s6677_s4 = sshll.u32 %s7016_s21, 4  ;;  %s6678_s4 = int_to_ptr.vmem [resolvable:$false] %s6677_s4 }
 0x123   : > { %s6679_s25 = scalar_lea.vmem %s6678_s4, 32  ;;  %p6680_p7 = scmp.lt.s32.totalorder %s735_s18, %s6678_s4 }
 0x124   : > { %p6675_p10 = pnand %p6674_p1, %p8686_p0  ;;  %p6681_p4 = scmp.lt.s32.totalorder %s6679_s25, %s6673_s27 }
 0x126   : > { %p6676_p2 = pneg %p6675_p10  ;;  %p6682_p6 = por %p6681_p4, %p6680_p7 }
 0x128   : > { %p6683_p11 = pnand %p6682_p6, %p6676_p2 }
 0x12a   : > { %6686 = shalt.err (!%p6683_p11)
}
 0x12b   : > { %6136 = dma.hbm_to_vmem [thread:$0]  (%p8686_p0), %s7450_s23, 16, %s735_s18, %s7271_s14  }
 0x12c   : > { %s744_s15 = scalar_lea.vmem [#allocation16], %s7254_s28  ;;  %s7507_s1 = scalar_lea.hbm %s8617_s11, %s7299_s2 }
 0x12d   : > { %s751_s16 = sshll.u32 %s744_s15, 4  ;;  %s6687_s26 = scalar_lea.hbm %s7482_s3, 16  ;;  %s752_s16 = int_to_ptr.vmem [resolvable:$true] %s751_s16 }
 0x12e   : > { %p6688_p9 = scmp.ne.s32.totalorder %s7482_s3, %s6687_s26  ;;  %s6691_s20 = scalar_lea.hbm %s8616_s10, 32 }
 0x12f   : > { %p6692_p8 = scmp.lt.u32.totalorder %s7482_s3, %s8616_s10  ;;  %p6693_p3 = scmp.lt.u32.totalorder %s6691_s20, %s6687_s26 }
 0x130   : > { %p6689_p12 = pnand %p6688_p9, %p8686_p0  ;;  %p6695_p1 = scmp.lt.u32.totalorder %s6687_s26, %s7482_s3 }
 0x131   : > { %p6694_p5 = por %p6693_p3, %p6692_p8 }
 0x132   : > { %p6690_p13 = pneg %p6689_p12 }
 0x133   : > { %p6696_p10 = por %p6695_p1, %p6694_p5 }
 0x135   : > { %p6697_p2 = pnand %p6696_p10, %p6690_p13 }
 0x137   : > { %6700 = shalt.err (!%p6697_p2)
}
 0x138   : > { %s6701_s23 = scalar_lea.vmem %s752_s16, 16  ;;  %s7017_s18 = smov [#allocation16]  }
 0x139   : > { %p6702_p7 = scmp.ne.s32.totalorder %s752_s16, %s6701_s23  ;;  %s6705_s4 = sshll.u32 %s7017_s18, 4  ;;  %s6706_s4 = int_to_ptr.vmem [resolvable:$false] %s6705_s4 }
 0x13a   : > { %s6707_s25 = scalar_lea.vmem %s6706_s4, 32  ;;  %p6708_p11 = scmp.lt.s32.totalorder %s752_s16, %s6706_s4 }
 0x13b   : > { %p6703_p4 = pnand %p6702_p7, %p8686_p0  ;;  %p6709_p9 = scmp.lt.s32.totalorder %s6707_s25, %s6701_s23 }
 0x13d   : > { %p6704_p6 = pneg %p6703_p4  ;;  %p6710_p12 = por %p6709_p9, %p6708_p11 }
 0x13f   : > { %p6711_p3 = pnand %p6710_p12, %p6704_p6 }
 0x141   : > { %6714 = shalt.err (!%p6711_p3)
}
 0x142   : > { %6137 = dma.hbm_to_vmem [thread:$0]  (%p8686_p0), %s7482_s3, 16, %s752_s16, %s7271_s14  }
 0x143   : > { %s761_s15 = scalar_lea.vmem [#allocation17], %s7254_s28  ;;  %s8654_s13 = sshll.u32 %s7254_s28, 7 }
 0x144   : > { %s768_s19 = sshll.u32 %s761_s15, 4  ;;  %s6715_s26 = scalar_lea.hbm %s7507_s1, 16  ;;  %s769_s19 = int_to_ptr.vmem [resolvable:$true] %s768_s19 }
 0x145   : > { %p6716_p13 = scmp.ne.s32.totalorder %s7507_s1, %s6715_s26  ;;  %s6719_s20 = scalar_lea.hbm %s8617_s11, 32 }
 0x146   : > { %p6720_p1 = scmp.lt.u32.totalorder %s7507_s1, %s8617_s11  ;;  %p6721_p10 = scmp.lt.u32.totalorder %s6719_s20, %s6715_s26 }
 0x147   : > { %p6717_p8 = pnand %p6716_p13, %p8686_p0  ;;  %p6723_p7 = scmp.lt.u32.totalorder %s6715_s26, %s7507_s1 }
 0x148   : > { %p6722_p2 = por %p6721_p10, %p6720_p1 }
 0x149   : > { %p6718_p5 = pneg %p6717_p8 }
 0x14a   : > { %p6724_p4 = por %p6723_p7, %p6722_p2 }
 0x14c   : > { %p6725_p6 = pnand %p6724_p4, %p6718_p5 }
 0x14e   : > { %6728 = shalt.err (!%p6725_p6)
}
 0x14f   : > { %s6729_s3 = scalar_lea.vmem %s769_s19, 16  ;;  %s7018_s16 = smov [#allocation17]  }
 0x150   : > { %p6730_p11 = scmp.ne.s32.totalorder %s769_s19, %s6729_s3  ;;  %s6733_s23 = sshll.u32 %s7018_s16, 4  ;;  %s6734_s23 = int_to_ptr.vmem [resolvable:$false] %s6733_s23 }
 0x151   : > { %s6735_s18 = scalar_lea.vmem %s6734_s23, 32  ;;  %p6736_p3 = scmp.lt.s32.totalorder %s769_s19, %s6734_s23 }
 0x152   : > { %p6731_p9 = pnand %p6730_p11, %p8686_p0  ;;  %p6737_p13 = scmp.lt.s32.totalorder %s6735_s18, %s6729_s3 }
 0x154   : > { %p6732_p12 = pneg %p6731_p9  ;;  %p6738_p8 = por %p6737_p13, %p6736_p3 }
 0x156   : > { %p6739_p1 = pnand %p6738_p8, %p6732_p12 }
 0x158   : > { %6742 = shalt.err (!%p6739_p1)
}
 0x159   : > { %6138 = dma.hbm_to_vmem [thread:$0]  (%p8686_p0), %s7507_s1, 16, %s769_s19, %s7271_s14  }
 0x15a   : > { %s5837_s4 = sshll.u32 %s6995_s0, 11  ;;  %s779_s25 = scalar_lea.vmem [#allocation18], %s8654_s13 }
 0x15b   : > { %s786_s15 = sshll.u32 %s779_s25, 4  ;;  %s7555_s30 = scalar_lea.hbm %s8618_s12, %s5837_s4  ;;  %s7557_s15 = int_to_ptr.vmem [resolvable:$true] %s786_s15 }
 0x15c   : > { %s6743_s20 = scalar_lea.hbm %s7555_s30, 2048  ;;  %s6747_s27 = scalar_lea.hbm %s8618_s12, 4096 }
 0x15d   : > { %p6744_p5 = scmp.ne.s32.totalorder %s7555_s30, %s6743_s20  ;;  %p6748_p7 = scmp.lt.u32.totalorder %s7555_s30, %s8618_s12 }
 0x15e   : > { %p6749_p4 = scmp.lt.u32.totalorder %s6747_s27, %s6743_s20  ;;  %p6751_p11 = scmp.lt.u32.totalorder %s6743_s20, %s7555_s30 }
 0x15f   : > { %p6745_p10 = pnand %p6744_p5, %p8686_p0 }
 0x160   : > { %p6750_p6 = por %p6749_p4, %p6748_p7 }
 0x161   : > { %p6746_p2 = pneg %p6745_p10 }
 0x162   : > { %p6752_p9 = por %p6751_p11, %p6750_p6 }
 0x164   : > { %p6753_p12 = pnand %p6752_p9, %p6746_p2 }
 0x166   : > { %6756 = shalt.err (!%p6753_p12)
}
 0x167   : > { %s6757_s16 = scalar_lea.vmem %s7557_s15, 2048  ;;  %s7019_s23 = smov [#allocation18]  }
 0x168   : > { %p6758_p3 = scmp.ne.s32.totalorder %s7557_s15, %s6757_s16  ;;  %s6761_s18 = sshll.u32 %s7019_s23, 4  ;;  %s6762_s18 = int_to_ptr.vmem [resolvable:$false] %s6761_s18 }
 0x169   : > { %s6763_s25 = scalar_lea.vmem %s6762_s18, 4096  ;;  %p6764_p1 = scmp.lt.s32.totalorder %s7557_s15, %s6762_s18 }
 0x16a   : > { %p6759_p13 = pnand %p6758_p3, %p8686_p0  ;;  %p6765_p5 = scmp.lt.s32.totalorder %s6763_s25, %s6757_s16 }
 0x16c   : > { %p6760_p8 = pneg %p6759_p13  ;;  %p6766_p10 = por %p6765_p5, %p6764_p1 }
 0x16e   : > { %p6767_p7 = pnand %p6766_p10, %p6760_p8 }
 0x170   : > { %6770 = shalt.err (!%p6767_p7)
}
 0x171   : > { %s7020_s26 = smov 128   ;;  %s7021_s24 = smov 8  }
 0x172   : > { %6139 = dma.hbm_to_vmem [thread:$0]  (%p8686_p0), %s7555_s30, 2048, %s7557_s15, %s7271_s14, %s7020_s26, %s7020_s26, %s7021_s24  }
 0x173   : > { %s5687_s20 = sshll.u32 %s7254_s28, 1  ;;  %s5838_s1 = sshll.u32 %s6995_s0, 5 }
 0x174   : > { %s8692_s21 = sld [smem:[#allocation45_spill]]  ;;  %s800_s16 = scalar_lea.vmem [#allocation19], %s5687_s20 }
 0x175   : > { %s808_s23 = sshll.u32 %s800_s16, 4  ;;  %s8693_s17 = sld [smem:[#allocation46_spill]]  ;;  %s809_s23 = int_to_ptr.vmem [resolvable:$true] %s808_s23 }
 0x17a   : > { %s7586_s3 = scalar_lea.hbm %s8692_s21, %s5838_s1  ;;  %s6775_s24 = scalar_lea.hbm %s8692_s21, 64 }
 0x17b   : > { %s7593_s13 = scalar_lea.hbm %s8693_s17, %s5837_s4  ;;  %s6771_s15 = scalar_lea.hbm %s7586_s3, 32 }
 0x17c   : > { %p6772_p2 = scmp.ne.s32.totalorder %s7586_s3, %s6771_s15  ;;  %p6776_p11 = scmp.lt.u32.totalorder %s7586_s3, %s8692_s21 }
 0x17d   : > { %p6777_p9 = scmp.lt.u32.totalorder %s6775_s24, %s6771_s15  ;;  %p6779_p3 = scmp.lt.u32.totalorder %s6771_s15, %s7586_s3 }
 0x17e   : > { %p6773_p4 = pnand %p6772_p2, %p8686_p0 }
 0x17f   : > { %p6778_p12 = por %p6777_p9, %p6776_p11 }
 0x180   : > { %p6774_p6 = pneg %p6773_p4 }
 0x181   : > { %p6780_p13 = por %p6779_p3, %p6778_p12 }
 0x183   : > { %p6781_p8 = pnand %p6780_p13, %p6774_p6 }
 0x185   : > { %6784 = shalt.err (!%p6781_p8)
}
 0x186   : > { %s6785_s4 = scalar_lea.vmem %s809_s23, 32  ;;  %s7022_s20 = smov [#allocation19]  }
 0x187   : > { %p6786_p1 = scmp.ne.s32.totalorder %s809_s23, %s6785_s4  ;;  %s6789_s27 = sshll.u32 %s7022_s20, 4  ;;  %s6790_s27 = int_to_ptr.vmem [resolvable:$false] %s6789_s27 }
 0x188   : > { %s6791_s16 = scalar_lea.vmem %s6790_s27, 64  ;;  %p6792_p7 = scmp.lt.s32.totalorder %s809_s23, %s6790_s27 }
 0x189   : > { %p6787_p5 = pnand %p6786_p1, %p8686_p0  ;;  %p6793_p2 = scmp.lt.s32.totalorder %s6791_s16, %s6785_s4 }
 0x18b   : > { %p6788_p10 = pneg %p6787_p5  ;;  %p6794_p4 = por %p6793_p2, %p6792_p7 }
 0x18d   : > { %p6795_p9 = pnand %p6794_p4, %p6788_p10 }
 0x18f   : > { %6798 = shalt.err (!%p6795_p9)
}
 0x190   : > { %6140 = dma.hbm_to_vmem [thread:$0]  (%p8686_p0), %s7586_s3, 32, %s809_s23, %s7271_s14  }
 0x191   : > { %s8694_s18 = sshll.u32 %s7254_s28, 7  ;;  %s8695_s24 = sld [smem:[#allocation47_spill]] }
 0x192   : > { %s819_s25 = scalar_lea.vmem [#allocation20], %s8694_s18  ;;  %s6799_s19 = scalar_lea.hbm %s7593_s13, 2048 }
 0x193   : > { %s826_s15 = sshll.u32 %s819_s25, 4  ;;  %p6800_p6 = scmp.ne.s32.totalorder %s7593_s13, %s6799_s19  ;;  %s7615_s15 = int_to_ptr.vmem [resolvable:$true] %s826_s15 }
 0x194   : > { %s6803_s27 = scalar_lea.hbm %s8693_s17, 4096  ;;  %p6804_p3 = scmp.lt.u32.totalorder %s7593_s13, %s8693_s17 }
 0x195   : > { %p6801_p11 = pnand %p6800_p6, %p8686_p0  ;;  %p6805_p13 = scmp.lt.u32.totalorder %s6803_s27, %s6799_s19 }
 0x196   : > { %p6807_p1 = scmp.lt.u32.totalorder %s6799_s19, %s7593_s13 }
 0x197   : > { %s7621_s1 = scalar_lea.hbm %s8695_s24, %s7299_s2  ;;  %p6802_p12 = pneg %p6801_p11 }
 0x198   : > { %p6806_p8 = por %p6805_p13, %p6804_p3 }
 0x19a   : > { %p6808_p5 = por %p6807_p1, %p6806_p8 }
 0x19c   : > { %p6809_p10 = pnand %p6808_p5, %p6802_p12 }
 0x19e   : > { %6812 = shalt.err (!%p6809_p10)
}
 0x19f   : > { %s6813_s16 = scalar_lea.vmem %s7615_s15, 2048  ;;  %s7023_s18 = smov [#allocation20]  }
 0x1a0   : > { %p6814_p7 = scmp.ne.s32.totalorder %s7615_s15, %s6813_s16  ;;  %s6817_s25 = sshll.u32 %s7023_s18, 4  ;;  %s6818_s25 = int_to_ptr.vmem [resolvable:$false] %s6817_s25 }
 0x1a1   : > { %s6819_s30 = scalar_lea.vmem %s6818_s25, 4096  ;;  %p6820_p9 = scmp.lt.s32.totalorder %s7615_s15, %s6818_s25 }
 0x1a2   : > { %p6815_p2 = pnand %p6814_p7, %p8686_p0  ;;  %p6821_p6 = scmp.lt.s32.totalorder %s6819_s30, %s6813_s16 }
 0x1a4   : > { %p6816_p4 = pneg %p6815_p2  ;;  %p6822_p11 = por %p6821_p6, %p6820_p9 }
 0x1a6   : > { %p6823_p3 = pnand %p6822_p11, %p6816_p4 }
 0x1a8   : > { %6826 = shalt.err (!%p6823_p3)
}
 0x1a9   : > { %s8696_s26 = smov 4   ;;  %s839_s19 = scalar_lea.vmem [#allocation21], %s7254_s28 }
 0x1aa   : > { %6141 = dma.hbm_to_vmem [thread:$0]  (%p8686_p0), %s7593_s13, 2048, %s7615_s15, %s7271_s14, %s8690_s29, %s8690_s29, %s8696_s26  }
 0x1ab   : > { %s846_s4 = sshll.u32 %s839_s19, 4  ;;  %s8697_s3 = sld [smem:[#allocation48_spill]]  ;;  %s847_s4 = int_to_ptr.vmem [resolvable:$true] %s846_s4 }
 0x1ac   : > { %s6827_s16 = scalar_lea.hbm %s7621_s1, 16  ;;  %s6831_s30 = scalar_lea.hbm %s8695_s24, 32 }
 0x1ad   : > { %p6828_p12 = scmp.ne.s32.totalorder %s7621_s1, %s6827_s16  ;;  %p6832_p1 = scmp.lt.u32.totalorder %s7621_s1, %s8695_s24 }
 0x1ae   : > { %p6833_p5 = scmp.lt.u32.totalorder %s6831_s30, %s6827_s16  ;;  %p6835_p7 = scmp.lt.u32.totalorder %s6827_s16, %s7621_s1 }
 0x1af   : > { %p6829_p13 = pnand %p6828_p12, %p8686_p0 }
 0x1b0   : > { %p6834_p10 = por %p6833_p5, %p6832_p1 }
 0x1b1   : > { %s7653_s23 = scalar_lea.hbm %s8697_s3, %s7299_s2  ;;  %p6830_p8 = pneg %p6829_p13 }
 0x1b2   : > { %p6836_p2 = por %p6835_p7, %p6834_p10 }
 0x1b4   : > { %p6837_p4 = pnand %p6836_p2, %p6830_p8 }
 0x1b6   : > { %6840 = shalt.err (!%p6837_p4)
}
 0x1b7   : > { %s6841_s29 = scalar_lea.vmem %s847_s4, 16  ;;  %s7024_s13 = smov [#allocation21]  }
 0x1b8   : > { %p6842_p9 = scmp.ne.s32.totalorder %s847_s4, %s6841_s29  ;;  %s6845_s15 = sshll.u32 %s7024_s13, 4  ;;  %s6846_s15 = int_to_ptr.vmem [resolvable:$false] %s6845_s15 }
 0x1b9   : > { %s6847_s26 = scalar_lea.vmem %s6846_s15, 32  ;;  %p6848_p3 = scmp.lt.s32.totalorder %s847_s4, %s6846_s15 }
 0x1ba   : > { %p6843_p6 = pnand %p6842_p9, %p8686_p0  ;;  %p6849_p12 = scmp.lt.s32.totalorder %s6847_s26, %s6841_s29 }
 0x1bc   : > { %p6844_p11 = pneg %p6843_p6  ;;  %p6850_p13 = por %p6849_p12, %p6848_p3 }
 0x1be   : > { %p6851_p1 = pnand %p6850_p13, %p6844_p11 }
 0x1c0   : > { %6854 = shalt.err (!%p6851_p1)
}
 0x1c1   : > { %6142 = dma.hbm_to_vmem [thread:$0]  (%p8686_p0), %s7621_s1, 16, %s847_s4, %s7271_s14  }
 0x1c2   : > { %s856_s5 = scalar_lea.vmem [#allocation22], %s7254_s28  ;;  %s8698_s27 = sld [smem:[#allocation49_spill]] }
 0x1c3   : > { %s863_s6 = sshll.u32 %s856_s5, 4  ;;  %s6855_s25 = scalar_lea.hbm %s7653_s23, 16  ;;  %s864_s6 = int_to_ptr.vmem [resolvable:$true] %s863_s6 }
 0x1c4   : > { %p6856_p8 = scmp.ne.s32.totalorder %s7653_s23, %s6855_s25  ;;  %s6859_s13 = scalar_lea.hbm %s8697_s3, 32 }
 0x1c5   : > { %p6860_p7 = scmp.lt.u32.totalorder %s7653_s23, %s8697_s3  ;;  %p6861_p2 = scmp.lt.u32.totalorder %s6859_s13, %s6855_s25 }
 0x1c6   : > { %p6857_p5 = pnand %p6856_p8, %p8686_p0  ;;  %p6863_p9 = scmp.lt.u32.totalorder %s6855_s25, %s7653_s23 }
 0x1c7   : > { %p6862_p4 = por %p6861_p2, %p6860_p7 }
 0x1c8   : > { %s8699_s16 = smov %s8698_s27  ;;  %s7678_s18 = scalar_lea.hbm %s8698_s27, %s7299_s2 }
 0x1c9   : > { %p6858_p10 = pneg %p6857_p5  ;;  %p6864_p6 = por %p6863_p9, %p6862_p4 }
 0x1cb   : > { %p6865_p11 = pnand %p6864_p6, %p6858_p10 }
 0x1cd   : > { %6868 = shalt.err (!%p6865_p11)
}
 0x1ce   : > { %s6869_s2 = scalar_lea.vmem %s864_s6, 16  ;;  %s7025_s1 = smov [#allocation22]  }
 0x1cf   : > { %p6870_p3 = scmp.ne.s32.totalorder %s864_s6, %s6869_s2  ;;  %s6873_s4 = sshll.u32 %s7025_s1, 4  ;;  %s6874_s4 = int_to_ptr.vmem [resolvable:$false] %s6873_s4 }
 0x1d0   : > { %s6875_s5 = scalar_lea.vmem %s6874_s4, 32  ;;  %p6876_p1 = scmp.lt.s32.totalorder %s864_s6, %s6874_s4 }
 0x1d1   : > { %p6871_p12 = pnand %p6870_p3, %p8686_p0  ;;  %p6877_p8 = scmp.lt.s32.totalorder %s6875_s5, %s6869_s2 }
 0x1d3   : > { %p6872_p13 = pneg %p6871_p12  ;;  %p6878_p5 = por %p6877_p8, %p6876_p1 }
 0x1d5   : > { %p6879_p2 = pnand %p6878_p5, %p6872_p13 }
 0x1d7   : > { %6882 = shalt.err (!%p6879_p2)
}
 0x1d8   : > { %6143 = dma.hbm_to_vmem [thread:$0]  (%p8686_p0), %s7653_s23, 16, %s864_s6, %s7271_s14  }
 0x1d9   : > { %s873_s19 = scalar_lea.vmem [#allocation23], %s7254_s28  ;;  %s6883_s27 = scalar_lea.hbm %s7678_s18, 16 }
 0x1da   : > { %s880_s20 = sshll.u32 %s873_s19, 4  ;;  %p6884_p10 = scmp.ne.s32.totalorder %s7678_s18, %s6883_s27  ;;  %s881_s20 = int_to_ptr.vmem [resolvable:$true] %s880_s20 }
 0x1db   : > { %s6887_s29 = scalar_lea.hbm %s8699_s16, 32  ;;  %p6888_p9 = scmp.lt.u32.totalorder %s7678_s18, %s8699_s16 }
 0x1dc   : > { %p6885_p7 = pnand %p6884_p10, %p8686_p0  ;;  %p6889_p6 = scmp.lt.u32.totalorder %s6887_s29, %s6883_s27 }
 0x1dd   : > { %p6891_p3 = scmp.lt.u32.totalorder %s6883_s27, %s7678_s18 }
 0x1de   : > { %p6886_p4 = pneg %p6885_p7  ;;  %p6890_p11 = por %p6889_p6, %p6888_p9 }
 0x1e0   : > { %p6892_p12 = por %p6891_p3, %p6890_p11 }
 0x1e2   : > { %p6893_p13 = pnand %p6892_p12, %p6886_p4 }
 0x1e4   : > { %6896 = shalt.err (!%p6893_p13)
}
 0x1e5   : > { %s6897_s28 = scalar_lea.vmem %s881_s20, 16  ;;  %s7026_s23 = smov [#allocation23]  }
 0x1e6   : > { %p6898_p1 = scmp.ne.s32.totalorder %s881_s20, %s6897_s28  ;;  %s6901_s6 = sshll.u32 %s7026_s23, 4  ;;  %s6902_s6 = int_to_ptr.vmem [resolvable:$false] %s6901_s6 }
 0x1e7   : > { %s6903_s26 = scalar_lea.vmem %s6902_s6, 32  ;;  %p6904_p2 = scmp.lt.s32.totalorder %s881_s20, %s6902_s6 }
 0x1e8   : > { %p6899_p8 = pnand %p6898_p1, %p8686_p0  ;;  %p6905_p10 = scmp.lt.s32.totalorder %s6903_s26, %s6897_s28 }
 0x1ea   : > { %p6900_p5 = pneg %p6899_p8  ;;  %p6906_p7 = por %p6905_p10, %p6904_p2 }
 0x1ec   : > { %p6907_p6 = pnand %p6906_p7, %p6900_p5 }
 0x1ee   : > { %6910 = shalt.err (!%p6907_p6)
}
 0x1ef   : > { %6144 = dma.hbm_to_vmem [thread:$0]  (%p8686_p0), %s7678_s18, 16, %s881_s20, %s7271_s14  }
 0x1f0 PF: > { %s8700_s2 = sld [smem:[#allocation37_spill]] }
 0x1f6   : > { %p8701_p4 = scmp.ne.s32.totalorder %s8700_s2, 0 }
 0x1f7   : > { %s8702_s1 = sld [smem:[#allocation33_spill]] (!%p8701_p4) }
 0x1f8   : > { %889 = sbr.rel (%p8701_p4) target bundleno = 2996 (0xbb4), region = 92 }
 0x1fd   : > { %p8703_p9 = scmp.eq.s32.totalorder (!%p8701_p4), %s8702_s1, 0 }
 0x1ff   : > { %6962 = dma.done.wait (%p8703_p9), [#allocation4], 512   ;;  %p8704_p11 = pmov %p8703_p9 }
 0x200   : > { %p8705_p3 = pmov %p8703_p9 }
 0x201   : > { %6964 = vsyncadd (%p8704_p11), [#allocation4], 4294966784 }
 0x202   : > { %6966 = dma.done.wait (%p8705_p3), [#allocation7], 256   ;;  %p8706_p12 = pmov %p8705_p3 }
 0x203   : > { %s8707_s22 = sld [smem:[#allocation29_spill]]  ;;  %s8708_s4 = sld [smem:[#allocation35_spill]] }
 0x204   : > { %6968 = vsyncadd (%p8706_p12), [#allocation7], 4294967040  ;;  %s899_s14 = sand.u32 1, %s8702_s1  }
 0x205   : > { %s900_s19 = scalar_lea.sflag [#allocation4], %s899_s14 }
 0x209   : > { %s7729_s18 = sand.u32 1, %s8707_s22   ;;  %p8709_p0 = scmp.ne.s32.totalorder %s8708_s4, 0 }
 0x20a   : > { %s5699_s5 = sshll.u32 %s7729_s18, 6 }
 0x20b   : > { %s7732_s20 = scalar_lea.vmem [#allocation8], %s5699_s5 }
 0x20c   : > { %6970 = dma.done.wait (%p8709_p0), %s900_s19, 8368  }
 0x20d   : > { %6972 = vsyncadd (%p8709_p0), %s900_s19, 4294958928  ;;  %s5703_s27 = sshll.u32 %s7729_s18, 7  ;;  %s5704_s25 = sshll.u32 %s7729_s18, 1 }
 0x20e   : > { %s7741_s29 = scalar_lea.vmem [#allocation10], %s5699_s5  ;;  %s928_s13 = scalar_lea.vmem [#allocation11], %s7729_s18 }
 0x20f   : > { %s7744_s15 = scalar_lea.vmem [#allocation12], %s5699_s5  ;;  %s945_s28 = scalar_lea.vmem [#allocation13], %s7729_s18 }
 0x210   : > { %s7747_s23 = scalar_lea.vmem [#allocation14], %s5699_s5  ;;  %s962_s6 = scalar_lea.vmem [#allocation15], %s7729_s18 }
 0x211   : > { %s970_s26 = scalar_lea.vmem [#allocation16], %s7729_s18  ;;  %s978_s2 = scalar_lea.vmem [#allocation17], %s7729_s18 }
 0x212   : > { %s7752_s1 = scalar_lea.vmem [#allocation18], %s5703_s27  ;;  %s7754_s22 = scalar_lea.vmem [#allocation19], %s5704_s25 }
 0x213   : > { %s7756_s4 = scalar_lea.vmem [#allocation20], %s5703_s27  ;;  %s1013_s14 = scalar_lea.vmem [#allocation21], %s7729_s18 }
 0x214   : > { %s1021_s19 = scalar_lea.vmem [#allocation22], %s7729_s18  ;;  %s1029_s30 = scalar_lea.vmem [#allocation23], %s7729_s18 }
 0x215   : > { %s8710_s3 = sld [smem:[#allocation31_spill]] }
 0x21b   : > { %p5706_p13 = scmp.ne.s32.totalorder %s8710_s3, 0 }
 0x21c   : > { %v1151_v0 = vld [vmem:[#allocation3] sm:$0xff] (!%p5706_p13)  ;;  %v1152_v1 = vld [vmem:[#allocation3 + $0x8] sm:$0xff] (!%p5706_p13)  ;;  %v1153_v2 = vld [vmem:[#allocation3 + $0x10] sm:$0xff] (!%p5706_p13) }
 0x21d   : > { %1150 = sbr.rel (%p5706_p13) target bundleno = 548 (0x224), region = 168  ;;  %1155 = vst [vmem:[#allocation2] sm:$0xff] (!%p5706_p13), %v1151_v0  ;;  %1156 = vst [vmem:[#allocation2 + $0x8] sm:$0xff] (!%p5706_p13), %v1152_v1  ;;  %v1154_v3 = vld [vmem:[#allocation3 + $0x18] sm:$0xff] (!%p5706_p13) }
 0x21e   : > { %1157 = vst [vmem:[#allocation2 + $0x10] sm:$0xff] (!%p5706_p13), %v1153_v2  ;;  %1158 = vst [vmem:[#allocation2 + $0x18] sm:$0xff] (!%p5706_p13), %v1154_v3 }
 0x224 PF: > { %v6251_v4 = vld [vmem:[%s7741_s29] sm:$0xff]   ;;  %v6253_v6 = vld [vmem:[%s7741_s29 + $0x8] sm:$0xff]   ;;  %v6255_v8 = vld [vmem:[%s7741_s29 + $0x10] sm:$0xff]   ;;  %s8711_s3 = scalar_lea.vmem [#allocation9], %s7729_s18  ;;  %s7027_s5 = smov 32   ;;  %v7030_v56 = vmov 0.0   ;;  %v1583_v61 = vlaneseq }
 0x225   : > { %v6252_v5 = vld [vmem:[%s7732_s20] sm:$0xff]   ;;  %5969 = vmatprep.subr.bf16.mxu1 %v6251_v4  ;;  %v6254_v7 = vld [vmem:[%s7732_s20 + $0x8] sm:$0xff]   ;;  %v6256_v9 = vld [vmem:[%s7732_s20 + $0x10] sm:$0xff]   ;;  %s7029_s27 = smov 64   ;;  %vm7031_vm0 = vmmov 0   ;;  %vm3147_vm1 = vcmask 261120  }
 0x226   : > { %5970 = vmatpush3.bf16.msra.mxu1 %v6251_v4  ;;  %5949 = vmatprep.subr.bf16.mxu0 %v6252_v5  ;;  %v6257_v10 = vld [vmem:[%s7741_s29 + $0x18] sm:$0xff]   ;;  %v6259_v12 = vld [vmem:[%s7741_s29 + $0x20] sm:$0xff]   ;;  %v1159_v14 = vld [vmem:[#allocation2] sm:$0xff]  ;;  %v7032_v59 = vmov 1983009808   ;;  %v7823_v0 = vshrl.u32 %v1583_v61, 7 }
 0x227   : > { %5971 = vmatprep.subr.bf16.mxu1 %v6253_v6  ;;  %5950 = vmatpush3.bf16.msra.mxu0 %v6252_v5  ;;  %v6258_v11 = vld [vmem:[%s7732_s20 + $0x18] sm:$0xff]   ;;  %v6260_v13 = vld [vmem:[%s7732_s20 + $0x20] sm:$0xff]   ;;  %v6261_v16 = vld [vmem:[%s7741_s29 + $0x28] sm:$0xff]   ;;  %v1581_v60 = vunpack.c.l.s4 %v7032_v59  ;;  %v7033_v1 = vmov 1934713408   ;;  %vm3548_vm2 = vcmask 130048  }
 0x228   : > { %5951 = vmatprep.subr.bf16.mxu0 %v6254_v7  ;;  %v1160_v15 = vld [vmem:[#allocation2 + $0x8] sm:$0xff]  ;;  %v6262_v18 = vld [vmem:[%s7732_s20 + $0x28] sm:$0xff]   ;;  %v6264_v20 = vld [vmem:[%s7732_s20 + $0x30] sm:$0xff]   ;;  %v1612_v2 = vunpack.c.l.s4 %v7033_v1  ;;  %vm4631_vm3 = vcmask 523264   ;;  %vm4636_vm4 = vcmask 785408   ;;  %s8712_s18 = sld [smem:[#allocation31_spill]] }
 0x229   : > { %v1163_v17 = vpack.c.bf16 %v1160_v15, %v1159_v14  ;;  %v6263_v19 = vld [vmem:[%s7741_s29 + $0x30] sm:$0xff]   ;;  %v6265_v21 = vld [vmem:[%s7741_s29 + $0x38] sm:$0xff]   ;;  %v1162_v24 = vld [vmem:[#allocation2 + $0x18] sm:$0xff]  ;;  %v1582_v63 = vunpack.c.0.s8 %v1581_v60 }
 0x22a   : > { %5972 = vmatpush3.bf16.msra.mxu1 %v6253_v6  ;;  %v6266_v22 = vld [vmem:[%s7732_s20 + $0x38] sm:$0xff]   ;;  %v1161_v23 = vld [vmem:[#allocation2 + $0x10] sm:$0xff]  ;;  %v6268_v27 = vld [vmem:[%s7744_s15 + $0x8] sm:$0xff]   ;;  %s7028_s20 = smov 96  }
 0x22b   : > { %5973 = vmatprep.subr.bf16.mxu1 %v6255_v8  ;;  %5952 = vmatpush3.bf16.msra.mxu0 %v6254_v7  ;;  %v1164_v25 = vpack.c.bf16 %v1162_v24, %v1161_v23  ;;  %v6267_v26 = vld [vmem:[%s7744_s15] sm:$0xff]   ;;  %v6269_v28 = vld [vmem:[%s7744_s15 + $0x10] sm:$0xff]   ;;  %v6270_v29 = vld [vmem:[%s7744_s15 + $0x18] sm:$0xff]   ;;  %v7830_v7 = vsub.s32 %v1582_v63, %v7823_v0 }
 0x22c   : > { %5953 = vmatprep.subr.bf16.mxu0 %v6256_v9  ;;  %5985 = vmatprep.mubr.bf16.mxu1 %v1163_v17  ;;  %v6271_v30 = vld [vmem:[%s7744_s15 + $0x20] sm:$0xff]   ;;  %v6272_v31 = vld [vmem:[%s7744_s15 + $0x28] sm:$0xff]   ;;  %v6273_v32 = vld [vmem:[%s7744_s15 + $0x30] sm:$0xff]  }
 0x22d   : > { %5965 = vmatprep.mubr.bf16.mxu0 %v1163_v17  ;;  %v6274_v33 = vld [vmem:[%s7744_s15 + $0x38] sm:$0xff]   ;;  %v5707_v34 = vld [vmem:[%s8711_s3] ss:$0 sm:$0xff] }
 0x22e   : > { %5974 = vmatpush3.bf16.msra.mxu1 %v6255_v8  ;;  %v5716_v36 = vld [vmem:[%s928_s13] ss:$0 sm:$0xff]  ;;  %p5828_p1 = scmp.ne.s32.totalorder %s8712_s18, 1 }
 0x22f   : > { %5975 = vmatprep.subr.bf16.mxu1 %v6257_v10  ;;  %5954 = vmatpush3.bf16.msra.mxu0 %v6256_v9 }
 0x230   : > { %5955 = vmatprep.subr.bf16.mxu0 %v6258_v11 }
 0x232   : > { %5976 = vmatpush3.bf16.msra.mxu1 %v6257_v10  ;;  %v7034_v10 = vmov 0  }
 0x233   : > { %5977 = vmatprep.subr.bf16.mxu1 %v6259_v12  ;;  %5956 = vmatpush3.bf16.msra.mxu0 %v6258_v11  ;;  %v7836_v11 = vpack.i.b16 %v7034_v10, %v7034_v10 }
 0x234   : > { %5957 = vmatprep.subr.bf16.mxu0 %v6260_v13 }
 0x236   : > { %5978 = vmatpush3.bf16.msra.mxu1 %v6259_v12 }
 0x237   : > { %5979 = vmatprep.subr.bf16.mxu1 %v6261_v16  ;;  %5958 = vmatpush3.bf16.msra.mxu0 %v6260_v13  ;;  %v1613_v13 = vunpack.c.0.s8 %v1612_v2 }
 0x238   : > { %5959 = vmatprep.subr.bf16.mxu0 %v6262_v18 }
 0x23a   : > { %5980 = vmatpush3.bf16.msra.mxu1 %v6261_v16 }
 0x23b   : > { %5981 = vmatprep.subr.bf16.mxu1 %v6263_v19  ;;  %5960 = vmatpush3.bf16.msra.mxu0 %v6262_v18 }
 0x23c   : > { %5961 = vmatprep.subr.bf16.mxu0 %v6264_v20 }
 0x23e   : > { %5982 = vmatpush3.bf16.msra.mxu1 %v6263_v19 }
 0x23f   : > { %5983 = vmatprep.subr.bf16.mxu1 %v6265_v21  ;;  %5962 = vmatpush3.bf16.msra.mxu0 %v6264_v20 }
 0x240   : > { %5963 = vmatprep.subr.bf16.mxu0 %v6266_v22 }
 0x242   : > { %5984 = vmatpush3.bf16.msra.mxu1 %v6265_v21 }
 0x243   : > { %5964 = vmatpush3.bf16.msra.mxu0 %v6266_v22  ;;  %6009 = vmatprep.subr.bf16.mxu1 %v7030_v56 }
 0x244   : > { %5989 = vmatprep.subr.bf16.mxu0 %v6267_v26 }
 0x245   : > { %5986 = vmatmul.mubr.bf16.vlgmr.msra.gmra.mrb[0].mxu1 %v1164_v25 }
 0x246   : > { %5966 = vmatmul.mubr.bf16.vlgmr.msra.gmra.mrb[0].mxu0 %v1164_v25  ;;  %6011 = vmatprep.mubr.msk.bf16.mxu1 %vm7031_vm0, %v7030_v56 }
 0x247   : > { %6005 = vmatprep.mubr.bf16.mxu0 %v1163_v17  ;;  %5990 = vmatpush3.bf16.msra.mxu0 %v6267_v26 }
 0x248   : > { %5991 = vmatprep.subr.bf16.mxu0 %v6268_v27 }
 0x24b   : > { %5992 = vmatpush3.bf16.msra.mxu0 %v6268_v27 }
 0x24c   : > { %5993 = vmatprep.subr.bf16.mxu0 %v6269_v28 }
 0x24f   : > { %5994 = vmatpush3.bf16.msra.mxu0 %v6269_v28 }
 0x250   : > { %5995 = vmatprep.subr.bf16.mxu0 %v6270_v29 }
 0x253   : > { %5996 = vmatpush3.bf16.msra.mxu0 %v6270_v29 }
 0x254   : > { %5997 = vmatprep.subr.bf16.mxu0 %v6271_v30 }
 0x257   : > { %5998 = vmatpush3.bf16.msra.mxu0 %v6271_v30 }
 0x258   : > { %5999 = vmatprep.subr.bf16.mxu0 %v6272_v31 }
 0x25b   : > { %6000 = vmatpush3.bf16.msra.mxu0 %v6272_v31 }
 0x25c   : > { %6001 = vmatprep.subr.bf16.mxu0 %v6273_v32 }
 0x25f   : > { %6002 = vmatpush3.bf16.msra.mxu0 %v6273_v32 }
 0x260   : > { %6003 = vmatprep.subr.bf16.mxu0 %v6274_v33 }
 0x263   : > { %6004 = vmatpush3.bf16.msra.mxu0 %v6274_v33 }
 0x264   : > { %6057 = vmatprep.subr.bf16.mxu0 %v7030_v56 }
 0x266   : > { %6006 = vmatmul.mubr.bf16.vlgmr.msra.gmra.mrb[4].mxu0 %v1164_v25  ;;  %v7845_v25 = vsub.s32 %v1613_v13, %v7823_v0 }
 0x267   : > { %6059 = vmatprep.mubr.msk.bf16.mxu0 %vm7031_vm0, %v7030_v56 }
 0x318   : > { %v5987_v35 = vpop.f32.mrb[0].mxu1 }
 0x319   : > { %v1390_v37 = vpop.f32.mrb[1].mxu1  ;;  %v5967_v38 = vpop.f32.mrb[0].mxu0  ;;  %v1399_v42 = vadd.f32 %v5987_v35, %v5716_v36 }
 0x31a   : > { %v5988_v39 = vpop.f32.mrb[2].mxu1  ;;  %v1279_v40 = vadd.f32 %v5967_v38, %v5707_v34  ;;  %v1270_v41 = vpop.f32.mrb[1].mxu0  ;;  %v1391_v47 = vadd.f32 %v5716_v36, %v1390_v37 }
 0x31b   : > { %v1402_v43 = vadd.f32 %v5988_v39, %v5716_v36  ;;  %v1393_v44 = vpop.f32.mrb[3].mxu1  ;;  %v1271_v45 = vadd.f32 %v5707_v34, %v1270_v41  ;;  %v5968_v46 = vpop.f32.mrb[2].mxu0 }
 0x31c   : > { %v1394_v48 = vadd.f32 %v5716_v36, %v1393_v44  ;;  %v1282_v49 = vadd.f32 %v5968_v46, %v5707_v34  ;;  %v1273_v50 = vpop.f32.mrb[3].mxu0 }
 0x31d   : > { %v7790_v51 = vpack.c.bf16 %v1402_v43, %v1399_v42  ;;  %v1274_v52 = vadd.f32 %v5707_v34, %v1273_v50 }
 0x31e   : > { %v2067_v53 = vpack.c.bf16 %v1394_v48, %v1391_v47  ;;  %v7792_v54 = vpack.c.bf16 %v1282_v49, %v1279_v40 }
 0x31f   : > { %v7794_v55 = vpack.c.bf16 %v1274_v52, %v1271_v45  ;;  %v2103_v47 = vshrl.u32 %v7790_v51, 16 }
 0x320   : > { %2079 = vrot.lane.b32.xlu1 %v2067_v53, %s7027_s5  ;;  %2071 = vrot.lane.b32.xlu0 %v2067_v53, %s7028_s20  ;;  %v2087_v18 = vshrl.u32 %v2067_v53, 16  ;;  %v1567_v52 = vshrl.u32 %v7792_v54, 16 }
 0x321   : > { %v1545_v34 = vshrl.u32 %v7794_v55, 16 }
 0x324   : > { %2075 = vrot.lane.b32.xlu0 %v2067_v53, %s7029_s27  ;;  %1529 = vrot.lane.b32.xlu1 %v7794_v55, %s7028_s20 }
 0x328   : > { %1533 = vrot.lane.b32.xlu0 %v7794_v55, %s7029_s27  ;;  %1537 = vrot.lane.b32.xlu1 %v7794_v55, %s7027_s5 }
 0x32c   : > { %2073 = vrot.lane.b32.xlu0 %v7790_v51, %s7028_s20  ;;  %2077 = vrot.lane.b32.xlu1 %v7790_v51, %s7029_s27 }
 0x330   : > { %2081 = vrot.lane.b32.xlu0 %v7790_v51, %s7027_s5  ;;  %1531 = vrot.lane.b32.xlu1 %v7792_v54, %s7028_s20 }
 0x334   : > { %1535 = vrot.lane.b32.xlu0 %v7792_v54, %s7029_s27  ;;  %1539 = vrot.lane.b32.xlu1 %v7792_v54, %s7027_s5 }
 0x339   : > { %v7825_v5 = vpop.f32.mrb[4].mxu0 }
 0x33a   : > { %v7827_v6 = vpop.f32.mrb[5].mxu0 }
 0x33b   : > { %v7832_v9 = vpop.f32.mrb[6].mxu0 }
 0x33c   : > { %v7839_v16 = vpop.f32.mrb[7].mxu0 }
 0x392   : > { %v2072_v57 = vpop.permute.xlu0 %2071  ;;  %v2080_v58 = vpop.permute.xlu1 %2079 }
 0x393   : > { %v2085_v8 = vpack.i.b16 %v2072_v57, %v2067_v53  ;;  %v2088_v12 = vshrl.u32 %v2072_v57, 16  ;;  %v2096_v17 = vshrl.u32 %v2080_v58, 16 }
 0x395   : > { %v2122_v21 = vrot.slane %v2085_v8, %v7830_v7  ;;  %v2089_v23 = vpack.i.b16 %v2088_v12, %v2087_v18  ;;  %v2115_v24 = vcombine.high %v2085_v8, %v7836_v11 }
 0x396   : > { %v2076_v62 = vpop.permute.xlu0 %2075  ;;  %v1530_v3 = vpop.permute.xlu1 %1529 }
 0x397   : > { %v2093_v4 = vpack.i.b16 %v2080_v58, %v2076_v62  ;;  %v2095_v14 = vshrl.u32 %v2076_v62, 16  ;;  %v1543_v29 = vpack.i.b16 %v1530_v3, %v7794_v55  ;;  %v1546_v35 = vshrl.u32 %v1530_v3, 16 }
 0x398   : > { %v2129_v36 = vrot.slane %v2115_v24, %v7830_v7  ;;  %v2181_v37 = vcombine.high %v2089_v23, %v7836_v11  ;;  %v2188_v44 = vrot.slane %v2089_v23, %v7830_v7 }
 0x399   : > { %v2137_v15 = vrot.slane %v2093_v4, %v7830_v7  ;;  %v2130_v22 = vcombine.high %v2093_v4, %v7836_v11  ;;  %v2097_v26 = vpack.i.b16 %v2096_v17, %v2095_v14  ;;  %v1579_v42 = vcombine.high %v1543_v29, %v7836_v11 }
 0x39a   : > { %v1534_v19 = vpop.permute.xlu0 %1533  ;;  %v1538_v20 = vpop.permute.xlu1 %1537  ;;  %v1547_v50 = vpack.i.b16 %v1546_v35, %v1545_v34  ;;  %v2195_v53 = vrot.slane %v2181_v37, %v7830_v7  ;;  %v1586_v58 = vrot.slane %v1543_v29, %v7830_v7 }
 0x39b   : > { %v2145_v27 = vcombine.low %v2122_v21, %v2137_v15  ;;  %v2146_v28 = vcombine.high %v2122_v21, %v2137_v15  ;;  %v1551_v30 = vpack.i.b16 %v1538_v20, %v1534_v19  ;;  %v1553_v31 = vshrl.u32 %v1534_v19, 16 }
 0x39c   : > { %v1554_v32 = vshrl.u32 %v1538_v20, 16  ;;  %v2144_v33 = vrot.slane %v2130_v22, %v7830_v7  ;;  %v2196_v38 = vcombine.high %v2097_v26, %v7836_v11  ;;  %v2203_v39 = vrot.slane %v2097_v26, %v7830_v7 }
 0x39d   : > { %v2153_v40 = vrot.slane %v2145_v27, %v7845_v25  ;;  %v2160_v41 = vrot.slane %v2146_v28, %v7845_v25  ;;  %v1594_v43 = vcombine.high %v1551_v30, %v7836_v11  ;;  %v1601_v46 = vrot.slane %v1551_v30, %v7830_v7 }
 0x39e   : > { %v1555_v45 = vpack.i.b16 %v1554_v32, %v1553_v31  ;;  %v2161_v48 = vcombine.low %v2129_v36, %v2144_v33  ;;  %v2162_v49 = vcombine.high %v2129_v36, %v2144_v33  ;;  %v2210_v55 = vrot.slane %v2196_v38, %v7830_v7  ;;  %v2074_v4 = vpop.permute.xlu0 %2073 }
 0x39f   : > { %v2211_v57 = vcombine.low %v2188_v44, %v2203_v39  ;;  %v2212_v59 = vcombine.high %v2188_v44, %v2203_v39  ;;  %v2379_v60 = vcombine.low %v2153_v40, %v2160_v41  ;;  %v1593_v61 = vrot.slane %v1579_v42, %v7830_v7 }
 0x3a0   : > { %v1608_v62 = vrot.slane %v1594_v43, %v7830_v7  ;;  %v5742_v63 = vcombine.high %v2153_v40, %v2160_v41  ;;  %v1609_v1 = vcombine.low %v1586_v58, %v1601_v46  ;;  %v1610_v2 = vcombine.high %v1586_v58, %v1601_v46  ;;  %v2078_v46 = vpop.permute.xlu1 %2077 }
 0x3a1   : > { %v1660_v3 = vcombine.high %v1555_v45, %v7836_v11  ;;  %v2169_v8 = vrot.slane %v2161_v48, %v7845_v25  ;;  %v2176_v12 = vrot.slane %v2162_v49, %v7845_v25  ;;  %v1645_v13 = vcombine.high %v1547_v50, %v7836_v11 }
 0x3a2   : > { %v1667_v14 = vrot.slane %v1555_v45, %v7830_v7  ;;  %v7873_v15 = vrot.slane %v2211_v57, %v7845_v25  ;;  %v2227_v17 = vcombine.low %v2195_v53, %v2210_v55  ;;  %v2228_v18 = vcombine.high %v2195_v53, %v2210_v55  ;;  %v2082_v37 = vpop.permute.xlu0 %2081 }
 0x3a3   : > { %v1652_v19 = vrot.slane %v1547_v50, %v7830_v7  ;;  %v2226_v20 = vrot.slane %v2212_v59, %v7845_v25  ;;  %v7878_v21 = vrot.slane %v2379_v60, %v7830_v7  ;;  %v1625_v22 = vcombine.low %v1593_v61, %v1608_v62 }
 0x3a4   : > { %v1626_v23 = vcombine.high %v1593_v61, %v1608_v62  ;;  %v7881_v24 = vrot.slane %v5742_v63, %v7830_v7  ;;  %v1617_v26 = vrot.slane %v1609_v1, %v7845_v25  ;;  %v1624_v27 = vrot.slane %v1610_v2, %v7845_v25 }
 0x3a5   : > { %v1674_v28 = vrot.slane %v1660_v3, %v7830_v7  ;;  %v2395_v29 = vcombine.low %v2169_v8, %v2176_v12  ;;  %v5743_v30 = vcombine.high %v2169_v8, %v2176_v12  ;;  %v1675_v31 = vcombine.low %v1652_v19, %v1667_v14 }
 0x3a6   : > { %v1676_v32 = vcombine.high %v1652_v19, %v1667_v14  ;;  %v2235_v33 = vrot.slane %v2227_v17, %v7845_v25  ;;  %v2242_v34 = vrot.slane %v2228_v18, %v7845_v25  ;;  %v1659_v35 = vrot.slane %v1645_v13, %v7830_v7 }
 0x3a7   : > { %v2101_v36 = vpack.i.b16 %v2074_v4, %v7790_v51  ;;  %v2429_v38 = vcombine.low %v7873_v15, %v2226_v20  ;;  %v1633_v39 = vrot.slane %v1625_v22, %v7845_v25  ;;  %v1640_v40 = vrot.slane %v1626_v23, %v7845_v25 }
 0x3a8   : > { %v2104_v41 = vshrl.u32 %v2074_v4, 16  ;;  %v5744_v42 = vcombine.high %v7873_v15, %v2226_v20  ;;  %v1691_v43 = vcombine.low %v1659_v35, %v1674_v28  ;;  %v1692_v44 = vcombine.high %v1659_v35, %v1674_v28 }
 0x3a9   : > { %v1843_v45 = vcombine.low %v1617_v26, %v1624_v27  ;;  %v1683_v48 = vrot.slane %v1675_v31, %v7845_v25  ;;  %v1690_v49 = vrot.slane %v1676_v32, %v7845_v25  ;;  %v5734_v50 = vcombine.high %v1617_v26, %v1624_v27 }
 0x3aa   : > { %v2112_v51 = vshrl.u32 %v2082_v37, 16  ;;  %v2445_v53 = vcombine.low %v2235_v33, %v2242_v34  ;;  %v5745_v55 = vcombine.high %v2235_v33, %v2242_v34  ;;  %v2247_v57 = vcombine.high %v2101_v36, %v7836_v11 }
 0x3ab   : > { %v2109_v58 = vpack.i.b16 %v2082_v37, %v2078_v46  ;;  %v1859_v59 = vcombine.low %v1633_v39, %v1640_v40  ;;  %v5735_v60 = vcombine.high %v1633_v39, %v1640_v40  ;;  %v2105_v61 = vpack.i.b16 %v2104_v41, %v2103_v47  ;;  %v7906_v47 = vpop.permute.xlu1 %1531 }
 0x3ac   : > { %v2111_v62 = vshrl.u32 %v2078_v46, 16  ;;  %v1699_v63 = vrot.slane %v1691_v43, %v7845_v25  ;;  %v1706_v1 = vrot.slane %v1692_v44, %v7845_v25  ;;  %v1850_v2 = vrot.slane %v1843_v45, %v7830_v7  ;;  %v1536_v44 = vpop.permute.xlu0 %1535 }
 0x3ad   : > { %v2254_v3 = vrot.slane %v2101_v36, %v7830_v7  ;;  %v1858_v4 = vrot.slane %v5734_v50, %v7830_v7  ;;  %v1893_v8 = vcombine.low %v1683_v48, %v1690_v49  ;;  %v5736_v12 = vcombine.high %v1683_v48, %v1690_v49 }
 0x3ae   : > { %v2113_v13 = vpack.i.b16 %v2112_v51, %v2111_v62  ;;  %v7903_v14 = vrot.slane %v2247_v57, %v7830_v7  ;;  %v2269_v15 = vrot.slane %v2109_v58, %v7830_v7  ;;  %v2402_v17 = vrot.slane %v2395_v29, %v7830_v7 }
 0x3af   : > { %v2410_v18 = vrot.slane %v5743_v30, %v7830_v7  ;;  %v7911_v19 = vrot.slane %v1859_v59, %v7830_v7  ;;  %v7914_v20 = vrot.slane %v5735_v60, %v7830_v7  ;;  %v2313_v22 = vcombine.high %v2105_v61, %v7836_v11  ;;  %v1540_v45 = vpop.permute.xlu1 %1539 }
 0x3b0   : > { %v2262_v23 = vcombine.high %v2109_v58, %v7836_v11  ;;  %v1909_v26 = vcombine.low %v1699_v63, %v1706_v1  ;;  %v5737_v27 = vcombine.high %v1699_v63, %v1706_v1  ;;  %v2436_v28 = vrot.slane %v2429_v38, %v7830_v7 }
 0x3b1   : > { %v2444_v31 = vrot.slane %v5744_v42, %v7830_v7  ;;  %v1875_v32 = vcombine.low %v1850_v2, %v1858_v4  ;;  %v1900_v29 = vrot.slane %v1893_v8, %v7830_v7  ;;  %v1908_v30 = vrot.slane %v5736_v12, %v7830_v7 }
 0x3b2   : > { %v2328_v33 = vcombine.high %v2113_v13, %v7836_v11  ;;  %v2277_v34 = vcombine.low %v2254_v3, %v2269_v15  ;;  %v2419_v35 = vcombine.low %v2402_v17, %v2410_v18  ;;  %v2452_v36 = vrot.slane %v2445_v53, %v7830_v7 }
 0x3b3   : > { %v2460_v37 = vrot.slane %v5745_v55, %v7830_v7  ;;  %v2320_v39 = vrot.slane %v2105_v61, %v7830_v7  ;;  %v2327_v40 = vrot.slane %v2313_v22, %v7830_v7  ;;  %v2276_v38 = vrot.slane %v2262_v23, %v7830_v7 }
 0x3b4   : > { %v2278_v41 = vcombine.high %v2254_v3, %v2269_v15  ;;  %v1916_v42 = vrot.slane %v1909_v26, %v7830_v7  ;;  %v1924_v43 = vrot.slane %v5737_v27, %v7830_v7  ;;  %v2411_v46 = vcombine.low %v7878_v21, %v7881_v24 }
 0x3b5   : > { %v2461_v48 = vcombine.low %v2436_v28, %v2444_v31  ;;  %v7933_v49 = vrot.slane %v1875_v32, %v7845_v25  ;;  %v1883_v50 = vcombine.low %v7911_v19, %v7914_v20  ;;  %v1925_v51 = vcombine.low %v1900_v29, %v1908_v30 }
 0x3b6   : > { %v2335_v53 = vrot.slane %v2113_v13, %v7830_v7  ;;  %v2285_v55 = vrot.slane %v2277_v34, %v7845_v25  ;;  %v2342_v57 = vrot.slane %v2328_v33, %v7830_v7  ;;  %v7941_v58 = vrot.slane %v2419_v35, %v7845_v25 }
 0x3b7   : > { %v2469_v59 = vcombine.low %v2452_v36, %v2460_v37  ;;  %v2292_v21 = vrot.slane %v2278_v41, %v7845_v25  ;;  %v2293_v24 = vcombine.low %v7903_v14, %v2276_v38  ;;  %v1575_v60 = vshrl.u32 %v1536_v44, 16 }
 0x3b8   : > { %v1576_v61 = vshrl.u32 %v1540_v45, 16  ;;  %v1933_v62 = vcombine.low %v1916_v42, %v1924_v43  ;;  %v7946_v63 = vrot.slane %v2411_v46, %v7845_v25  ;;  %v2468_v1 = vrot.slane %v2461_v48, %v7845_v25 }
 0x3b9   : > { %v2476_v2 = vrot.slane %v2469_v59, %v7845_v25  ;;  %v2294_v3 = vcombine.high %v7903_v14, %v2276_v38  ;;  %v2343_v4 = vcombine.low %v2320_v39, %v2335_v53  ;;  %v2344_v8 = vcombine.high %v2320_v39, %v2335_v53  ;;  %v5725_v53 = vld [vmem:[%s945_s28] ss:$0 sm:$0xff] }
 0x3ba   : > { %v1568_v12 = vshrl.u32 %v7906_v47, 16  ;;  %v2359_v13 = vcombine.low %v2327_v40, %v2342_v57  ;;  %v1565_v15 = vpack.i.b16 %v7906_v47, %v7792_v54  ;;  %v2427_v17 = vcombine.low %v7946_v63, %v7941_v58 }
 0x3bb   : > { %v2477_v18 = vcombine.low %v2468_v1, %v2476_v2  ;;  %v7957_v19 = vrot.slane %v2293_v24, %v7845_v25  ;;  %v2360_v20 = vcombine.high %v2327_v40, %v2342_v57  ;;  %v2479_v22 = vcombine.low %v2285_v55, %v2292_v21 }
 0x3bc   : > { %v1577_v23 = vpack.i.b16 %v1576_v61, %v1575_v60  ;;  %v5746_v26 = vcombine.high %v2285_v55, %v2292_v21  ;;  %v1573_v14 = vpack.i.b16 %v1540_v45, %v1536_v44  ;;  %v7960_v28 = vrot.slane %v1933_v62, %v7845_v25 }
 0x3bd   : > { %v2581_v27 = vpack.i.b16 %v2477_v18, %v2427_v17  ;;  %v7963_v31 = vrot.slane %v2294_v3, %v7845_v25  ;;  %v7966_v47 = vrot.slane %v2343_v4, %v7845_v25  ;;  %v7969_v32 = vrot.slane %v2344_v8, %v7845_v25 }
 0x3be   : > { %v1569_v29 = vpack.i.b16 %v1568_v12, %v1567_v52  ;;  %v7975_v33 = vrot.slane %v1883_v50, %v7845_v25  ;;  %v7978_v34 = vrot.slane %v1925_v51, %v7845_v25  ;;  %v2583_v35 = vshrl.u32 %v2477_v18, 16 }
 0x3bf   : > { %v3152_v30 = vsel %vm3147_vm1, %v2581_v27, 0  ;;  %v2367_v36 = vrot.slane %v2359_v13, %v7845_v25  ;;  %v2374_v37 = vrot.slane %v2360_v20, %v7845_v25  ;;  %v7983_v39 = vrot.slane %v2479_v22, %v7830_v7 }
 0x3c0   : > { %v1792_v54 = vcombine.high %v1577_v23, %v7836_v11  ;;  %6010 = vmatpush3.bf16.xpose.msra.mxu1 %v3152_v30  ;;  %v7987_v52 = vrot.slane %v5746_v26, %v7830_v7  ;;  %v1726_v40 = vcombine.high %v1573_v14, %v7836_v11  ;;  %v1941_v38 = vcombine.low %v7978_v34, %v7960_v28 }
 0x3c1   : > { %6015 = vmatprep.subr.bf16.mxu1 %v7030_v56  ;;  %v2582_v41 = vshrl.u32 %v2427_v17, 16  ;;  %v2495_v42 = vcombine.low %v7957_v19, %v7963_v31  ;;  %v5747_v43 = vcombine.high %v7957_v19, %v7963_v31  ;;  %v1711_v44 = vcombine.high %v1565_v15, %v7836_v11 }
 0x3c2   : > { %v1777_v45 = vcombine.high %v1569_v29, %v7836_v11  ;;  %v2529_v46 = vcombine.low %v7966_v47, %v7969_v32  ;;  %v1733_v48 = vrot.slane %v1573_v14, %v7830_v7  ;;  %v1891_v50 = vcombine.low %v7933_v49, %v7975_v33 }
 0x3c3   : > { %v2584_v51 = vpack.i.b16 %v2583_v35, %v2582_v41  ;;  %v5748_v55 = vcombine.high %v7966_v47, %v7969_v32  ;;  %v2545_v57 = vcombine.low %v2367_v36, %v2374_v37  ;;  %v1806_v59 = vrot.slane %v1792_v54, %v7830_v7 }
 0x3c4   : > { %v1519_v21 = vadd.f32 %v7825_v5, %v5725_v53  ;;  %v5749_v24 = vcombine.high %v2367_v36, %v2374_v37  ;;  %v1718_v60 = vrot.slane %v1565_v15, %v7830_v7  ;;  %v1740_v61 = vrot.slane %v1726_v40, %v7830_v7 }
 0x3c5   : > { %v2045_v62 = vpack.i.b16 %v1941_v38, %v1891_v50  ;;  %v1725_v3 = vrot.slane %v1711_v44, %v7830_v7  ;;  %v1784_v4 = vrot.slane %v1569_v29, %v7830_v7  ;;  %v1791_v8 = vrot.slane %v1777_v45, %v7830_v7 }
 0x3c6   : > { %v1799_v12 = vrot.slane %v1577_v23, %v7830_v7  ;;  %v1741_v13 = vcombine.low %v1718_v60, %v1733_v48  ;;  %v3199_v17 = vsel %vm3147_vm1, %v2584_v51, 0  ;;  %v2478_v5 = vcombine.high %v2468_v1, %v2476_v2 }
 0x3c7   : > { %6012 = vmatmul.mubr.msk.bf16.vlgmr.msra.gmra.mrb[4].mxu1 %vm3147_vm1, %v2045_v62  ;;  %v1522_v18 = vadd.f32 %v7832_v9, %v5725_v53  ;;  %v1742_v15 = vcombine.high %v1718_v60, %v1733_v48  ;;  %v1823_v19 = vcombine.low %v1791_v8, %v1806_v59  ;;  %v1824_v20 = vcombine.high %v1791_v8, %v1806_v59 }
 0x3c8   : > { %6016 = vmatpush3.bf16.xpose.msra.mxu1 %v3199_v17  ;;  %6017 = vmatprep.mubr.msk.bf16.mxu1 %vm7031_vm0, %v7030_v56  ;;  %v2047_v22 = vshrl.u32 %v1941_v38, 16  ;;  %v1757_v26 = vcombine.low %v1725_v3, %v1740_v61  ;;  %v2428_v23 = vcombine.high %v7946_v63, %v7941_v58  ;;  %v1511_v14 = vadd.f32 %v5725_v53, %v7827_v6 }
 0x3c9   : > { %6021 = vmatprep.subr.bf16.mxu1 %v7030_v56  ;;  %v8025_v27 = vpack.c.bf16 %v1522_v18, %v1519_v21  ;;  %v1758_v1 = vcombine.high %v1725_v3, %v1740_v61  ;;  %v1807_v9 = vcombine.low %v1784_v4, %v1799_v12  ;;  %v1808_v2 = vcombine.high %v1784_v4, %v1799_v12 }
 0x3ca   : > { %v2046_v31 = vshrl.u32 %v1891_v50, 16  ;;  %v2587_v47 = vpack.i.b16 %v2478_v5, %v2428_v23  ;;  %v2552_v32 = vrot.slane %v2545_v57, %v7830_v7  ;;  %v2560_v29 = vrot.slane %v5749_v24, %v7830_v7 }
 0x3cb   : > { %v1514_v30 = vadd.f32 %v5725_v53, %v7839_v16  ;;  %v1831_v35 = vrot.slane %v1823_v19, %v7845_v25  ;;  %v1838_v36 = vrot.slane %v1824_v20, %v7845_v25  ;;  %v2502_v6 = vrot.slane %v2495_v42, %v7830_v7 }
 0x3cc   : > { %v2048_v58 = vpack.i.b16 %v2047_v22, %v2046_v31  ;;  %v2510_v63 = vrot.slane %v5747_v43, %v7830_v7  ;;  %v2536_v37 = vrot.slane %v2529_v46, %v7830_v7  ;;  %v2544_v54 = vrot.slane %v5748_v55, %v7830_v7 }
 0x3cd   : > { %v8036_v40 = vpack.c.bf16 %v1514_v30, %v1511_v14  ;;  %v1765_v38 = vrot.slane %v1757_v26, %v7845_v25  ;;  %v1772_v41 = vrot.slane %v1758_v1, %v7845_v25  ;;  %v1815_v16 = vrot.slane %v1807_v9, %v7845_v25 }
 0x3ce   : > { %v1822_v44 = vrot.slane %v1808_v2, %v7845_v25  ;;  %v1749_v45 = vrot.slane %v1741_v13, %v7845_v25  ;;  %v3246_v42 = vsel %vm3147_vm1, %v2587_v47, 0  ;;  %v2589_v43 = vshrl.u32 %v2478_v5, 16 }
 0x3cf   : > { %6018 = vmatmul.mubr.msk.bf16.vlgmr.msra.gmra.mrb[8].mxu1 %vm3147_vm1, %v2048_v58  ;;  %v2569_v46 = vcombine.low %v2552_v32, %v2560_v29  ;;  %2607 = vrot.lane.b32.xlu1 %v8036_v40, %s7028_s20  ;;  %v1756_v48 = vrot.slane %v1742_v15, %v7845_v25  ;;  %v2009_v50 = vcombine.low %v1831_v35, %v1838_v36  ;;  %v2588_v55 = vshrl.u32 %v2428_v23, 16 }
 0x3d0   : > { %v5741_v51 = vcombine.high %v1831_v35, %v1838_v36  ;;  %6022 = vmatpush3.bf16.xpose.msra.mxu1 %v3246_v42  ;;  %6023 = vmatprep.mubr.msk.bf16.mxu1 %vm7031_vm0, %v7030_v56  ;;  %v1942_v53 = vcombine.high %v7978_v34, %v7960_v28  ;;  %v2519_v57 = vcombine.low %v2502_v6, %v2510_v63 }
 0x3d1   : > { %6027 = vmatprep.subr.bf16.mxu1 %v7030_v56  ;;  %v2561_v59 = vcombine.low %v2536_v37, %v2544_v54  ;;  %v1959_v21 = vcombine.low %v1765_v38, %v1772_v41  ;;  %v5739_v24 = vcombine.high %v1765_v38, %v1772_v41  ;;  %v1993_v60 = vcombine.low %v1815_v16, %v1822_v44 }
 0x3d2   : > { %v5740_v61 = vcombine.high %v1815_v16, %v1822_v44  ;;  %v1892_v62 = vcombine.high %v7933_v49, %v7975_v33  ;;  %v2590_v3 = vpack.i.b16 %v2589_v43, %v2588_v55  ;;  %v2511_v4 = vcombine.low %v7983_v39, %v7987_v52 }
 0x3d3   : > { %v2576_v8 = vrot.slane %v2569_v46, %v7845_v25  ;;  %v1943_v12 = vcombine.low %v1749_v45, %v1756_v48  ;;  %v5738_v28 = vcombine.high %v1749_v45, %v1756_v48  ;;  %v2016_v34 = vrot.slane %v2009_v50, %v7830_v7 }
 0x3d4   : > { %v2024_v13 = vrot.slane %v5741_v51, %v7830_v7  ;;  %v2051_v17 = vpack.i.b16 %v1942_v53, %v1892_v62  ;;  %v2526_v5 = vrot.slane %v2519_v57, %v7845_v25  ;;  %v2568_v18 = vrot.slane %v2561_v59, %v7845_v25 }
 0x3d5   : > { %v1966_v15 = vrot.slane %v1959_v21, %v7830_v7  ;;  %v1974_v49 = vrot.slane %v5739_v24, %v7830_v7  ;;  %v2000_v33 = vrot.slane %v1993_v60, %v7830_v7  ;;  %v2008_v39 = vrot.slane %v5740_v61, %v7830_v7 }
 0x3d6   : > { %v3293_v52 = vsel %vm3147_vm1, %v2590_v3, 0  ;;  %v2518_v19 = vrot.slane %v2511_v4, %v7845_v25  ;;  %v2577_v20 = vcombine.low %v2568_v18, %v2576_v8  ;;  %v1950_v22 = vrot.slane %v1943_v12, %v7830_v7  ;;  %v5841_v4 = vld [vmem:[#allocation6] sm:$0xff]  }
 0x3d7   : > { %6024 = vmatmul.mubr.msk.bf16.vlgmr.msra.gmra.mrb[12].mxu1 %vm3147_vm1, %v2051_v17  ;;  %v1958_v26 = vrot.slane %v5738_v28, %v7830_v7  ;;  %v2033_v23 = vcombine.low %v2016_v34, %v2024_v13  ;;  %v2053_v14 = vshrl.u32 %v1942_v53, 16  ;;  %v1983_v9 = vcombine.low %v1966_v15, %v1974_v49 }
 0x3d8   : > { %6028 = vmatpush3.bf16.xpose.msra.mxu1 %v3293_v52  ;;  %6029 = vmatprep.mubr.msk.bf16.mxu1 %vm7031_vm0, %v7030_v56  ;;  %v2527_v1 = vcombine.low %v2518_v19, %v2526_v5  ;;  %v2025_v2 = vcombine.low %v2000_v33, %v2008_v39  ;;  %v2052_v31 = vshrl.u32 %v1892_v62, 16  ;;  %v2595_v6 = vshrl.u32 %v2577_v20, 16 }
 0x3d9   : > { %6033 = vmatprep.subr.bf16.mxu1 %v7030_v56  ;;  %v1975_v32 = vcombine.low %v1950_v22, %v1958_v26  ;;  %v2040_v30 = vrot.slane %v2033_v23, %v7845_v25  ;;  %v1990_v36 = vrot.slane %v1983_v9, %v7845_v25  ;;  %v2578_v45 = vcombine.high %v2568_v18, %v2576_v8 }
 0x3da   : > { %v2593_v47 = vpack.i.b16 %v2577_v20, %v2527_v1  ;;  %v2054_v29 = vpack.i.b16 %v2053_v14, %v2052_v31  ;;  %v2032_v58 = vrot.slane %v2025_v2, %v7845_v25  ;;  %v2594_v54 = vshrl.u32 %v2527_v1, 16 }
 0x3db   : > { %v1982_v63 = vrot.slane %v1975_v32, %v7845_v25  ;;  %v2528_v43 = vcombine.high %v2518_v19, %v2526_v5  ;;  %v2601_v53 = vshrl.u32 %v2578_v45, 16  ;;  %v5842_v8 = vunpack.c.l.bf16 %v5841_v4 }
 0x3dc   : > { %v3340_v35 = vsel %vm3147_vm1, %v2593_v47, 0  ;;  %v2041_v37 = vcombine.low %v2032_v58, %v2040_v30  ;;  %v2596_v41 = vpack.i.b16 %v2595_v6, %v2594_v54  ;;  %v2042_v55 = vcombine.high %v2032_v58, %v2040_v30  ;;  %v5848_v6 = vld [vmem:[#allocation6 + $0x8] sm:$0xff]  }
 0x3dd   : > { %v1991_v38 = vcombine.low %v1982_v63, %v1990_v36  ;;  %v2599_v48 = vpack.i.b16 %v2578_v45, %v2528_v43  ;;  %v2600_v57 = vshrl.u32 %v2528_v43, 16  ;;  %v1992_v59 = vcombine.high %v1982_v63, %v1990_v36 }
 0x3de   : > { %v3387_v44 = vsel %vm3147_vm1, %v2596_v41, 0  ;;  %v2059_v42 = vshrl.u32 %v2041_v37, 16  ;;  %v2065_v61 = vshrl.u32 %v2042_v55, 16  ;;  %v5843_v12 = vunpack.c.h.bf16 %v5841_v4 }
 0x3df   : > { %6030 = vmatmul.mubr.msk.bf16.vlgmr.msra.gmra.mrb[16].mxu1 %vm3147_vm1, %v2054_v29  ;;  %v2057_v16 = vpack.i.b16 %v2041_v37, %v1991_v38  ;;  %v2058_v46 = vshrl.u32 %v1991_v38, 16  ;;  %v3434_v51 = vsel %vm3147_vm1, %v2599_v48, 0  ;;  %v2602_v21 = vpack.i.b16 %v2601_v53, %v2600_v57 }
 0x3e0   : > { %6034 = vmatpush3.bf16.xpose.msra.mxu1 %v3340_v35  ;;  %6035 = vmatprep.mubr.msk.bf16.mxu1 %vm7031_vm0, %v7030_v56  ;;  %v2063_v24 = vpack.i.b16 %v2042_v55, %v1992_v59  ;;  %v2064_v62 = vshrl.u32 %v1992_v59, 16  ;;  %v5846_v41 = vunpack.c.l.bf16 %v5848_v6 }
 0x3e1   : > { %6039 = vmatprep.subr.bf16.mxu1 %v7030_v56  ;;  %v2060_v50 = vpack.i.b16 %v2059_v42, %v2058_v46  ;;  %v3481_v60 = vsel %vm3147_vm1, %v2602_v21, 0 }
 0x3e2   : > { %v2066_v3 = vpack.i.b16 %v2065_v61, %v2064_v62 }
 0x3e7   : > { %6036 = vmatmul.mubr.msk.bf16.vlgmr.msra.gmra.mrb[20].mxu1 %vm3147_vm1, %v2057_v16  ;;  %v5847_v16 = vunpack.c.h.bf16 %v5848_v6 }
 0x3e8   : > { %6040 = vmatpush3.bf16.xpose.msra.mxu1 %v3387_v44  ;;  %6041 = vmatprep.mubr.msk.bf16.mxu1 %vm7031_vm0, %v7030_v56 }
 0x3e9   : > { %6045 = vmatprep.subr.bf16.mxu1 %v7030_v56 }
 0x3ef   : > { %6042 = vmatmul.mubr.msk.bf16.vlgmr.msra.gmra.mrb[24].mxu1 %vm3147_vm1, %v2060_v50 }
 0x3f0   : > { %6046 = vmatpush3.bf16.xpose.msra.mxu1 %v3434_v51  ;;  %6047 = vmatprep.mubr.msk.bf16.mxu1 %vm7031_vm0, %v7030_v56 }
 0x3f1   : > { %6051 = vmatprep.subr.bf16.mxu1 %v7030_v56 }
 0x3f7   : > { %6048 = vmatmul.mubr.msk.bf16.vlgmr.msra.gmra.mrb[28].mxu1 %vm3147_vm1, %v2063_v24 }
 0x3f8   : > { %6052 = vmatpush3.bf16.xpose.msra.mxu1 %v3481_v60  ;;  %6053 = vmatprep.mubr.msk.bf16.mxu1 %vm7031_vm0, %v7030_v56 }
 0x3f9   : > { %6063 = vmatprep.subr.bf16.mxu1 %v7030_v56 }
 0x3ff   : > { %6054 = vmatmul.mubr.msk.bf16.vlgmr.msra.gmra.mrb[32].mxu1 %vm3147_vm1, %v2066_v3 }
 0x400   : > { %6065 = vmatprep.mubr.msk.bf16.mxu1 %vm7031_vm0, %v7030_v56 }
 0x49a   : > { %v3188_v28 = vpop.f32.mrb[4].mxu1 }
 0x49b   : > { %v8101_v34 = vadd.f32 %v5842_v8, %v3188_v28  ;;  %v6013_v13 = vpop.f32.mrb[5].mxu1 }
 0x49c   : > { %v3191_v17 = vpop.f32.mrb[6].mxu1 }
 0x49d   : > { %v8103_v5 = vadd.f32 %v5843_v12, %v3191_v17  ;;  %v6014_v18 = vpop.f32.mrb[7].mxu1  ;;  %v3549_v15 = vsel %vm3548_vm2, %v8101_v34, -inf }
 0x49e   : > { %3550 = vmax.xlane.f32.xlu0 %v3549_v15 }
 0x49f   : > { %v3552_v49 = vsel %vm3548_vm2, %v8103_v5, -inf }
 0x4a0   : > { %3553 = vmax.xlane.f32.xlu1 %v3552_v49 }
 0x4a2   : > { %v3235_v33 = vpop.f32.mrb[8].mxu1 }
 0x4a3   : > { %v8109_v39 = vadd.f32 %v5842_v8, %v3235_v33  ;;  %v6019_v52 = vpop.f32.mrb[9].mxu1 }
 0x4a4   : > { %v3238_v19 = vpop.f32.mrb[10].mxu1 }
 0x4a5   : > { %v8111_v20 = vadd.f32 %v5843_v12, %v3238_v19  ;;  %v6020_v22 = vpop.f32.mrb[11].mxu1  ;;  %v3555_v26 = vsel %vm3548_vm2, %v8109_v39, -inf }
 0x4a6   : > { %3556 = vmax.xlane.f32.xlu0 %v3555_v26 }
 0x4a7   : > { %v3558_v23 = vsel %vm3548_vm2, %v8111_v20, -inf }
 0x4aa   : > { %3559 = vmax.xlane.f32.xlu0 %v3558_v23  ;;  %v3282_v14 = vpop.f32.mrb[12].mxu1  ;;  %v8173_v23 = vpop.permute.xlu1 %2607 }
 0x4ab   : > { %v8117_v1 = vadd.f32 %v5842_v8, %v3282_v14  ;;  %v6025_v9 = vpop.f32.mrb[13].mxu1 }
 0x4ac   : > { %v3285_v2 = vpop.f32.mrb[14].mxu1 }
 0x4ad   : > { %v8119_v31 = vadd.f32 %v5843_v12, %v3285_v2  ;;  %v6026_v47 = vpop.f32.mrb[15].mxu1  ;;  %v3561_v32 = vsel %vm3548_vm2, %v8117_v1, -inf }
 0x4ae   : > { %3562 = vmax.xlane.f32.xlu1 %v3561_v32 }
 0x4af   : > { %v3564_v29 = vsel %vm3548_vm2, %v8119_v31, -inf }
 0x4b0   : > { %3565 = vmax.xlane.f32.xlu0 %v3564_v29 }
 0x4b2   : > { %v3329_v30 = vpop.f32.mrb[16].mxu1 }
 0x4b3   : > { %v8125_v35 = vadd.f32 %v5842_v8, %v3329_v30  ;;  %v6031_v36 = vpop.f32.mrb[17].mxu1 }
 0x4b4   : > { %v3332_v58 = vpop.f32.mrb[18].mxu1 }
 0x4b5   : > { %v8127_v63 = vadd.f32 %v5843_v12, %v3332_v58  ;;  %v6032_v37 = vpop.f32.mrb[19].mxu1  ;;  %v3567_v54 = vsel %vm3548_vm2, %v8125_v35, -inf }
 0x4b6   : > { %3568 = vmax.xlane.f32.xlu1 %v3567_v54 }
 0x4b7   : > { %v3570_v38 = vsel %vm3548_vm2, %v8127_v63, -inf }
 0x4b8   : > { %3571 = vmax.xlane.f32.xlu0 %v3570_v38 }
 0x4ba   : > { %v3376_v44 = vpop.f32.mrb[20].mxu1 }
 0x4bb   : > { %v8133_v45 = vadd.f32 %v5846_v41, %v3376_v44  ;;  %v6037_v42 = vpop.f32.mrb[21].mxu1 }
 0x4bc   : > { %v3379_v43 = vpop.f32.mrb[22].mxu1 }
 0x4bd   : > { %v8135_v46 = vadd.f32 %v5847_v16, %v3379_v43  ;;  %v6038_v48 = vpop.f32.mrb[23].mxu1  ;;  %v3573_v50 = vsel %vm3548_vm2, %v8133_v45, -inf }
 0x4be   : > { %3574 = vmax.xlane.f32.xlu1 %v3573_v50 }
 0x4bf   : > { %v3576_v51 = vsel %vm3548_vm2, %v8135_v46, -inf }
 0x4c0   : > { %3577 = vmax.xlane.f32.xlu0 %v3576_v51 }
 0x4c2   : > { %v3423_v53 = vpop.f32.mrb[24].mxu1 }
 0x4c3   : > { %v8141_v55 = vadd.f32 %v5846_v41, %v3423_v53  ;;  %v6043_v57 = vpop.f32.mrb[25].mxu1 }
 0x4c4   : > { %v3426_v59 = vpop.f32.mrb[26].mxu1 }
 0x4c5   : > { %v8143_v21 = vadd.f32 %v5847_v16, %v3426_v59  ;;  %v6044_v24 = vpop.f32.mrb[27].mxu1  ;;  %v3579_v60 = vsel %vm3548_vm2, %v8141_v55, -inf }
 0x4c6   : > { %3580 = vmax.xlane.f32.xlu1 %v3579_v60 }
 0x4c7   : > { %v3582_v61 = vsel %vm3548_vm2, %v8143_v21, -inf }
 0x4c8   : > { %3583 = vmax.xlane.f32.xlu0 %v3582_v61 }
 0x4ca   : > { %v3470_v62 = vpop.f32.mrb[28].mxu1 }
 0x4cb   : > { %v8149_v3 = vadd.f32 %v5846_v41, %v3470_v62  ;;  %v6049_v4 = vpop.f32.mrb[29].mxu1 }
 0x4cc   : > { %v3473_v8 = vpop.f32.mrb[30].mxu1 }
 0x4cd   : > { %v8151_v12 = vadd.f32 %v5847_v16, %v3473_v8  ;;  %v6050_v28 = vpop.f32.mrb[31].mxu1  ;;  %v3585_v13 = vsel %vm3548_vm2, %v8149_v3, -inf }
 0x4ce   : > { %3586 = vmax.xlane.f32.xlu1 %v3585_v13 }
 0x4cf   : > { %v3588_v17 = vsel %vm3548_vm2, %v8151_v12, -inf }
 0x4d0   : > { %3589 = vmax.xlane.f32.xlu0 %v3588_v17 }
 0x4d2   : > { %v3517_v18 = vpop.f32.mrb[32].mxu1 }
 0x4d3   : > { %v8157_v15 = vadd.f32 %v5846_v41, %v3517_v18  ;;  %v6055_v49 = vpop.f32.mrb[33].mxu1 }
 0x4d4   : > { %v3520_v33 = vpop.f32.mrb[34].mxu1 }
 0x4d5   : > { %v8159_v52 = vadd.f32 %v5847_v16, %v3520_v33  ;;  %v6056_v19 = vpop.f32.mrb[35].mxu1  ;;  %v3591_v22 = vsel %vm3548_vm2, %v8157_v15, -inf }
 0x4d6   : > { %3592 = vmax.xlane.f32.xlu1 %v3591_v22 }
 0x4d7   : > { %v3594_v26 = vsel %vm3548_vm2, %v8159_v52, -inf }
 0x4d8   : > { %3595 = vmax.xlane.f32.xlu0 %v3594_v26 }
 0x4e7   : > { %2615 = vrot.lane.b32.xlu1 %v8036_v40, %s7027_s5 }
 0x4eb   : > { %2613 = vrot.lane.b32.xlu1 %v8025_v27, %s7029_s27 }
 0x4ee   : > { %2611 = vrot.lane.b32.xlu0 %v8036_v40, %s7029_s27 }
 0x4f2   : > { %2609 = vrot.lane.b32.xlu0 %v8025_v27, %s7028_s20 }
 0x52b   : > { %v3551_v14 = vpop.xlane.xlu0 %3550 }
 0x52c   : > { %v3597_v9 = vsub.f32 %v8101_v34, %v3551_v14 }
 0x52d   : > { %v3554_v2 = vpop.xlane.xlu1 %3553 }
 0x52e   : > { %v3613_v47 = vmul.f32 1.442695, %v3597_v9  ;;  %v3598_v32 = vsub.f32 %v8103_v5, %v3554_v2 }
 0x530   : > { %6323 = vpow2.f32 %v3613_v47  ;;  %v3615_v29 = vmul.f32 1.442695, %v3598_v32 }
 0x532   : > { %6325 = vpow2.f32 %v3615_v29 }
 0x533   : > { %v3557_v30 = vpop.xlane.xlu0 %3556 }
 0x534   : > { %v3599_v36 = vsub.f32 %v8109_v39, %v3557_v30 }
 0x536   : > { %v3617_v58 = vmul.f32 1.442695, %v3599_v36 }
 0x537   : > { %v3560_v6 = vpop.xlane.xlu0 %3559 }
 0x538   : > { %6327 = vpow2.f32 %v3617_v58  ;;  %v3600_v37 = vsub.f32 %v8111_v20, %v3560_v6  ;;  %v2624_v58 = vshrl.u32 %v8173_v23, 16 }
 0x53a   : > { %v8179_v54 = vpop.eup %6323  ;;  %v3619_v38 = vmul.f32 1.442695, %v3600_v37 }
 0x53b   : > { %v3563_v41 = vpop.xlane.xlu1 %3562  ;;  %v3645_v34 = vsel %vm3548_vm2, %v8179_v54, 0.0 }
 0x53c   : > { %v8183_v16 = vpop.eup %6325  ;;  %6329 = vpow2.f32 %v3619_v38  ;;  %v3601_v5 = vsub.f32 %v8117_v1, %v3563_v41  ;;  %3646 = vadd.xlane.f32.xlu1 %v3645_v34 }
 0x53d   : > { %v3566_v44 = vpop.xlane.xlu0 %3565  ;;  %v3648_v39 = vsel %vm3548_vm2, %v8183_v16, 0.0 }
 0x53e   : > { %v3621_v42 = vmul.f32 1.442695, %v3601_v5  ;;  %v3602_v20 = vsub.f32 %v8119_v31, %v3566_v44  ;;  %3649 = vadd.xlane.f32.xlu0 %v3648_v39 }
 0x540   : > { %6331 = vpow2.f32 %v3621_v42  ;;  %v3623_v43 = vmul.f32 1.442695, %v3602_v20 }
 0x542   : > { %v8189_v48 = vpop.eup %6327  ;;  %6333 = vpow2.f32 %v3623_v43 }
 0x543   : > { %v3569_v50 = vpop.xlane.xlu1 %3568  ;;  %v3651_v51 = vsel %vm3548_vm2, %v8189_v48, 0.0 }
 0x544   : > { %v3603_v1 = vsub.f32 %v8125_v35, %v3569_v50  ;;  %3652 = vadd.xlane.f32.xlu0 %v3651_v51 }
 0x545   : > { %v3572_v53 = vpop.xlane.xlu0 %3571 }
 0x546   : > { %v8194_v57 = vpop.eup %6329  ;;  %v3625_v59 = vmul.f32 1.442695, %v3603_v1  ;;  %v3604_v24 = vsub.f32 %v8127_v63, %v3572_v53 }
 0x547   : > { %v3654_v31 = vsel %vm3548_vm2, %v8194_v57, 0.0 }
 0x548   : > { %6335 = vpow2.f32 %v3625_v59  ;;  %v3627_v60 = vmul.f32 1.442695, %v3604_v24  ;;  %3655 = vadd.xlane.f32.xlu1 %v3654_v31 }
 0x54a   : > { %v8199_v61 = vpop.eup %6331  ;;  %6337 = vpow2.f32 %v3627_v60 }
 0x54b   : > { %v3575_v62 = vpop.xlane.xlu1 %3574  ;;  %v3657_v35 = vsel %vm3548_vm2, %v8199_v61, 0.0 }
 0x54c   : > { %v8203_v4 = vpop.eup %6333  ;;  %v3605_v8 = vsub.f32 %v8133_v45, %v3575_v62  ;;  %3658 = vadd.xlane.f32.xlu0 %v3657_v35 }
 0x54d   : > { %v3660_v63 = vsel %vm3548_vm2, %v8203_v4, 0.0  ;;  %v8208_v13 = vpop.xlane.xlu0 %3577 }
 0x54e   : > { %v3629_v28 = vmul.f32 1.442695, %v3605_v8  ;;  %3661 = vadd.xlane.f32.xlu1 %v3660_v63 }
 0x550   : > { %6339 = vpow2.f32 %v3629_v28 }
 0x552   : > { %v8210_v17 = vpop.eup %6335 }
 0x553   : > { %v3581_v18 = vpop.xlane.xlu1 %3580  ;;  %v3663_v49 = vsel %vm3548_vm2, %v8210_v17, 0.0 }
 0x554   : > { %v8214_v33 = vpop.eup %6337  ;;  %v3607_v19 = vsub.f32 %v8141_v55, %v3581_v18  ;;  %3664 = vadd.xlane.f32.xlu0 %v3663_v49 }
 0x555   : > { %v3584_v45 = vpop.xlane.xlu0 %3583  ;;  %v3666_v22 = vsel %vm3548_vm2, %v8214_v33, 0.0 }
 0x556   : > { %v3633_v26 = vmul.f32 1.442695, %v3607_v19  ;;  %v3608_v14 = vsub.f32 %v8143_v21, %v3584_v45  ;;  %3667 = vadd.xlane.f32.xlu1 %v3666_v22  ;;  %v2623_v21 = vshrl.u32 %v8036_v40, 16 }
 0x558   : > { %6341 = vpow2.f32 %v3633_v26  ;;  %v3635_v9 = vmul.f32 1.442695, %v3608_v14  ;;  %v2625_v5 = vpack.i.b16 %v2624_v58, %v2623_v21  ;;  %v3606_v14 = vsub.f32 %v8135_v46, %v8208_v13 }
 0x55a   : > { %v8220_v2 = vpop.eup %6339  ;;  %6343 = vpow2.f32 %v3635_v9  ;;  %v2724_v28 = vrot.slane %v2625_v5, %v7830_v7 }
 0x55b   : > { %v3669_v47 = vsel %vm3548_vm2, %v8220_v2, 0.0  ;;  %v8225_v29 = vpop.xlane.xlu1 %3586 }
 0x55c   : > { %3670 = vadd.xlane.f32.xlu0 %v3669_v47 }
 0x55d   : > { %v3590_v32 = vpop.xlane.xlu0 %3589 }
 0x55e   : > { %v3610_v55 = vsub.f32 %v8151_v12, %v3590_v32  ;;  %v2621_v12 = vpack.i.b16 %v8173_v23, %v8036_v40  ;;  %v2717_v40 = vcombine.high %v2625_v5, %v7836_v11 }
 0x560   : > { %v3639_v30 = vmul.f32 1.442695, %v3610_v55  ;;  %v2651_v20 = vcombine.high %v2621_v12, %v7836_v11  ;;  %v2658_v23 = vrot.slane %v2621_v12, %v7830_v7  ;;  %v2731_v18 = vrot.slane %v2717_v40, %v7830_v7 }
 0x562   : > { %v8227_v36 = vpop.eup %6341  ;;  %6345 = vpow2.f32 %v3639_v30  ;;  %v2665_v31 = vrot.slane %v2651_v20, %v7830_v7 }
 0x563   : > { %v8231_v6 = vpop.xlane.xlu1 %3592  ;;  %v3675_v37 = vsel %vm3548_vm2, %v8227_v36, 0.0 }
 0x564   : > { %v8235_v38 = vpop.eup %6343  ;;  %3676 = vadd.xlane.f32.xlu0 %v3675_v37 }
 0x565   : > { %v3596_v41 = vpop.xlane.xlu0 %3595  ;;  %v3678_v39 = vsel %vm3548_vm2, %v8235_v38, 0.0 }
 0x566   : > { %v3612_v34 = vsub.f32 %v8159_v52, %v3596_v41 }
 0x567   : > { %2617 = vrot.lane.b32.xlu1 %v8025_v27, %s7027_s5  ;;  %v2616_v44 = vpop.permute.xlu1 %2615 }
 0x568   : > { %v3643_v42 = vmul.f32 1.442695, %v3612_v34  ;;  %3679 = vadd.xlane.f32.xlu0 %v3678_v39  ;;  %v2632_v50 = vshrl.u32 %v2616_v44, 16 }
 0x569   : > { %v2612_v43 = vpop.permute.xlu0 %2611 }
 0x56a   : > { %v2629_v51 = vpack.i.b16 %v2616_v44, %v2612_v43  ;;  %v2631_v1 = vshrl.u32 %v2612_v43, 16  ;;  %6347 = vpow2.f32 %v3643_v42 }
 0x56c   : > { %v8246_v52 = vpop.eup %6345  ;;  %v2633_v53 = vpack.i.b16 %v2632_v50, %v2631_v1  ;;  %v2666_v59 = vcombine.high %v2629_v51, %v7836_v11  ;;  %v2673_v24 = vrot.slane %v2629_v51, %v7830_v7 }
 0x56d   : > { %v3684_v60 = vsel %vm3548_vm2, %v8246_v52, 0.0 }
 0x56e   : > { %v2680_v62 = vrot.slane %v2666_v59, %v7830_v7  ;;  %v2681_v35 = vcombine.low %v2658_v23, %v2673_v24  ;;  %v2682_v8 = vcombine.high %v2658_v23, %v2673_v24  ;;  %v2732_v63 = vcombine.high %v2633_v53, %v7836_v11  ;;  %3685 = vadd.xlane.f32.xlu0 %v3684_v60 }
 0x56f   : > { %v2739_v49 = vrot.slane %v2633_v53, %v7830_v7  ;;  %v3631_v24 = vmul.f32 1.442695, %v3606_v14 }
 0x570   : > { %v2689_v19 = vrot.slane %v2681_v35, %v7845_v25  ;;  %v2696_v45 = vrot.slane %v2682_v8, %v7845_v25  ;;  %v2697_v22 = vcombine.low %v2665_v31, %v2680_v62  ;;  %v2698_v26 = vcombine.high %v2665_v31, %v2680_v62 }
 0x571   : > { %v2746_v9 = vrot.slane %v2732_v63, %v7830_v7  ;;  %v2747_v47 = vcombine.low %v2724_v28, %v2739_v49  ;;  %v2748_v32 = vcombine.high %v2724_v28, %v2739_v49  ;;  %v3609_v31 = vsub.f32 %v8149_v3, %v8225_v29 }
 0x572   : > { %v2705_v55 = vrot.slane %v2697_v22, %v7845_v25  ;;  %v2712_v30 = vrot.slane %v2698_v26, %v7845_v25  ;;  %v2915_v21 = vcombine.low %v2689_v19, %v2696_v45  ;;  %v5750_v58 = vcombine.high %v2689_v19, %v2696_v45 }
 0x573   : > { %v2755_v37 = vrot.slane %v2747_v47, %v7845_v25  ;;  %v2762_v12 = vrot.slane %v2748_v32, %v7845_v25  ;;  %v2763_v41 = vcombine.low %v2731_v18, %v2746_v9  ;;  %v2764_v34 = vcombine.high %v2731_v18, %v2746_v9 }
 0x574   : > { %v2922_v5 = vrot.slane %v2915_v21, %v7830_v7  ;;  %v2930_v46 = vrot.slane %v5750_v58, %v7830_v7  ;;  %v2931_v13 = vcombine.low %v2705_v55, %v2712_v30  ;;  %v5751_v44 = vcombine.high %v2705_v55, %v2712_v30  ;;  %v8270_v39 = vpop.eup %6347 }
 0x575   : > { %v2771_v42 = vrot.slane %v2763_v41, %v7845_v25  ;;  %v2778_v20 = vrot.slane %v2764_v34, %v7845_v25  ;;  %v2965_v43 = vcombine.low %v2755_v37, %v2762_v12  ;;  %v5752_v50 = vcombine.high %v2755_v37, %v2762_v12 }
 0x576   : > { %v2938_v51 = vrot.slane %v2931_v13, %v7830_v7  ;;  %v2946_v1 = vrot.slane %v5751_v44, %v7830_v7  ;;  %v3690_v60 = vsel %vm3548_vm2, %v8270_v39, 0.0  ;;  %v2947_v62 = vcombine.low %v2922_v5, %v2930_v46 }
 0x577   : > { %v2972_v40 = vrot.slane %v2965_v43, %v7830_v7  ;;  %v2980_v23 = vrot.slane %v5752_v50, %v7830_v7  ;;  %v2981_v53 = vcombine.low %v2771_v42, %v2778_v20  ;;  %v5753_v59 = vcombine.high %v2771_v42, %v2778_v20  ;;  %3691 = vadd.xlane.f32.xlu0 %v3690_v60  ;;  %v2614_v42 = vpop.permute.xlu1 %2613  ;;  %v2610_v20 = vpop.permute.xlu0 %2609 }
 0x578   : > { %v2955_v35 = vcombine.low %v2938_v51, %v2946_v1  ;;  %v2954_v18 = vrot.slane %v2947_v62, %v7845_v25  ;;  %6349 = vpow2.f32 %v3631_v24  ;;  %v3637_v45 = vmul.f32 1.442695, %v3609_v31 }
 0x579   : > { %v2988_v8 = vrot.slane %v2981_v53, %v7830_v7  ;;  %v2996_v63 = vrot.slane %v5753_v59, %v7830_v7  ;;  %v2997_v28 = vcombine.low %v2972_v40, %v2980_v23  ;;  %v3611_v3 = vsub.f32 %v8157_v15, %v8231_v6 }
 0x57a   : > { %v2962_v49 = vrot.slane %v2955_v35, %v7845_v25  ;;  %6351 = vpow2.f32 %v3637_v45 }
 0x57b   : > { %v3005_v19 = vcombine.low %v2988_v8, %v2996_v63  ;;  %v3004_v22 = vrot.slane %v2997_v28, %v7845_v25  ;;  %v3641_v32 = vmul.f32 1.442695, %v3611_v3  ;;  %v2640_v8 = vshrl.u32 %v2610_v20, 16 }
 0x57c   : > { %v2963_v29 = vcombine.low %v2954_v18, %v2962_v49  ;;  %v2964_v14 = vcombine.high %v2954_v18, %v2962_v49  ;;  %v2639_v28 = vshrl.u32 %v8025_v27, 16  ;;  %v2637_v18 = vpack.i.b16 %v2610_v20, %v8025_v27 }
 0x57d   : > { %v3012_v26 = vrot.slane %v3005_v19, %v7845_v25  ;;  %6353 = vpow2.f32 %v3641_v32  ;;  %v2647_v27 = vshrl.u32 %v2614_v42, 16 }
 0x57e   : > { %v3119_v55 = vshrl.u32 %v2963_v29, 16  ;;  %v3127_v30 = vshrl.u32 %v2964_v14, 16  ;;  %v2641_v3 = vpack.i.b16 %v2640_v8, %v2639_v28 }
 0x57f   : > { %v3013_v9 = vcombine.low %v3004_v22, %v3012_v26  ;;  %v3014_v47 = vcombine.high %v3004_v22, %v3012_v26 }
 0x581   : > { %v3117_v21 = vpack.i.b16 %v3013_v9, %v2963_v29  ;;  %v3120_v58 = vshrl.u32 %v3013_v9, 16  ;;  %v3125_v37 = vpack.i.b16 %v3014_v47, %v2964_v14  ;;  %v3128_v12 = vshrl.u32 %v3014_v47, 16 }
 0x582   : > { %v8291_v15 = vpop.eup %6349  ;;  %v2849_v47 = vcombine.high %v2641_v3, %v7836_v11 }
 0x583   : > { %6058 = vmatpush3.bf16.msra.mxu0 %v3117_v21  ;;  %v3121_v41 = vpack.i.b16 %v3120_v58, %v3119_v55  ;;  %v3129_v34 = vpack.i.b16 %v3128_v12, %v3127_v30  ;;  %v3672_v5 = vsel %vm3548_vm2, %v8291_v15, 0.0  ;;  %v2790_v55 = vrot.slane %v2637_v18, %v7830_v7 }
 0x584   : > { %6069 = vmatprep.subr.bf16.mxu0 %v7030_v56  ;;  %v8294_v6 = vpop.eup %6351 }
 0x585   : > { %6064 = vmatpush3.bf16.msra.mxu1 %v3121_v41  ;;  %v3681_v46 = vsel %vm3548_vm2, %v8294_v6, 0.0 }
 0x586   : > { %6075 = vmatprep.subr.bf16.mxu1 %v7030_v56 }
 0x587   : > { %v8300_v13 = vpop.eup %6353 }
 0x588   : > { %v3687_v44 = vsel %vm3548_vm2, %v8300_v13, 0.0 }
 0x58b   : > { %3673 = vadd.xlane.f32.xlu1 %v3672_v5  ;;  %v2856_v5 = vrot.slane %v2641_v3, %v7830_v7 }
 0x58f   : > { %3682 = vadd.xlane.f32.xlu1 %v3681_v46  ;;  %v2863_v46 = vrot.slane %v2849_v47, %v7830_v7 }
 0x593   : > { %3688 = vadd.xlane.f32.xlu1 %v3687_v44 }
 0x5c9   : > { %v3647_v43 = vpop.xlane.xlu1 %3646 }
 0x5ca   : > { %6355 = vrcp.f32 %v3647_v43 }
 0x5cb   : > { %v3650_v50 = vpop.xlane.xlu0 %3649 }
 0x5cc   : > { %6357 = vrcp.f32 %v3650_v50 }
 0x5d1   : > { %v3653_v51 = vpop.xlane.xlu0 %3652 }
 0x5d2   : > { %6359 = vrcp.f32 %v3653_v51 }
 0x5d4   : > { %v6356_v1 = vpop.eup %6355 }
 0x5d5   : > { %v3656_v40 = vpop.xlane.xlu1 %3655  ;;  %v3709_v53 = vmul.f32 %v6356_v1, %v8179_v54 }
 0x5d6   : > { %v6358_v23 = vpop.eup %6357  ;;  %6361 = vrcp.f32 %v3656_v40 }
 0x5d7   : > { %v3710_v59 = vmul.f32 %v6358_v23, %v8183_v16 }
 0x5d9   : > { %v3659_v24 = vpop.xlane.xlu0 %3658  ;;  %v3725_v31 = vpack.c.bf16 %v3710_v59, %v3709_v53 }
 0x5da   : > { %6363 = vrcp.f32 %v3659_v24 }
 0x5db   : > { %v3662_v60 = vpop.xlane.xlu1 %3661  ;;  %6060 = vmatmul.mubr.msk.bf16.vlgmr.msra.gmra.mrb[8].mxu0 %vm3548_vm2, %v3725_v31 }
 0x5dc   : > { %6365 = vrcp.f32 %v3662_v60  ;;  %6070 = vmatpush3.bf16.msra.mxu0 %v3125_v37  ;;  %6071 = vmatprep.mubr.msk.bf16.mxu0 %vm7031_vm0, %v7030_v56  ;;  %v6360_v62 = vpop.eup %6359 }
 0x5dd   : > { %6081 = vmatprep.subr.bf16.mxu0 %v7030_v56  ;;  %v3711_v54 = vmul.f32 %v6360_v62, %v8189_v48  ;;  %v2783_v48 = vcombine.high %v2637_v18, %v7836_v11 }
 0x5e0   : > { %v6362_v35 = vpop.eup %6361 }
 0x5e1   : > { %v3712_v16 = vmul.f32 %v6362_v35, %v8194_v57  ;;  %v3665_v63 = vpop.xlane.xlu0 %3664 }
 0x5e2   : > { %6367 = vrcp.f32 %v3665_v63 }
 0x5e3   : > { %v3668_v49 = vpop.xlane.xlu1 %3667  ;;  %v3726_v19 = vpack.c.bf16 %v3712_v16, %v3711_v54 }
 0x5e4   : > { %v6364_v45 = vpop.eup %6363  ;;  %6369 = vrcp.f32 %v3668_v49 }
 0x5e5   : > { %6066 = vmatmul.mubr.msk.bf16.vlgmr.msra.gmra.mrb[36].mxu1 %vm3548_vm2, %v3726_v19  ;;  %v3713_v57 = vmul.f32 %v6364_v45, %v8199_v61  ;;  %v2797_v61 = vrot.slane %v2783_v48, %v7830_v7 }
 0x5e6   : > { %v6366_v29 = vpop.eup %6365  ;;  %6076 = vmatpush3.bf16.msra.mxu1 %v3129_v34  ;;  %6077 = vmatprep.mubr.msk.bf16.mxu1 %vm7031_vm0, %v7030_v56 }
 0x5e7   : > { %v3714_v22 = vmul.f32 %v6366_v29, %v8203_v4  ;;  %v2618_v26 = vpop.permute.xlu1 %2617  ;;  %6087 = vmatprep.subr.bf16.mxu1 %v7030_v56 }
 0x5e8   : > { %v2645_v14 = vpack.i.b16 %v2618_v26, %v2614_v42  ;;  %v2648_v9 = vshrl.u32 %v2618_v26, 16 }
 0x5e9   : > { %v3727_v32 = vpack.c.bf16 %v3714_v22, %v3713_v57  ;;  %v8335_v20 = vpop.xlane.xlu0 %3670 }
 0x5ea   : > { %v2649_v30 = vpack.i.b16 %v2648_v9, %v2647_v27  ;;  %v2798_v21 = vcombine.high %v2645_v14, %v7836_v11  ;;  %v2805_v58 = vrot.slane %v2645_v14, %v7830_v7 }
 0x5eb   : > { %6072 = vmatmul.mubr.msk.bf16.vlgmr.msra.gmra.mrb[12].mxu0 %vm3548_vm2, %v3727_v32 }
 0x5ec   : > { %v6368_v4 = vpop.eup %6367  ;;  %v2812_v37 = vrot.slane %v2798_v21, %v7830_v7  ;;  %v2813_v12 = vcombine.low %v2790_v55, %v2805_v58  ;;  %v2814_v41 = vcombine.high %v2790_v55, %v2805_v58  ;;  %v2864_v34 = vcombine.high %v2649_v30, %v7836_v11  ;;  %6083 = vmatprep.mubr.msk.bf16.mxu0 %vm7031_vm0, %v7030_v56 }
 0x5ed   : > { %v3715_v44 = vmul.f32 %v6368_v4, %v8210_v17  ;;  %v2871_v42 = vrot.slane %v2649_v30, %v7830_v7 }
 0x5ee   : > { %v6370_v43 = vpop.eup %6369  ;;  %v2821_v50 = vrot.slane %v2813_v12, %v7845_v25  ;;  %v2828_v51 = vrot.slane %v2814_v41, %v7845_v25  ;;  %v2829_v1 = vcombine.low %v2797_v61, %v2812_v37  ;;  %v2830_v40 = vcombine.high %v2797_v61, %v2812_v37 }
 0x5ef   : > { %v3716_v23 = vmul.f32 %v6370_v43, %v8214_v33  ;;  %v2878_v53 = vrot.slane %v2864_v34, %v7830_v7  ;;  %v2879_v59 = vcombine.low %v2856_v5, %v2871_v42  ;;  %v2880_v24 = vcombine.high %v2856_v5, %v2871_v42 }
 0x5f0   : > { %v2837_v31 = vrot.slane %v2829_v1, %v7845_v25  ;;  %v2844_v17 = vrot.slane %v2830_v40, %v7845_v25  ;;  %v3015_v60 = vcombine.low %v2821_v50, %v2828_v51  ;;  %v5754_v62 = vcombine.high %v2821_v50, %v2828_v51 }
 0x5f1   : > { %v2887_v35 = vrot.slane %v2879_v59, %v7845_v25  ;;  %v2894_v8 = vrot.slane %v2880_v24, %v7845_v25  ;;  %v2895_v54 = vcombine.low %v2863_v46, %v2878_v53  ;;  %v2896_v16 = vcombine.high %v2863_v46, %v2878_v53  ;;  %v3677_v63 = vpop.xlane.xlu0 %3676 }
 0x5f2   : > { %v3022_v28 = vrot.slane %v3015_v60, %v7830_v7  ;;  %v3030_v33 = vrot.slane %v5754_v62, %v7830_v7  ;;  %v3031_v18 = vcombine.low %v2837_v31, %v2844_v17  ;;  %v5755_v49 = vcombine.high %v2837_v31, %v2844_v17 }
 0x5f3   : > { %v2903_v19 = vrot.slane %v2895_v54, %v7845_v25  ;;  %v2910_v45 = vrot.slane %v2896_v16, %v7845_v25  ;;  %v3065_v3 = vcombine.low %v2887_v35, %v2894_v8  ;;  %v5756_v29 = vcombine.high %v2887_v35, %v2894_v8 }
 0x5f4   : > { %v3038_v48 = vrot.slane %v3031_v18, %v7830_v7  ;;  %v3046_v57 = vrot.slane %v5755_v49, %v7830_v7  ;;  %6371 = vrcp.f32 %v3677_v63  ;;  %v3728_v22 = vpack.c.bf16 %v3716_v23, %v3715_v44 }
 0x5f5   : > { %v3072_v26 = vrot.slane %v3065_v3, %v7830_v7  ;;  %v3080_v27 = vrot.slane %v5756_v29, %v7830_v7  ;;  %v3081_v14 = vcombine.low %v2903_v19, %v2910_v45  ;;  %v5757_v9 = vcombine.high %v2903_v19, %v2910_v45  ;;  %v3680_v47 = vpop.xlane.xlu0 %3679 }
 0x5f6   : > { %6078 = vmatmul.mubr.msk.bf16.vlgmr.msra.gmra.mrb[40].mxu1 %vm3548_vm2, %v3728_v22  ;;  %6373 = vrcp.f32 %v3680_v47  ;;  %v3047_v32 = vcombine.low %v3022_v28, %v3030_v33  ;;  %v3055_v55 = vcombine.low %v3038_v48, %v3046_v57 }
 0x5f7   : > { %v3088_v30 = vrot.slane %v3081_v14, %v7830_v7  ;;  %v3096_v21 = vrot.slane %v5757_v9, %v7830_v7  ;;  %v3097_v58 = vcombine.low %v3072_v26, %v3080_v27  ;;  %6089 = vmatprep.mubr.msk.bf16.mxu1 %vm7031_vm0, %v7030_v56  ;;  %6375 = vrcp.f32 %v8335_v20 }
 0x5f8   : > { %v3062_v61 = vrot.slane %v3055_v55, %v7845_v25  ;;  %v3054_v4 = vrot.slane %v3047_v32, %v7845_v25 }
 0x5f9   : > { %v3105_v37 = vcombine.low %v3088_v30, %v3096_v21  ;;  %v3104_v41 = vrot.slane %v3097_v58, %v7845_v25 }
 0x5fa   : > { %v3063_v12 = vcombine.low %v3054_v4, %v3062_v61  ;;  %v3064_v51 = vcombine.high %v3054_v4, %v3062_v61 }
 0x5fb   : > { %v3112_v34 = vrot.slane %v3105_v37, %v7845_v25 }
 0x5fc   : > { %v3135_v43 = vshrl.u32 %v3063_v12, 16  ;;  %v3143_v31 = vshrl.u32 %v3064_v51, 16 }
 0x5fd   : > { %v3113_v5 = vcombine.low %v3104_v41, %v3112_v34  ;;  %v3114_v46 = vcombine.high %v3104_v41, %v3112_v34 }
 0x5fe   : > { %v6372_v44 = vpop.eup %6371 }
 0x5ff   : > { %v3133_v42 = vpack.i.b16 %v3113_v5, %v3063_v12  ;;  %v3136_v50 = vshrl.u32 %v3113_v5, 16  ;;  %v3719_v40 = vmul.f32 %v6372_v44, %v8227_v36  ;;  %v3144_v59 = vshrl.u32 %v3114_v46, 16  ;;  %v3686_v36 = vpop.xlane.xlu0 %3685 }
 0x600   : > { %v6374_v1 = vpop.eup %6373  ;;  %v3141_v18 = vpack.i.b16 %v3114_v46, %v3064_v51 }
 0x601   : > { %v3720_v23 = vmul.f32 %v6374_v1, %v8235_v38  ;;  %6082 = vmatpush3.bf16.msra.mxu0 %v3133_v42  ;;  %v3137_v53 = vpack.i.b16 %v3136_v50, %v3135_v43  ;;  %v3145_v17 = vpack.i.b16 %v3144_v59, %v3143_v31  ;;  %v6376_v8 = vpop.eup %6375 }
 0x602   : > { %6093 = vmatprep.subr.bf16.mxu0 %v7030_v56  ;;  %v3717_v16 = vmul.f32 %v6376_v8, %v8220_v2 }
 0x603   : > { %6088 = vmatpush3.bf16.msra.mxu1 %v3137_v53  ;;  %v3730_v24 = vpack.c.bf16 %v3720_v23, %v3719_v40 }
 0x604   : > { %6099 = vmatprep.subr.bf16.mxu1 %v7030_v56  ;;  %v3692_v60 = vpop.xlane.xlu0 %3691 }
 0x606   : > { %6090 = vmatmul.mubr.msk.bf16.vlgmr.msra.gmra.mrb[44].mxu1 %vm3548_vm2, %v3730_v24 }
 0x607   : > { %6100 = vmatpush3.bf16.msra.mxu1 %v3145_v17  ;;  %6101 = vmatprep.mubr.msk.bf16.mxu1 %vm7031_vm0, %v7030_v56 }
 0x618   : > { %v3674_v38 = vpop.xlane.xlu1 %3673 }
 0x619   : > { %6377 = vrcp.f32 %v3674_v38 }
 0x61c   : > { %v3683_v62 = vpop.xlane.xlu1 %3682 }
 0x61d   : > { %6379 = vrcp.f32 %v3683_v62 }
 0x61e   : > { %6381 = vrcp.f32 %v3686_v36 }
 0x61f   : > { %6383 = vrcp.f32 %v3692_v60 }
 0x620   : > { %v3689_v35 = vpop.xlane.xlu1 %3688 }
 0x621   : > { %6385 = vrcp.f32 %v3689_v35 }
 0x623   : > { %v6378_v54 = vpop.eup %6377 }
 0x624   : > { %v3718_v63 = vmul.f32 %v6378_v54, %v8291_v15 }
 0x626   : > { %v3729_v28 = vpack.c.bf16 %v3718_v63, %v3717_v16 }
 0x627   : > { %v6380_v33 = vpop.eup %6379 }
 0x628   : > { %v6382_v20 = vpop.eup %6381  ;;  %6084 = vmatmul.mubr.msk.bf16.vlgmr.msra.gmra.mrb[16].mxu0 %vm3548_vm2, %v3729_v28  ;;  %v3721_v19 = vmul.f32 %v6380_v33, %v8294_v6 }
 0x629   : > { %v6384_v49 = vpop.eup %6383  ;;  %6094 = vmatpush3.bf16.msra.mxu0 %v3141_v18  ;;  %6095 = vmatprep.mubr.msk.bf16.mxu0 %vm7031_vm0, %v7030_v56  ;;  %v3722_v3 = vmul.f32 %v6382_v20, %v8246_v52 }
 0x62a   : > { %v3724_v2 = vmul.f32 %v6384_v49, %v8270_v39 }
 0x62b   : > { %v6386_v45 = vpop.eup %6385  ;;  %v3731_v29 = vpack.c.bf16 %v3722_v3, %v3721_v19 }
 0x62c   : > { %v3723_v15 = vmul.f32 %v6386_v45, %v8300_v13 }
 0x62e   : > { %v3732_v48 = vpack.c.bf16 %v3724_v2, %v3723_v15 }
 0x630   : > { %6096 = vmatmul.mubr.msk.bf16.vlgmr.msra.gmra.mrb[20].mxu0 %vm3548_vm2, %v3731_v29  ;;  %6102 = vmatmul.mubr.msk.bf16.vlgmr.msra.gmra.mrb[48].mxu1 %vm3548_vm2, %v3732_v48 }
 0x631   : > { %4984 = vmatprep.mubr.bf16.mxu1 %v7034_v10 }
 0x6ae   : > { %v3770_v57 = vpop.f32.mrb[8].mxu0 }
 0x6af   : > { %v6061_v22 = vpop.f32.mrb[9].mxu0 }
 0x6b0   : > { %v3773_v56 = vpop.f32.mrb[10].mxu0 }
 0x6b1   : > { %v4085_v26 = vpack.c.bf16 %v3773_v56, %v3770_v57  ;;  %v6062_v6 = vpop.f32.mrb[11].mxu0 }
 0x6b3   : > { %v4097_v47 = vshrl.u32 %v4085_v26, 16 }
 0x6b8   : > { %v3814_v27 = vpop.f32.mrb[36].mxu1 }
 0x6b9   : > { %v6067_v14 = vpop.f32.mrb[37].mxu1 }
 0x6ba   : > { %v3817_v52 = vpop.f32.mrb[38].mxu1 }
 0x6bb   : > { %v4086_v9 = vpack.c.bf16 %v3817_v52, %v3814_v27  ;;  %v6068_v39 = vpop.f32.mrb[39].mxu1 }
 0x6bd   : > { %v4095_v13 = vpack.i.b16 %v4086_v9, %v4085_v26  ;;  %v4098_v32 = vshrl.u32 %v4086_v9, 16 }
 0x6be   : > { %v3858_v55 = vpop.f32.mrb[12].mxu0 }
 0x6bf   : > { %v4099_v30 = vpack.i.b16 %v4098_v32, %v4097_v47  ;;  %v6073_v21 = vpop.f32.mrb[13].mxu0  ;;  %v4125_v46 = vcombine.high %v4095_v13, %v7836_v11  ;;  %v4132_v50 = vrot.slane %v4095_v13, %v7830_v7 }
 0x6c0   : > { %v3861_v58 = vpop.f32.mrb[14].mxu0 }
 0x6c1   : > { %v4087_v61 = vpack.c.bf16 %v3861_v58, %v3858_v55  ;;  %v6074_v4 = vpop.f32.mrb[15].mxu0  ;;  %v4139_v23 = vrot.slane %v4125_v46, %v7830_v7  ;;  %v4191_v53 = vcombine.high %v4099_v30, %v7836_v11  ;;  %v4198_v36 = vrot.slane %v4099_v30, %v7830_v7  ;;  %v6276_v46 = vld [vmem:[%s7747_s23 + $0x8] sm:$0xff]  }
 0x6c3   : > { %v4105_v44 = vshrl.u32 %v4087_v61, 16  ;;  %v4205_v54 = vrot.slane %v4191_v53, %v7830_v7 }
 0x6c9   : > { %v3902_v37 = vpop.f32.mrb[40].mxu1 }
 0x6ca   : > { %v6079_v12 = vpop.f32.mrb[41].mxu1 }
 0x6cb   : > { %v3905_v41 = vpop.f32.mrb[42].mxu1 }
 0x6cc   : > { %v4088_v34 = vpack.c.bf16 %v3905_v41, %v3902_v37  ;;  %v6080_v5 = vpop.f32.mrb[43].mxu1 }
 0x6cd   : > { %v6275_v5 = vld [vmem:[%s7747_s23] sm:$0xff]  }
 0x6ce   : > { %v4103_v42 = vpack.i.b16 %v4088_v34, %v4087_v61  ;;  %v4106_v43 = vshrl.u32 %v4088_v34, 16  ;;  %6105 = vmatprep.subr.bf16.mxu0 %v6275_v5 }
 0x6cf   : > { %6106 = vmatpush3.bf16.msra.mxu0 %v6275_v5 }
 0x6d0   : > { %v4107_v51 = vpack.i.b16 %v4106_v43, %v4105_v44  ;;  %v4140_v1 = vcombine.high %v4103_v42, %v7836_v11  ;;  %v4147_v40 = vrot.slane %v4103_v42, %v7830_v7  ;;  %6107 = vmatprep.subr.bf16.mxu0 %v6276_v46 }
 0x6d2   : > { %v4154_v59 = vrot.slane %v4140_v1, %v7830_v7  ;;  %v4155_v24 = vcombine.low %v4132_v50, %v4147_v40  ;;  %v4156_v31 = vcombine.high %v4132_v50, %v4147_v40  ;;  %v4206_v17 = vcombine.high %v4107_v51, %v7836_v11  ;;  %v6277_v1 = vld [vmem:[%s7747_s23 + $0x10] sm:$0xff]  }
 0x6d3   : > { %v4213_v38 = vrot.slane %v4107_v51, %v7830_v7  ;;  %6108 = vmatpush3.bf16.msra.mxu0 %v6276_v46 }
 0x6d4   : > { %v4163_v60 = vrot.slane %v4155_v24, %v7845_v25  ;;  %v4170_v62 = vrot.slane %v4156_v31, %v7845_v25  ;;  %v4171_v35 = vcombine.low %v4139_v23, %v4154_v59  ;;  %v4172_v8 = vcombine.high %v4139_v23, %v4154_v59  ;;  %6109 = vmatprep.subr.bf16.mxu0 %v6277_v1 }
 0x6d5   : > { %v4220_v16 = vrot.slane %v4206_v17, %v7830_v7  ;;  %v4221_v63 = vcombine.low %v4198_v36, %v4213_v38  ;;  %v4222_v28 = vcombine.high %v4198_v36, %v4213_v38  ;;  %v6278_v38 = vld [vmem:[%s7747_s23 + $0x18] sm:$0xff]  }
 0x6d6   : > { %v4179_v33 = vrot.slane %v4171_v35, %v7845_v25  ;;  %v4186_v18 = vrot.slane %v4172_v8, %v7845_v25  ;;  %v4389_v20 = vcombine.low %v4163_v60, %v4170_v62  ;;  %v5774_v49 = vcombine.high %v4163_v60, %v4170_v62  ;;  %v6279_v35 = vld [vmem:[%s7747_s23 + $0x20] sm:$0xff]   ;;  %v6280_v8 = vld [vmem:[%s7747_s23 + $0x28] sm:$0xff]  }
 0x6d7   : > { %v4229_v19 = vrot.slane %v4221_v63, %v7845_v25  ;;  %v4236_v45 = vrot.slane %v4222_v28, %v7845_v25  ;;  %v4237_v3 = vcombine.low %v4205_v54, %v4220_v16  ;;  %v4238_v2 = vcombine.high %v4205_v54, %v4220_v16  ;;  %6110 = vmatpush3.bf16.msra.mxu0 %v6277_v1 }
 0x6d8   : > { %v4405_v15 = vcombine.low %v4179_v33, %v4186_v18  ;;  %v5775_v29 = vcombine.high %v4179_v33, %v4186_v18  ;;  %v4396_v48 = vrot.slane %v4389_v20, %v7830_v7  ;;  %v4404_v57 = vrot.slane %v5774_v49, %v7830_v7  ;;  %6111 = vmatprep.subr.bf16.mxu0 %v6278_v38 }
 0x6d9   : > { %v4245_v22 = vrot.slane %v4237_v3, %v7845_v25  ;;  %v4252_v56 = vrot.slane %v4238_v2, %v7845_v25  ;;  %v4439_v26 = vcombine.low %v4229_v19, %v4236_v45  ;;  %v5776_v6 = vcombine.high %v4229_v19, %v4236_v45  ;;  %v3990_v27 = vpop.f32.mrb[44].mxu1 }
 0x6da   : > { %v6091_v14 = vpop.f32.mrb[45].mxu1  ;;  %v4412_v52 = vrot.slane %v4405_v15, %v7830_v7  ;;  %v4420_v9 = vrot.slane %v5775_v29, %v7830_v7  ;;  %v4421_v39 = vcombine.low %v4396_v48, %v4404_v57 }
 0x6db   : > { %v3993_v47 = vpop.f32.mrb[46].mxu1  ;;  %v4446_v13 = vrot.slane %v4439_v26, %v7830_v7  ;;  %v4454_v32 = vrot.slane %v5776_v6, %v7830_v7  ;;  %v4455_v55 = vcombine.low %v4245_v22, %v4252_v56  ;;  %v5777_v30 = vcombine.high %v4245_v22, %v4252_v56  ;;  %6112 = vmatpush3.bf16.msra.mxu0 %v6278_v38 }
 0x6dc   : > { %v4090_v21 = vpack.c.bf16 %v3993_v47, %v3990_v27  ;;  %v6092_v58 = vpop.f32.mrb[47].mxu1  ;;  %v4429_v61 = vcombine.low %v4412_v52, %v4420_v9  ;;  %v4428_v41 = vrot.slane %v4421_v39, %v7845_v25  ;;  %6113 = vmatprep.subr.bf16.mxu0 %v6279_v35 }
 0x6dd   : > { %v4462_v4 = vrot.slane %v4455_v55, %v7830_v7  ;;  %v4470_v37 = vrot.slane %v5777_v30, %v7830_v7  ;;  %v4471_v12 = vcombine.low %v4446_v13, %v4454_v32 }
 0x6de   : > { %v4436_v34 = vrot.slane %v4429_v61, %v7845_v25  ;;  %v4114_v18 = vshrl.u32 %v4090_v21, 16 }
 0x6df   : > { %v4479_v44 = vcombine.low %v4462_v4, %v4470_v37  ;;  %v4478_v50 = vrot.slane %v4471_v12, %v7845_v25  ;;  %6114 = vmatpush3.bf16.msra.mxu0 %v6279_v35 }
 0x6e0   : > { %v4438_v42 = vcombine.high %v4428_v41, %v4436_v34  ;;  %v8414_v43 = vcombine.low %v4428_v41, %v4436_v34  ;;  %6115 = vmatprep.subr.bf16.mxu0 %v6280_v8 }
 0x6e1   : > { %v4486_v51 = vrot.slane %v4479_v44, %v7845_v25 }
 0x6e2   : > { %v4592_v53 = vshrl.u32 %v8414_v43, 16  ;;  %v4598_v59 = vshrl.u32 %v4438_v42, 16 }
 0x6e3   : > { %v4488_v40 = vcombine.high %v4478_v50, %v4486_v51  ;;  %v8419_v23 = vcombine.low %v4478_v50, %v4486_v51  ;;  %6116 = vmatpush3.bf16.msra.mxu0 %v6280_v8 }
 0x6e5   : > { %v4597_v24 = vpack.i.b16 %v4488_v40, %v4438_v42  ;;  %v4593_v31 = vshrl.u32 %v8419_v23, 16  ;;  %v4599_v17 = vshrl.u32 %v4488_v40, 16  ;;  %v4591_v36 = vpack.i.b16 %v8419_v23, %v8414_v43 }
 0x6e7   : > { %4617 = vrot.lane.b32.xlu1 %v4597_v24, %s7029_s27  ;;  %v4594_v60 = vpack.i.b16 %v4593_v31, %v4592_v53  ;;  %v8427_v62 = vpack.i.b16 %v4599_v17, %v4598_v59 }
 0x6eb   : > { %4613 = vrot.lane.b32.xlu1 %v4594_v60, %s7027_s5 }
 0x6fb   : > { %v3946_v54 = vpop.f32.mrb[16].mxu0 }
 0x6fc   : > { %v6085_v16 = vpop.f32.mrb[17].mxu0 }
 0x6fd   : > { %v3949_v63 = vpop.f32.mrb[18].mxu0 }
 0x6fe   : > { %v4089_v28 = vpack.c.bf16 %v3949_v63, %v3946_v54  ;;  %v6086_v33 = vpop.f32.mrb[19].mxu0 }
 0x700   : > { %v4111_v20 = vpack.i.b16 %v4090_v21, %v4089_v28  ;;  %v4113_v49 = vshrl.u32 %v4089_v28, 16  ;;  %v6281_v28 = vld [vmem:[%s7747_s23 + $0x30] sm:$0xff]  }
 0x701   : > { %6117 = vmatprep.subr.bf16.mxu0 %v6281_v28 }
 0x702   : > { %v4115_v19 = vpack.i.b16 %v4114_v18, %v4113_v49  ;;  %v4257_v6 = vcombine.high %v4111_v20, %v7836_v11  ;;  %v4264_v9 = vrot.slane %v4111_v20, %v7830_v7  ;;  %6118 = vmatpush3.bf16.msra.mxu0 %v6281_v28 }
 0x703   : > { %v4034_v45 = vpop.f32.mrb[20].mxu0  ;;  %v4078_v3 = vpop.f32.mrb[48].mxu1 }
 0x704   : > { %v6097_v2 = vpop.f32.mrb[21].mxu0  ;;  %v6103_v15 = vpop.f32.mrb[49].mxu1  ;;  %v4271_v32 = vrot.slane %v4257_v6, %v7830_v7  ;;  %v4323_v55 = vcombine.high %v4115_v19, %v7836_v11  ;;  %v4330_v4 = vrot.slane %v4115_v19, %v7830_v7 }
 0x705   : > { %v4037_v29 = vpop.f32.mrb[22].mxu0  ;;  %v4081_v48 = vpop.f32.mrb[50].mxu1 }
 0x706   : > { %v4091_v57 = vpack.c.bf16 %v4037_v29, %v4034_v45  ;;  %v4092_v22 = vpack.c.bf16 %v4081_v48, %v4078_v3  ;;  %v6098_v56 = vpop.f32.mrb[23].mxu0  ;;  %v6104_v26 = vpop.f32.mrb[51].mxu1  ;;  %v4337_v46 = vrot.slane %v4323_v55, %v7830_v7 }
 0x707   : > { %v6282_v56 = vld [vmem:[%s7747_s23 + $0x38] sm:$0xff]  }
 0x708   : > { %v4121_v27 = vshrl.u32 %v4091_v57, 16  ;;  %v4119_v14 = vpack.i.b16 %v4092_v22, %v4091_v57  ;;  %v4122_v52 = vshrl.u32 %v4092_v22, 16  ;;  %6119 = vmatprep.subr.bf16.mxu0 %v6282_v56 }
 0x709   : > { %6120 = vmatpush3.bf16.msra.mxu0 %v6282_v56  ;;  %v6301_v56 = vld [vmem:[%s7752_s1 + $0x60] ss:$8 sps:$4 sm:$0xff]  }
 0x70a   : > { %v4123_v39 = vpack.i.b16 %v4122_v52, %v4121_v27  ;;  %v4272_v47 = vcombine.high %v4119_v14, %v7836_v11  ;;  %v4279_v13 = vrot.slane %v4119_v14, %v7830_v7 }
 0x70c   : > { %v4286_v30 = vrot.slane %v4272_v47, %v7830_v7  ;;  %v4287_v21 = vcombine.low %v4264_v9, %v4279_v13  ;;  %v4288_v58 = vcombine.high %v4264_v9, %v4279_v13  ;;  %v4338_v61 = vcombine.high %v4123_v39, %v7836_v11 }
 0x70d   : > { %v4345_v37 = vrot.slane %v4123_v39, %v7830_v7 }
 0x70e   : > { %v4295_v12 = vrot.slane %v4287_v21, %v7845_v25  ;;  %v4302_v41 = vrot.slane %v4288_v58, %v7845_v25  ;;  %v4303_v34 = vcombine.low %v4271_v32, %v4286_v30  ;;  %v4304_v5 = vcombine.high %v4271_v32, %v4286_v30 }
 0x70f   : > { %v4352_v44 = vrot.slane %v4338_v61, %v7830_v7  ;;  %v4353_v42 = vcombine.low %v4330_v4, %v4345_v37  ;;  %v4354_v50 = vcombine.high %v4330_v4, %v4345_v37 }
 0x710   : > { %v4311_v51 = vrot.slane %v4303_v34, %v7845_v25  ;;  %v4318_v11 = vrot.slane %v4304_v5, %v7845_v25  ;;  %v4489_v1 = vcombine.low %v4295_v12, %v4302_v41  ;;  %v5778_v40 = vcombine.high %v4295_v12, %v4302_v41 }
 0x711   : > { %v4361_v53 = vrot.slane %v4353_v42, %v7845_v25  ;;  %v4368_v59 = vrot.slane %v4354_v50, %v7845_v25  ;;  %v4369_v24 = vcombine.low %v4337_v46, %v4352_v44  ;;  %v4370_v31 = vcombine.high %v4337_v46, %v4352_v44  ;;  %v5782_v50 = vld [vmem:[%s962_s6] ss:$0 sm:$0xff] }
 0x712   : > { %v4505_v17 = vcombine.low %v4311_v51, %v4318_v11  ;;  %v5779_v38 = vcombine.high %v4311_v51, %v4318_v11  ;;  %v4496_v60 = vrot.slane %v4489_v1, %v7830_v7  ;;  %v4504_v35 = vrot.slane %v5778_v40, %v7830_v7 }
 0x713   : > { %v4377_v8 = vrot.slane %v4369_v24, %v7845_v25  ;;  %v4384_v54 = vrot.slane %v4370_v31, %v7845_v25  ;;  %v4539_v16 = vcombine.low %v4361_v53, %v4368_v59  ;;  %v5780_v63 = vcombine.high %v4361_v53, %v4368_v59  ;;  %v6404_v24 = vld [vmem:[#allocation2 + $0x8] sm:$0xff] }
 0x714   : > { %v4512_v33 = vrot.slane %v4505_v17, %v7830_v7  ;;  %v4520_v18 = vrot.slane %v5779_v38, %v7830_v7  ;;  %v4521_v20 = vcombine.low %v4496_v60, %v4504_v35  ;;  %v6405_v38 = vld [vmem:[#allocation2 + $0x10] sm:$0xff] }
 0x715   : > { %v4546_v49 = vrot.slane %v4539_v16, %v7830_v7  ;;  %v4554_v19 = vrot.slane %v5780_v63, %v7830_v7  ;;  %v4555_v45 = vcombine.low %v4377_v8, %v4384_v54  ;;  %v5781_v3 = vcombine.high %v4377_v8, %v4384_v54  ;;  %v6406_v16 = vld [vmem:[#allocation2 + $0x18] sm:$0xff] }
 0x716   : > { %v4529_v2 = vcombine.low %v4512_v33, %v4520_v18  ;;  %v4528_v57 = vrot.slane %v4521_v20, %v7845_v25  ;;  %v6283_v33 = vld [vmem:[%s7752_s1] ss:$8 sps:$4 sm:$0xff]   ;;  %v6285_v18 = vld [vmem:[%s7752_s1 + $0x4] ss:$8 sps:$4 sm:$0xff]   ;;  %v6288_v20 = vld [vmem:[%s7752_s1 + $0x14] ss:$8 sps:$4 sm:$0xff]  }
 0x717   : > { %v4562_v15 = vrot.slane %v4555_v45, %v7830_v7  ;;  %v4570_v29 = vrot.slane %v5781_v3, %v7830_v7  ;;  %v4571_v48 = vcombine.low %v4546_v49, %v4554_v19  ;;  %4952 = vmatprep.subr.bf16.mxu1 %v6285_v18  ;;  %v6286_v49 = vld [vmem:[%s7752_s1 + $0x10] ss:$8 sps:$4 sm:$0xff]   ;;  %v6291_v19 = vld [vmem:[%s7752_s1 + $0x24] ss:$8 sps:$4 sm:$0xff]   ;;  %v6289_v45 = vld [vmem:[%s7752_s1 + $0x20] ss:$8 sps:$4 sm:$0xff]  }
 0x718   : > { %v4536_v22 = vrot.slane %v4529_v2, %v7845_v25  ;;  %4953 = vmatpush1.bf16.msra.mxu1 %v6283_v33  ;;  %v6292_v3 = vld [vmem:[%s7752_s1 + $0x30] ss:$8 sps:$4 sm:$0xff]   ;;  %v6294_v2 = vld [vmem:[%s7752_s1 + $0x34] ss:$8 sps:$4 sm:$0xff]   ;;  %v5791_v33 = vld [vmem:[%s970_s26] ss:$0 sm:$0xff] }
 0x719   : > { %v4579_v26 = vcombine.low %v4562_v15, %v4570_v29  ;;  %v4578_v14 = vrot.slane %v4571_v48, %v7845_v25  ;;  %4954 = vmatprep.subr.bf16.mxu1 %v6288_v20  ;;  %v6297_v15 = vld [vmem:[%s7752_s1 + $0x44] ss:$8 sps:$4 sm:$0xff]   ;;  %v6295_v29 = vld [vmem:[%s7752_s1 + $0x40] ss:$8 sps:$4 sm:$0xff]   ;;  %v6300_v48 = vld [vmem:[%s7752_s1 + $0x54] ss:$8 sps:$4 sm:$0xff]  }
 0x71a   : > { %v4538_v6 = vcombine.high %v4528_v57, %v4536_v22  ;;  %v4537_v27 = vcombine.low %v4528_v57, %v4536_v22  ;;  %v6298_v57 = vld [vmem:[%s7752_s1 + $0x50] ss:$8 sps:$4 sm:$0xff]   ;;  %v6303_v22 = vld [vmem:[%s7752_s1 + $0x64] ss:$8 sps:$4 sm:$0xff]  }
 0x71b   : > { %v4586_v52 = vrot.slane %v4579_v26, %v7845_v25  ;;  %v6306_v26 = vld [vmem:[%s7752_s1 + $0x74] ss:$8 sps:$4 sm:$0xff]  }
 0x71c   : > { %v4604_v47 = vshrl.u32 %v4537_v27, 16  ;;  %v4610_v13 = vshrl.u32 %v4538_v6, 16  ;;  %4955 = vmatpush1.bf16.msra.mxu1 %v6286_v49 }
 0x71d   : > { %v4588_v9 = vcombine.high %v4578_v14, %v4586_v52  ;;  %v4587_v39 = vcombine.low %v4578_v14, %v4586_v52  ;;  %4956 = vmatprep.subr.bf16.mxu1 %v6291_v19  ;;  %v6308_v14 = vld [vmem:[%s7756_s4] sm:$0xff]   ;;  %v6309_v52 = vld [vmem:[%s7756_s4 + $0x48] sm:$0xff]  }
 0x71f   : > { %v4609_v7 = vpack.i.b16 %v4588_v9, %v4538_v6  ;;  %v4605_v32 = vshrl.u32 %v4587_v39, 16  ;;  %v4611_v55 = vshrl.u32 %v4588_v9, 16  ;;  %v4603_v30 = vpack.i.b16 %v4587_v39, %v4537_v27  ;;  %v6304_v6 = vld [vmem:[%s7752_s1 + $0x70] ss:$8 sps:$4 sm:$0xff]   ;;  %v6307_v27 = vld [vmem:[%s7756_s4 + $0x40] sm:$0xff]  }
 0x720   : > { %4957 = vmatpush1.bf16.msra.mxu1 %v6289_v45  ;;  %5921 = vmatprep.subr.bf16.mxu0 %v6307_v27  ;;  %v6310_v9 = vld [vmem:[%s7756_s4 + $0x8] sm:$0xff]   ;;  %v6311_v39 = vld [vmem:[%s7756_s4 + $0x50] sm:$0xff]  }
 0x721   : > { %4619 = vrot.lane.b32.xlu1 %v4609_v7, %s7029_s27  ;;  %v4606_v21 = vpack.i.b16 %v4605_v32, %v4604_v47  ;;  %v4612_v58 = vpack.i.b16 %v4611_v55, %v4610_v13  ;;  %4958 = vmatprep.subr.bf16.mxu1 %v6294_v2  ;;  %v6312_v47 = vld [vmem:[%s7756_s4 + $0x10] sm:$0xff]   ;;  %v6313_v13 = vld [vmem:[%s7756_s4 + $0x58] sm:$0xff]   ;;  %v6315_v32 = vld [vmem:[%s7756_s4 + $0x60] sm:$0xff]  }
 0x722   : > { %v6314_v7 = vld [vmem:[%s7756_s4 + $0x18] sm:$0xff]   ;;  %v6316_v55 = vld [vmem:[%s7756_s4 + $0x20] sm:$0xff]  }
 0x723   : > { %4615 = vrot.lane.b32.xlu0 %v4606_v21, %s7027_s5 }
 0x724   : > { %4959 = vmatpush1.bf16.msra.mxu1 %v6292_v3  ;;  %v5792_v3 = vld [vmem:[%s978_s2] ss:$0 sm:$0xff] }
 0x725   : > { %4623 = vrot.lane.b32.xlu1 %v4612_v58, %s7028_s20  ;;  %4960 = vmatprep.subr.bf16.mxu1 %v6297_v15 }
 0x727   : > { %4621 = vrot.lane.b32.xlu0 %v8427_v62, %s7028_s20 }
 0x728   : > { %4961 = vmatpush1.bf16.msra.mxu1 %v6295_v29 }
 0x729   : > { %4962 = vmatprep.subr.bf16.mxu1 %v6300_v48 }
 0x72c   : > { %4963 = vmatpush1.bf16.msra.mxu1 %v6298_v57 }
 0x72d   : > { %4964 = vmatprep.subr.bf16.mxu1 %v6303_v22 }
 0x730   : > { %4965 = vmatpush1.bf16.msra.mxu1 %v6301_v56 }
 0x731   : > { %4966 = vmatprep.subr.bf16.mxu1 %v6306_v26 }
 0x734   : > { %4967 = vmatpush1.bf16.msra.mxu1 %v6304_v6 }
 0x759   : > { %v4618_v25 = vpop.permute.xlu1 %4617 }
 0x75d   : > { %v4614_v61 = vpop.permute.xlu1 %4613 }
 0x75e   : > { %v4627_v12 = vsel %vm3147_vm1, %v4591_v36, %v4614_v61  ;;  %v6403_v36 = vld [vmem:[#allocation2] sm:$0xff] }
 0x75f   : > { %v4633_v44 = vsel %vm4631_vm3, %v4627_v12, %v4618_v25 }
 0x793   : > { %v4620_v4 = vpop.permute.xlu1 %4619 }
 0x795   : > { %v4616_v37 = vpop.permute.xlu0 %4615 }
 0x796   : > { %v4630_v41 = vsel %vm3147_vm1, %v4603_v30, %v4616_v37  ;;  %v6317_v30 = vld [vmem:[%s7756_s4 + $0x68] sm:$0xff]  }
 0x797   : > { %v4624_v34 = vpop.permute.xlu1 %4623  ;;  %v4635_v5 = vsel %vm4631_vm3, %v4630_v41, %v4620_v4 }
 0x798   : > { %v4641_v62 = vsel %vm4636_vm4, %v4635_v5, %v4624_v34 }
 0x799   : > { %v4622_v46 = vpop.permute.xlu0 %4621 }
 0x79a   : > { %v4638_v42 = vsel %vm4636_vm4, %v4633_v44, %v4622_v46 }
 0x79b   : > { %6121 = vmatprep.mubr.bf16.mxu0 %v4638_v42 }
 0x79c   : > { %6122 = vmatmul.mubr.bf16.vlgmr.msra.gmra.mrb[24].mxu0 %v4641_v62 }
 0x79d   : > { %5922 = vmatpush3.bf16.msra.mxu0 %v6308_v14  ;;  %v6318_v14 = vld [vmem:[%s7756_s4 + $0x28] sm:$0xff]  }
 0x79e   : > { %5923 = vmatprep.subr.bf16.mxu0 %v6309_v52  ;;  %v6319_v52 = vld [vmem:[%s7756_s4 + $0x70] sm:$0xff]  }
 0x7a1   : > { %5924 = vmatpush3.bf16.msra.mxu0 %v6310_v9  ;;  %v6320_v9 = vld [vmem:[%s7756_s4 + $0x30] sm:$0xff]  }
 0x7a2   : > { %5925 = vmatprep.subr.bf16.mxu0 %v6311_v39  ;;  %v6321_v39 = vld [vmem:[%s7756_s4 + $0x78] sm:$0xff]  }
 0x7a5   : > { %5926 = vmatpush3.bf16.msra.mxu0 %v6312_v47  ;;  %v6322_v47 = vld [vmem:[%s7756_s4 + $0x38] sm:$0xff]  }
 0x7a6   : > { %5927 = vmatprep.subr.bf16.mxu0 %v6313_v13  ;;  %v4860_v13 = vld [vmem:[%s7754_s22] sm:$0x3] }
 0x7a9   : > { %5928 = vmatpush3.bf16.msra.mxu0 %v6314_v7  ;;  %v4868_v7 = vsub.s32 1, %v7823_v0 }
 0x7aa   : > { %5929 = vmatprep.subr.bf16.mxu0 %v6315_v32 }
 0x7ad   : > { %5930 = vmatpush3.bf16.msra.mxu0 %v6316_v55  ;;  %v4869_v55 = vrot.slane %v4860_v13, %v4868_v7 }
 0x7ae   : > { %5931 = vmatprep.subr.bf16.mxu0 %v6317_v30 }
 0x7b1   : > { %5932 = vmatpush3.bf16.msra.mxu0 %v6318_v14 }
 0x7b2   : > { %5933 = vmatprep.subr.bf16.mxu0 %v6319_v52 }
 0x7b5   : > { %5934 = vmatpush3.bf16.msra.mxu0 %v6320_v9 }
 0x7b6   : > { %5935 = vmatprep.subr.bf16.mxu0 %v6321_v39 }
 0x7b9   : > { %5936 = vmatpush3.bf16.msra.mxu0 %v6322_v47 }
 0x86f   : > { %v6123_v51 = vpop.f32.mrb[24].mxu0 }
 0x870   : > { %v4748_v11 = vpop.f32.mrb[25].mxu0  ;;  %v4757_v59 = vadd.f32 %v6123_v51, %v5782_v50 }
 0x871   : > { %v4749_v1 = vadd.f32 %v5782_v50, %v4748_v11  ;;  %v6124_v43 = vpop.f32.mrb[26].mxu0 }
 0x872   : > { %v4751_v23 = vpop.f32.mrb[27].mxu0  ;;  %v8486_v60 = vadd.f32 %v6405_v38, %v4757_v59  ;;  %v4760_v35 = vadd.f32 %v6124_v43, %v5782_v50 }
 0x873   : > { %v8478_v40 = vadd.f32 %v6403_v36, %v4749_v1  ;;  %v4752_v53 = vadd.f32 %v5782_v50, %v4751_v23 }
 0x874   : > { %v4784_v54 = vmul.f32 %v8486_v60, %v8486_v60  ;;  %v8493_v63 = vadd.f32 %v6406_v16, %v4760_v35 }
 0x875   : > { %v8480_v31 = vadd.f32 %v6404_v24, %v4752_v53  ;;  %4769 = vadd.xlane.f32.xlu0 %v8478_v40  ;;  %v4782_v17 = vmul.f32 %v8478_v40, %v8478_v40 }
 0x876   : > { %v4785_v28 = vmul.f32 %v8493_v63, %v8493_v63 }
 0x877   : > { %4771 = vadd.xlane.f32.xlu1 %v8480_v31  ;;  %v4783_v8 = vmul.f32 %v8480_v31, %v8480_v31 }
 0x879   : > { %4786 = vadd.xlane.f32.xlu0 %v4782_v17 }
 0x87b   : > { %4773 = vadd.xlane.f32.xlu1 %v8486_v60 }
 0x87d   : > { %4788 = vadd.xlane.f32.xlu0 %v4783_v8 }
 0x87f   : > { %4790 = vadd.xlane.f32.xlu1 %v4784_v54 }
 0x881   : > { %4775 = vadd.xlane.f32.xlu0 %v8493_v63 }
 0x885   : > { %4792 = vadd.xlane.f32.xlu0 %v4785_v28 }
 0x902   : > { %v4770_v21 = vpop.xlane.xlu0 %4769 }
 0x903   : > { %v4778_v58 = vmul.f32 0.0078125, %v4770_v21 }
 0x904   : > { %v4772_v25 = vpop.xlane.xlu1 %4771 }
 0x905   : > { %v4798_v4 = vmul.f32 %v4778_v58, %v4778_v58  ;;  %v4779_v37 = vmul.f32 0.0078125, %v4772_v25  ;;  %v4814_v8 = vsub.f32 %v8478_v40, %v4778_v58 }
 0x906   : > { %v4787_v61 = vpop.xlane.xlu0 %4786 }
 0x907   : > { %v4794_v12 = vmul.f32 0.0078125, %v4787_v61  ;;  %v4799_v44 = vmul.f32 %v4779_v37, %v4779_v37  ;;  %v4815_v18 = vsub.f32 %v8480_v31, %v4779_v37 }
 0x908   : > { %v4774_v41 = vpop.xlane.xlu1 %4773 }
 0x909   : > { %v4802_v34 = vsub.f32 %v4794_v12, %v4798_v4  ;;  %v4780_v5 = vmul.f32 0.0078125, %v4774_v41 }
 0x90a   : > { %v4789_v46 = vpop.xlane.xlu0 %4788 }
 0x90b   : > { %v4806_v42 = vadd.f32 1e-05, %v4802_v34  ;;  %v4795_v62 = vmul.f32 0.0078125, %v4789_v46  ;;  %v4800_v51 = vmul.f32 %v4780_v5, %v4780_v5  ;;  %v4816_v2 = vsub.f32 %v8486_v60, %v4780_v5 }
 0x90c   : > { %v4791_v50 = vpop.xlane.xlu1 %4790 }
 0x90d   : > { %6387 = vrsqrt.f32 %v4806_v42  ;;  %v4803_v11 = vsub.f32 %v4795_v62, %v4799_v44  ;;  %v4796_v1 = vmul.f32 0.0078125, %v4791_v50 }
 0x90e   : > { %v4776_v43 = vpop.xlane.xlu0 %4775 }
 0x90f   : > { %v4807_v23 = vadd.f32 1e-05, %v4803_v11  ;;  %v4804_v36 = vsub.f32 %v4796_v1, %v4800_v51  ;;  %v4781_v53 = vmul.f32 0.0078125, %v4776_v43 }
 0x911   : > { %6389 = vrsqrt.f32 %v4807_v23  ;;  %v4808_v59 = vadd.f32 1e-05, %v4804_v36  ;;  %v4801_v17 = vmul.f32 %v4781_v53, %v4781_v53  ;;  %v4817_v57 = vsub.f32 %v8493_v63, %v4781_v53 }
 0x912   : > { %v4793_v24 = vpop.xlane.xlu0 %4792 }
 0x913   : > { %6391 = vrsqrt.f32 %v4808_v59  ;;  %v4797_v38 = vmul.f32 0.0078125, %v4793_v24 }
 0x915   : > { %v4805_v35 = vsub.f32 %v4797_v38, %v4801_v17 }
 0x917   : > { %v6388_v54 = vpop.eup %6387  ;;  %v4809_v16 = vadd.f32 1e-05, %v4805_v35 }
 0x918   : > { %v4818_v28 = vmul.f32 %v6388_v54, %v4814_v8  ;;  %v5809_v8 = vld [vmem:[%s1013_s14] ss:$0 sm:$0xff] }
 0x919   : > { %6393 = vrsqrt.f32 %v4809_v16 }
 0x91a   : > { %v4828_v19 = vmul.f32 %v5791_v33, %v4818_v28 }
 0x91b   : > { %v6390_v20 = vpop.eup %6389 }
 0x91c   : > { %v4819_v49 = vmul.f32 %v6390_v20, %v4815_v18  ;;  %v8532_v29 = vadd.f32 %v5792_v3, %v4828_v19 }
 0x91d   : > { %v6392_v45 = vpop.eup %6391 }
 0x91e   : > { %v4829_v15 = vmul.f32 %v5791_v33, %v4819_v49  ;;  %v4820_v48 = vmul.f32 %v6392_v45, %v4816_v2 }
 0x920   : > { %v8534_v40 = vadd.f32 %v5792_v3, %v4829_v15  ;;  %v4830_v60 = vmul.f32 %v5791_v33, %v4820_v48 }
 0x922   : > { %v4842_v31 = vpack.c.bf16 %v8534_v40, %v8532_v29  ;;  %v8540_v6 = vadd.f32 %v5792_v3, %v4830_v60 }
 0x923   : > { %v6394_v22 = vpop.eup %6393 }
 0x924   : > { %4985 = vmatmul.mubr.bf16.vlgmr.msra.gmra.mrb[52].mxu1 %v4842_v31  ;;  %v4821_v56 = vmul.f32 %v6394_v22, %v4817_v57 }
 0x925   : > { %4994 = vmatprep.mubr.bf16.mxu1 %v7034_v10  ;;  %v4864_v10 = vsub.s32 0, %v7823_v0 }
 0x926   : > { %v4831_v26 = vmul.f32 %v5791_v33, %v4821_v56 }
 0x927   : > { %v4865_v32 = vrot.slane %v4860_v13, %v4864_v10 }
 0x928   : > { %v8542_v27 = vadd.f32 %v5792_v3, %v4831_v26 }
 0x92a   : > { %v4843_v63 = vpack.c.bf16 %v8542_v27, %v8540_v6 }
 0x92c   : > { %4995 = vmatmul.mubr.bf16.gmra.mrb[56].mxu1 %v4843_v63 }
 0x9f7   : > { %v4986_v30 = vpop.f32.mrb[52].mxu1 }
 0x9f8   : > { %v4987_v21 = vadd.f32 %v4986_v30, %v4865_v32  ;;  %v4988_v58 = vpop.f32.mrb[53].mxu1 }
 0x9f9   : > { %v4989_v25 = vadd.f32 %v4988_v58, %v4869_v55  ;;  %v4990_v61 = vpop.f32.mrb[54].mxu1 }
 0x9fa   : > { %v4991_v4 = vadd.f32 %v4990_v61, %v4865_v32  ;;  %v4992_v37 = vpop.f32.mrb[55].mxu1  ;;  %v5005_v41 = vmax.f32 %v4987_v21, 0.0 }
 0x9fb   : > { %v4993_v12 = vadd.f32 %v4992_v37, %v4869_v55  ;;  %v5006_v5 = vmax.f32 %v4989_v25, 0.0 }
 0x9fc   : > { %v5007_v34 = vmax.f32 %v4991_v4, 0.0 }
 0x9fd   : > { %v5008_v46 = vmax.f32 %v4993_v12, 0.0 }
 0x9fe   : > { %v5013_v44 = vpack.c.bf16 %v5007_v34, %v5005_v41 }
 0x9ff   : > { %v5014_v42 = vpack.c.bf16 %v5008_v46, %v5006_v5  ;;  %v4996_v62 = vpop.f32.mrb[56].mxu1 }
 0xa00   : > { %v4997_v50 = vadd.f32 %v4996_v62, %v4865_v32  ;;  %v4998_v51 = vpop.f32.mrb[57].mxu1 }
 0xa01   : > { %v4999_v0 = vadd.f32 %v4998_v51, %v4869_v55  ;;  %v5000_v11 = vpop.f32.mrb[58].mxu1  ;;  %5184 = vmatprep.mubr.bf16.mxu0 %v5014_v42 }
 0xa02   : > { %v5001_v1 = vadd.f32 %v5000_v11, %v4865_v32  ;;  %v5002_v43 = vpop.f32.mrb[59].mxu1  ;;  %5185 = vmatmul.mubr.bf16.vlgmr.msra.gmra.mrb[28].mxu0 %v5013_v44  ;;  %v5009_v36 = vmax.f32 %v4997_v50, 0.0 }
 0xa03   : > { %v5003_v23 = vadd.f32 %v5002_v43, %v4869_v55  ;;  %v5010_v59 = vmax.f32 %v4999_v0, 0.0 }
 0xa04   : > { %v5011_v53 = vmax.f32 %v5001_v1, 0.0  ;;  %v5826_v1 = vld [vmem:[%s1021_s19] ss:$0 sm:$0xff] }
 0xa05   : > { %v5012_v24 = vmax.f32 %v5003_v23, 0.0 }
 0xa06   : > { %v5015_v17 = vpack.c.bf16 %v5011_v53, %v5009_v36  ;;  %v5827_v53 = vld [vmem:[%s1029_s30] ss:$0 sm:$0xff] }
 0xa07   : > { %v5016_v38 = vpack.c.bf16 %v5012_v24, %v5010_v59 }
 0xa09   : > { %5192 = vmatprep.mubr.bf16.mxu0 %v5016_v38 }
 0xa0a   : > { %5193 = vmatmul.mubr.bf16.gmra.mrb[32].mxu0 %v5015_v17 }
 0xad5   : > { %v5937_v35 = vpop.f32.mrb[28].mxu0 }
 0xad6   : > { %v5938_v54 = vpop.f32.mrb[29].mxu0 }
 0xad7   : > { %v5939_v16 = vadd.f32 %v5938_v54, %v5937_v35  ;;  %v5940_v28 = vpop.f32.mrb[30].mxu0 }
 0xad8   : > { %v5941_v33 = vpop.f32.mrb[31].mxu0 }
 0xad9   : > { %v5187_v18 = vadd.f32 %v5939_v16, %v5809_v8  ;;  %v5942_v20 = vadd.f32 %v5941_v33, %v5940_v28 }
 0xadb   : > { %v5190_v49 = vadd.f32 %v5942_v20, %v5809_v8  ;;  %v5201_v19 = vadd.f32 %v5187_v18, %v8532_v29 }
 0xadd   : > { %v5943_v45 = vpop.f32.mrb[32].mxu0  ;;  %5207 = vadd.xlane.f32.xlu1 %v5201_v19  ;;  %v5202_v3 = vadd.f32 %v5190_v49, %v8534_v40  ;;  %v5219_v57 = vmul.f32 %v5201_v19, %v5201_v19 }
 0xade   : > { %v5944_v2 = vpop.f32.mrb[33].mxu0 }
 0xadf   : > { %v5945_v15 = vadd.f32 %v5944_v2, %v5943_v45  ;;  %v5946_v48 = vpop.f32.mrb[34].mxu0  ;;  %5209 = vadd.xlane.f32.xlu0 %v5202_v3  ;;  %v5220_v60 = vmul.f32 %v5202_v3, %v5202_v3 }
 0xae0   : > { %v5947_v31 = vpop.f32.mrb[35].mxu0 }
 0xae1   : > { %v5195_v22 = vadd.f32 %v5945_v15, %v5809_v8  ;;  %v5948_v56 = vadd.f32 %v5947_v31, %v5946_v48  ;;  %5223 = vadd.xlane.f32.xlu1 %v5219_v57 }
 0xae3   : > { %v5198_v26 = vadd.f32 %v5948_v56, %v5809_v8  ;;  %5225 = vadd.xlane.f32.xlu0 %v5220_v60  ;;  %v5203_v63 = vadd.f32 %v5195_v22, %v8540_v6 }
 0xae5   : > { %5211 = vadd.xlane.f32.xlu1 %v5203_v63  ;;  %v5204_v29 = vadd.f32 %v5198_v26, %v8542_v27  ;;  %v5221_v14 = vmul.f32 %v5203_v63, %v5203_v63 }
 0xae7   : > { %5213 = vadd.xlane.f32.xlu0 %v5204_v29  ;;  %v5222_v40 = vmul.f32 %v5204_v29, %v5204_v29 }
 0xae9   : > { %5227 = vadd.xlane.f32.xlu1 %v5221_v14 }
 0xaeb   : > { %5229 = vadd.xlane.f32.xlu0 %v5222_v40 }
 0xb6a   : > { %v5208_v52 = vpop.xlane.xlu1 %5207 }
 0xb6b   : > { %v5215_v9 = vmul.f32 0.0078125, %v5208_v52 }
 0xb6c   : > { %v5210_v39 = vpop.xlane.xlu0 %5209 }
 0xb6d   : > { %v5216_v47 = vmul.f32 0.0078125, %v5210_v39  ;;  %v5235_v13 = vmul.f32 %v5215_v9, %v5215_v9  ;;  %v5251_v0 = vsub.f32 %v5201_v19, %v5215_v9 }
 0xb6e   : > { %v5224_v10 = vpop.xlane.xlu1 %5223 }
 0xb6f   : > { %v5231_v7 = vmul.f32 0.0078125, %v5224_v10  ;;  %v5236_v55 = vmul.f32 %v5216_v47, %v5216_v47  ;;  %v5252_v43 = vsub.f32 %v5202_v3, %v5216_v47 }
 0xb70   : > { %v5226_v32 = vpop.xlane.xlu0 %5225 }
 0xb71   : > { %v5239_v30 = vsub.f32 %v5231_v7, %v5235_v13  ;;  %v5232_v21 = vmul.f32 0.0078125, %v5226_v32 }
 0xb72   : > { %v5212_v6 = vpop.xlane.xlu1 %5211 }
 0xb73   : > { %v5243_v58 = vadd.f32 1e-05, %v5239_v30  ;;  %v5240_v25 = vsub.f32 %v5232_v21, %v5236_v55  ;;  %v5217_v27 = vmul.f32 0.0078125, %v5212_v6 }
 0xb74   : > { %v5214_v61 = vpop.xlane.xlu0 %5213 }
 0xb75   : > { %6395 = vrsqrt.f32 %v5243_v58  ;;  %v5244_v4 = vadd.f32 1e-05, %v5240_v25  ;;  %v5218_v37 = vmul.f32 0.0078125, %v5214_v61  ;;  %v5237_v41 = vmul.f32 %v5217_v27, %v5217_v27 }
 0xb76   : > { %v5228_v12 = vpop.xlane.xlu1 %5227  ;;  %v5253_v8 = vsub.f32 %v5203_v63, %v5217_v27 }
 0xb77   : > { %6397 = vrsqrt.f32 %v5244_v4  ;;  %v5233_v34 = vmul.f32 0.0078125, %v5228_v12  ;;  %v5238_v46 = vmul.f32 %v5218_v37, %v5218_v37  ;;  %v5254_v16 = vsub.f32 %v5204_v29, %v5218_v37 }
 0xb78   : > { %v5230_v5 = vpop.xlane.xlu0 %5229 }
 0xb79   : > { %v5241_v44 = vsub.f32 %v5233_v34, %v5237_v41  ;;  %v5234_v42 = vmul.f32 0.0078125, %v5230_v5 }
 0xb7b   : > { %v5245_v62 = vadd.f32 1e-05, %v5241_v44  ;;  %v5242_v50 = vsub.f32 %v5234_v42, %v5238_v46 }
 0xb7d   : > { %6399 = vrsqrt.f32 %v5245_v62  ;;  %v5246_v51 = vadd.f32 1e-05, %v5242_v50 }
 0xb7f   : > { %v6396_v11 = vpop.eup %6395  ;;  %6401 = vrsqrt.f32 %v5246_v51 }
 0xb80   : > { %v5255_v23 = vmul.f32 %v6396_v11, %v5251_v0 }
 0xb81   : > { %v6398_v36 = vpop.eup %6397 }
 0xb82   : > { %v5265_v59 = vmul.f32 %v5826_v1, %v5255_v23  ;;  %v5256_v24 = vmul.f32 %v6398_v36, %v5252_v43 }
 0xb84   : > { %v5275_v17 = vadd.f32 %v5827_v53, %v5265_v59  ;;  %v5266_v38 = vmul.f32 %v5826_v1, %v5256_v24 }
 0xb86   : > { %5279 = vst [vmem:[#allocation2] sm:$0xff] %v5275_v17  ;;  %v5276_v35 = vadd.f32 %v5827_v53, %v5266_v38  ;;  %5287 = vst [vmem:[#allocation24] sm:$0xff] (!%p5828_p1), %v5275_v17 }
 0xb87   : > { %v6400_v54 = vpop.eup %6399 }
 0xb88   : > { %5280 = vst [vmem:[#allocation2 + $0x8] sm:$0xff] %v5276_v35  ;;  %v5257_v28 = vmul.f32 %v6400_v54, %v5253_v8  ;;  %5288 = vst [vmem:[#allocation24 + $0x8] sm:$0xff] (!%p5828_p1), %v5276_v35 }
 0xb89   : > { %v6402_v33 = vpop.eup %6401 }
 0xb8a   : > { %v5267_v18 = vmul.f32 %v5826_v1, %v5257_v28  ;;  %v5258_v20 = vmul.f32 %v6402_v33, %v5254_v16  ;;  %5286 = sbr.rel (%p5828_p1) target bundleno = 2961 (0xb91), region = 172 }
 0xb8c   : > { %v5277_v49 = vadd.f32 %v5827_v53, %v5267_v18  ;;  %v5268_v19 = vmul.f32 %v5826_v1, %v5258_v20 }
 0xb8e   : > { %5281 = vst [vmem:[#allocation2 + $0x10] sm:$0xff] %v5277_v49  ;;  %v5278_v45 = vadd.f32 %v5827_v53, %v5268_v19  ;;  %5289 = vst [vmem:[#allocation24 + $0x10] sm:$0xff] (!%p5828_p1), %v5277_v49 }
 0xb90   : > { %5282 = vst [vmem:[#allocation2 + $0x18] sm:$0xff] %v5278_v45  ;;  %5290 = vst [vmem:[#allocation24 + $0x18] sm:$0xff] (!%p5828_p1), %v5278_v45 }
 0xb91 PF: > { %s8713_s25 = sld [smem:[#allocation33_spill]]  ;;  %s7035_s30 = smov [#allocation24]  }
 0xb92   : > { %s5301_s29 = sshll.u32 %s7035_s30, 4  ;;  %s5302_s29 = int_to_ptr.vmem [resolvable:$true] %s5301_s29 }
 0xb93   : > { %s6911_s13 = scalar_lea.vmem %s5302_s29, 512  ;;  %p6918_p7 = scmp.lt.s32.totalorder %s5302_s29, %s5302_s29 }
 0xb94   : > { %p6912_p5 = scmp.ne.s32.totalorder %s5302_s29, %s6911_s13  ;;  %p6919_p6 = scmp.lt.s32.totalorder %s6911_s13, %s6911_s13 }
 0xb96   : > { %p6920_p4 = por %p6919_p6, %p6918_p7 }
 0xb97   : > { %p6180_p8 = scmp.eq.s32.totalorder %s8713_s25, 1 }
 0xb99   : > { %p6913_p2 = pnand %p6912_p5, %p6180_p8 }
 0xb9b   : > { %p6914_p10 = pneg %p6913_p2 }
 0xb9d   : > { %p6921_p9 = pnand %p6920_p4, %p6914_p10 }
 0xb9f   : > { %6924 = shalt.err (!%p6921_p9)
}
 0xba0   : > { %s8714_s23 = sld [smem:[#allocation50_spill]] }
 0xba6   : > { %s6925_s6 = scalar_lea.hbm %s8714_s23, 512 }
 0xba7   : > { %p6926_p11 = scmp.ne.s32.totalorder %s8714_s23, %s6925_s6  ;;  %p6931_p0 = scmp.lt.u32.totalorder %s6925_s6, %s8714_s23 }
 0xba9   : > { %p6927_p3 = pnand %p6926_p11, %p6180_p8 }
 0xbab   : > { %p6928_p12 = pneg %p6927_p3 }
 0xbad   : > { %p6933_p13 = pnand %p6931_p0, %p6928_p12 }
 0xbaf   : > { %6936 = shalt.err (!%p6933_p13)
}
 0xbb0   : > { %s7036_s4 = smov 128   ;;  %s7037_s14 = smov 8  }
 0xbb1   : > { %6166 = dma.vmem_to_hbm [thread:$0]  (%p6180_p8), %s5302_s29, 512, %s8714_s23, [#allocation5], %s7036_s4, %s7036_s4, %s7037_s14  }
 0xbb2   : > { %6974 = dma.done.wait (%p6180_p8), [#allocation5], 512  }
 0xbb3   : > { %6976 = vsyncadd (%p6180_p8), [#allocation5], 4294966784 }
 0xbb4 PF: > { %s8715_s5 = sld [smem:[#allocation32_spill]]  ;;  %s8716_s27 = sld [smem:[#allocation29_spill]] }
 0xbb5   : > { %s8717_s28 = sld [smem:[#allocation30_spill]]  ;;  %s8718_s29 = sld [smem:[#allocation36_spill]] }
 0xbb6   : > { %s8719_s20 = sld [smem:[#allocation34_spill]]  ;;  %s8720_s30 = smov %s6995_s0 }
 0xbba   : > { %s31_s19 = sadd.s32 1, %s8715_s5  }
 0xbbb   : > { %p28_p1 = scmp.ge.s32.totalorder %s31_s19, 4  }
 0xbbc   : > { %s8721_s0 = smov %s8719_s20 }
 0xbbd   :  { %30 = sbr.rel (!%p28_p1) target bundleno = 19 (0x13), region = 312 }
 0xbc4   :  { %5317 = vsyncpa [#allocation4], 1 }
 0xbc5   :  { %5319 = vsyncpa [#allocation4 + $0x1], 1 }
 0xbc6   :  { %5320 = vsyncpa [#allocation7], 1 }
 0xbc7   :  { %5321 = vsyncpa [#allocation5], 1 }
 0xbc8   :  { %5323 = vsyncpa [#allocation5 + $0x1], 1 }

</bundles_post_ra>
